<compile_context>
chip_gen: v7x
topology: tpu7x:2x2x1
jax: 0.10.0
libtpu: 0.0.40
codegen_flags: <defaults>
</compile_context>

<pallas_src>
import functools

import jax
import jax.numpy as jnp
from jax.experimental import pallas as pl
from jax.experimental.pallas import tpu as pltpu

LANE = 128                      # TPU lane width: channels padded to multiples of this
TM = 256                        # matmul M tile
TM_E = 256                      # epilogue M tile
VMEM_LIMIT = 48 * 1024 * 1024   # explicit budget (~75% of v7x's 64 MiB physical VMEM)
BN_EPS = 1e-5
LEAKY_SLOPE = 0.1


def _round_up(x, m):
    return (x + m - 1) // m * m


def _pad_rows(x, mult):
    pad = (-x.shape[0]) % mult
    return x if pad == 0 else jnp.pad(x, ((0, pad), (0, 0)))


# ---------------------------------------------------------------------------
# Kernel 1: tiled matmul (bf16 in, f32 accumulate) fused with per-tile
# BatchNorm statistics (per-channel sum and sum-of-squares).
# grid = (Mp//TM, Np//TN, Kp//TK); K is the reduction ("arbitrary") axis.
# ---------------------------------------------------------------------------
def _mm_stats_kernel(a_ref, b_ref, y_ref, sum_ref, ssq_ref, acc_ref):
    @pl.when(pl.program_id(2) == 0)
    def _():
        acc_ref[...] = jnp.zeros_like(acc_ref)

    acc_ref[...] += jnp.dot(a_ref[...], b_ref[...],
                            preferred_element_type=jnp.float32)

    @pl.when(pl.program_id(2) == pl.num_programs(2) - 1)
    def _():
        acc = acc_ref[...]
        y_ref[...] = acc.astype(y_ref.dtype)
        s = jnp.sum(acc, axis=0, keepdims=True)          # (1, TN)
        q = jnp.sum(acc * acc, axis=0, keepdims=True)    # (1, TN)
        # Stats outputs are (1, 8, TN) sublane-aligned blocks; only row 0 is read back.
        sum_ref[...] = jnp.broadcast_to(s[None], sum_ref.shape)
        ssq_ref[...] = jnp.broadcast_to(q[None], ssq_ref.shape)


def _matmul_with_stats(a_bf16, b_bf16):
    """a: (Mp, Kp) bf16, b: (Kp, Np) bf16; Mp % TM == 0, Kp/Np multiples of 128.
    Returns y (Mp, Np) f32 plus per-channel sum / sum-of-squares over all rows."""
    Mp, Kp = a_bf16.shape
    Kp2, Np = b_bf16.shape
    assert Kp == Kp2 and Mp % TM == 0 and Kp % LANE == 0 and Np % LANE == 0
    tn = 256 if Np % 256 == 0 else LANE
    tk = next(t for t in (512, 384, 256, LANE) if Kp % t == 0)
    n_mt = Mp // TM
    y, psum, pssq = pl.pallas_call(
        _mm_stats_kernel,
        out_shape=(jax.ShapeDtypeStruct((Mp, Np), jnp.float32),
                   jax.ShapeDtypeStruct((n_mt, 8, Np), jnp.float32),
                   jax.ShapeDtypeStruct((n_mt, 8, Np), jnp.float32)),
        grid_spec=pltpu.PrefetchScalarGridSpec(
            num_scalar_prefetch=0,
            grid=(n_mt, Np // tn, Kp // tk),
            in_specs=[pl.BlockSpec((TM, tk), lambda i, j, k: (i, k)),
                      pl.BlockSpec((tk, tn), lambda i, j, k: (k, j))],
            out_specs=[pl.BlockSpec((TM, tn), lambda i, j, k: (i, j)),
                       pl.BlockSpec((1, 8, tn), lambda i, j, k: (i, 0, j)),
                       pl.BlockSpec((1, 8, tn), lambda i, j, k: (i, 0, j))],
            scratch_shapes=[pltpu.VMEM((TM, tn), jnp.float32)]),
        compiler_params=pltpu.CompilerParams(
            dimension_semantics=("parallel", "parallel", "arbitrary"),
            vmem_limit_bytes=VMEM_LIMIT),
    )(a_bf16, b_bf16)
    chan_sum = psum[:, 0, :].sum(axis=0)    # (Np,) tiny reduction in plain JAX
    chan_ssq = pssq[:, 0, :].sum(axis=0)
    return y, chan_sum, chan_ssq


# ---------------------------------------------------------------------------
# Kernel 2: tiled BatchNorm-affine + LeakyReLU (+ optional residual) epilogue.
# Two variants so non-residual layers never stream a zero residual from HBM.
# ---------------------------------------------------------------------------
def _affine_act_res_kernel(y_ref, s_ref, b_ref, r_ref, o_ref):
    z = y_ref[...] * s_ref[...] + b_ref[...]
    z = jnp.where(z > 0, z, LEAKY_SLOPE * z)
    o_ref[...] = z + r_ref[...]


def _affine_act_kernel(y_ref, s_ref, b_ref, o_ref):
    z = y_ref[...] * s_ref[...] + b_ref[...]
    o_ref[...] = jnp.where(z > 0, z, LEAKY_SLOPE * z)


def _bn_act_res(y, chan_sum, chan_ssq, gamma_p, beta_p, m_true, residual=None):
    Mp, Np = y.shape
    inv_m = 1.0 / float(m_true)                    # true row count: padded rows excluded
    mean = chan_sum * inv_m
    var = jnp.maximum(chan_ssq * inv_m - mean * mean, 0.0)   # E[x^2] - E[x]^2
    scale = gamma_p * jax.lax.rsqrt(var + BN_EPS)
    shift = beta_p - mean * scale
    scale = scale.reshape(1, Np).astype(jnp.float32)
    shift = shift.reshape(1, Np).astype(jnp.float32)

    row_spec = pl.BlockSpec((TM_E, Np), lambda i: (i, 0))
    vec_spec = pl.BlockSpec((1, Np), lambda i: (0, 0))
    cparams = pltpu.CompilerParams(dimension_semantics=("parallel",),
                                   vmem_limit_bytes=VMEM_LIMIT)
    if residual is None:
        return pl.pallas_call(
            _affine_act_kernel,
            out_shape=jax.ShapeDtypeStruct((Mp, Np), jnp.float32),
            grid_spec=pltpu.PrefetchScalarGridSpec(
                num_scalar_prefetch=0, grid=(Mp // TM_E,),
                in_specs=[row_spec, vec_spec, vec_spec],
                out_specs=row_spec),
            compiler_params=cparams,
        )(y, scale, shift)
    return pl.pallas_call(
        _affine_act_res_kernel,
        out_shape=jax.ShapeDtypeStruct((Mp, Np), jnp.float32),
        grid_spec=pltpu.PrefetchScalarGridSpec(
            num_scalar_prefetch=0, grid=(Mp // TM_E,),
            in_specs=[row_spec, vec_spec, vec_spec, row_spec],
            out_specs=row_spec),
        compiler_params=cparams,
    )(y, scale, shift, residual)


# ---------------------------------------------------------------------------
# CNNBlock glue: conv-as-matmul (bf16) + fused stats + tiled BN/act/res epilogue.
# ---------------------------------------------------------------------------
def conv_bn_act(a_bf16, params, m_true, residual=None):
    """a_bf16: (M, Kp) bf16 activation / im2col matrix (channels already 128-padded).
    params['w']: pre-padded bf16 (Kp, Np) weights. Returns (M, Np) f32."""
    a_p = _pad_rows(a_bf16, TM)                       # zero rows: no effect on BN stats
    y, s, q = _matmul_with_stats(a_p, params["w"])
    res_p = None if residual is None else _pad_rows(residual, TM)
    out = _bn_act_res(y, s, q, params["gamma"], params["beta"], m_true, res_p)
    return out[:m_true]                               # slice padded M rows; keep padded lanes


def im2col_3x3(x_flat, n, h, w):
    """(N*H*W, Cp) -> (N*H*W, 9*Cp) patches for a 3x3 / stride-1 / pad-1 conv (bf16)."""
    # TODO(synk): fold the 9 tap offsets into the matmul reduction grid (shifted NHWC
    # windows via BlockSpec / manual DMA) to avoid materializing the 9x patch blow-up.
    cp = x_flat.shape[1]
    x = x_flat.reshape(n, h, w, cp)
    xp = jnp.pad(x, ((0, 0), (1, 1), (1, 1), (0, 0)))
    taps = [xp[:, dy:dy + h, dx:dx + w, :] for dy in range(3) for dx in range(3)]
    patches = jnp.stack(taps, axis=3)                 # (N, H, W, 9, Cp)
    return patches.reshape(n * h * w, 9 * cp)


@functools.partial(jax.jit, static_argnames=("use_residual",))
def residual_block_forward(params, x_nchw, use_residual=True):
    n, c, h, w = x_nchw.shape
    cp = _round_up(c, LANE)
    m = n * h * w
    x = jnp.transpose(x_nchw, (0, 2, 3, 1)).reshape(m, c).astype(jnp.float32)
    if cp != c:
        x = jnp.pad(x, ((0, 0), (0, cp - c)))         # lane-dense channels; pads stay 0
    for p1, p2 in params:
        hmid = conv_bn_act(x.astype(jnp.bfloat16), p1, m)           # 1x1: C -> C/2
        patches = im2col_3x3(hmid.astype(jnp.bfloat16), n, h, w)    # 3x3 taps (bf16)
        x = conv_bn_act(patches, p2, m,
                        residual=x if use_residual else None)       # 3x3: C/2 -> C (+x)
    out = x[:, :c].reshape(n, h, w, c)
    return jnp.transpose(out, (0, 3, 1, 2))           # back to NCHW


# ---------------------------------------------------------------------------
# Parameters (deterministic synthetic) — weights pre-padded and pre-cast to bf16.
# ---------------------------------------------------------------------------
def init_cnn_params(key, cin, cout, k):
    kw_, kg, kb = jax.random.split(key, 3)
    cin_p, cout_p = _round_up(cin, LANE), _round_up(cout, LANE)
    fan_in = cin * k * k
    w = jax.random.normal(kw_, (k, k, cin, cout), jnp.float32) / jnp.sqrt(fan_in)
    w_p = jnp.zeros((k, k, cin_p, cout_p), jnp.float32).at[:, :, :cin, :cout].set(w)
    gamma = 1.0 + 0.1 * jax.random.normal(kg, (cout,), jnp.float32)
    beta = 0.1 * jax.random.normal(kb, (cout,), jnp.float32)
    gamma_p = jnp.ones((cout_p,), jnp.float32).at[:cout].set(gamma)
    beta_p = jnp.zeros((cout_p,), jnp.float32).at[:cout].set(beta)
    return {"w": w_p.reshape(k * k * cin_p, cout_p).astype(jnp.bfloat16),
            "gamma": gamma_p, "beta": beta_p,
            "w_full": w}                              # unpadded f32 copy for the reference


def build_residual_block_params(key, channels, num_repeats):
    reps = []
    for _ in range(num_repeats):
        key, k1, k2 = jax.random.split(key, 3)
        reps.append((init_cnn_params(k1, channels, channels // 2, 1),
                     init_cnn_params(k2, channels // 2, channels, 3)))
    return reps


# ---------------------------------------------------------------------------
# Pure-JAX reference (same bf16 quantization of the MXU inputs, f32 everywhere else).
# ---------------------------------------------------------------------------
def ref_cnn_block(x_nhwc, w, gamma, beta, pad):
    xq = x_nhwc.astype(jnp.bfloat16).astype(jnp.float32)
    wq = w.astype(jnp.bfloat16).astype(jnp.float32)
    y = jax.lax.conv_general_dilated(xq, wq, (1, 1), [(pad, pad), (pad, pad)],
                                     dimension_numbers=("NHWC", "HWIO", "NHWC"))
    mean = y.mean(axis=(0, 1, 2))
    var = y.var(axis=(0, 1, 2))
    z = (y - mean) * jax.lax.rsqrt(var + BN_EPS) * gamma + beta
    return jnp.where(z > 0, z, LEAKY_SLOPE * z)


def ref_residual_block(params, x_nchw, use_residual=True):
    x = jnp.transpose(x_nchw, (0, 2, 3, 1))
    for p1, p2 in params:
        c1 = p1["w_full"].shape[-1]
        c2 = p2["w_full"].shape[-1]
        hmid = ref_cnn_block(x, p1["w_full"], p1["gamma"][:c1], p1["beta"][:c1], pad=0)
        y = ref_cnn_block(hmid, p2["w_full"], p2["gamma"][:c2], p2["beta"][:c2], pad=1)
        x = y + x if use_residual else y
    return jnp.transpose(x, (0, 3, 1, 2))


if __name__ == "__main__":
    key = jax.random.PRNGKey(0)
    key, kx = jax.random.split(key)
    N, C, H, W = 2, 64, 16, 16
    num_repeats = 2
    x = jax.random.normal(kx, (N, C, H, W), jnp.float32)
    params = build_residual_block_params(key, C, num_repeats)

    out = residual_block_forward(params, x, use_residual=True)
    out = jax.block_until_ready(out)
    assert out.shape == (N, C, H, W), out.shape

    ref = ref_residual_block(params, x, use_residual=True)
    err = float(jnp.max(jnp.abs(out - ref)))
    assert jnp.allclose(out, ref, atol=2e-2, rtol=2e-2), err

    print("KERNEL_OK")
</pallas_src>

<mosaic_0001>
module attributes {stable_mosaic.version = 11 : i64} {
  func.func @_mm_stats_kernel(%arg0: i32, %arg1: i32, %arg2: i32, %arg3: memref<256x128xbf16, #tpu.memory_space<vmem>>, %arg4: memref<128x128xbf16, #tpu.memory_space<vmem>>, %arg5: memref<256x128xf32, #tpu.memory_space<vmem>>, %arg6: memref<1x8x128xf32, #tpu.memory_space<vmem>>, %arg7: memref<1x8x128xf32, #tpu.memory_space<vmem>>, %arg8: memref<256x128xf32, #tpu.memory_space<vmem>>) attributes {dimension_semantics = [#tpu.dimension_semantics<parallel>, #tpu.dimension_semantics<parallel>, #tpu.dimension_semantics<arbitrary>], iteration_bounds = array<i64: 2, 1, 1>, scalar_prefetch = 0 : i64, scratch_operands = 1 : i64, tpu.core_type = #tpu.core_type<tc>, window_params = [{transform_indices = @transform_0, window_bounds = array<i64: 256, 128>}, {transform_indices = @transform_1, window_bounds = array<i64: 128, 128>}, {transform_indices = @transform_2, window_bounds = array<i64: 256, 128>}, {transform_indices = @transform_3, window_bounds = array<i64: 1, 8, 128>}, {transform_indices = @transform_4, window_bounds = array<i64: 1, 8, 128>}]} {
    %c0_i32 = arith.constant 0 : i32
    %0 = arith.cmpi eq, %arg2, %c0_i32 : i32
    %1 = arith.extui %0 : i1 to i32
    %c0_i32_0 = arith.constant 0 : i32
    %2 = arith.cmpi ne, %1, %c0_i32_0 : i32
    scf.if %2 {
      %cst_10 = arith.constant 0.000000e+00 : f32
      %12 = vector.broadcast %cst_10 : f32 to vector<256x128xf32>
      %c0_11 = arith.constant 0 : index
      %c0_12 = arith.constant 0 : index
      %13 = vector.load %arg8[%c0_11, %c0_12] : memref<256x128xf32, #tpu.memory_space<vmem>>, vector<256x128xf32>
      tpu.vector_store %arg8[%c0_11, %c0_12], %12 {strides = array<i32>} : memref<256x128xf32, #tpu.memory_space<vmem>>, vector<256x128xf32>,
    } else {
    }
    %c0 = arith.constant 0 : index
    %c0_1 = arith.constant 0 : index
    %3 = vector.load %arg8[%c0, %c0_1] : memref<256x128xf32, #tpu.memory_space<vmem>>, vector<256x128xf32>
    %c0_2 = arith.constant 0 : index
    %c0_3 = arith.constant 0 : index
    %4 = vector.load %arg3[%c0_2, %c0_3] : memref<256x128xbf16, #tpu.memory_space<vmem>>, vector<256x128xbf16>
    %c0_4 = arith.constant 0 : index
    %c0_5 = arith.constant 0 : index
    %5 = vector.load %arg4[%c0_4, %c0_5] : memref<128x128xbf16, #tpu.memory_space<vmem>>, vector<128x128xbf16>
    %cst = arith.constant dense<0.000000e+00> : vector<256x128xf32>
    %6 = tpu.matmul %4, %5, %cst {dimension_numbers = #tpu.dot_dimension_numbers<[1], [0], [0], [1], [0, 0, 1, 1], [], []>} : vector<256x128xbf16>, vector<128x128xbf16>, vector<256x128xf32> -> vector<256x128xf32>
    %7 = arith.addf %3, %6 : vector<256x128xf32>
    %c0_6 = arith.constant 0 : index
    %c0_7 = arith.constant 0 : index
    %8 = vector.load %arg8[%c0_6, %c0_7] : memref<256x128xf32, #tpu.memory_space<vmem>>, vector<256x128xf32>
    tpu.vector_store %arg8[%c0_6, %c0_7], %7 {strides = array<i32>} : memref<256x128xf32, #tpu.memory_space<vmem>>, vector<256x128xf32>,
    %c0_i32_8 = arith.constant 0 : i32
    %9 = arith.cmpi eq, %arg2, %c0_i32_8 : i32
    %10 = arith.extui %9 : i1 to i32
    %c0_i32_9 = arith.constant 0 : i32
    %11 = arith.cmpi ne, %10, %c0_i32_9 : i32
    scf.if %11 {
      %c0_10 = arith.constant 0 : index
      %c0_11 = arith.constant 0 : index
      %12 = vector.load %arg8[%c0_10, %c0_11] : memref<256x128xf32, #tpu.memory_space<vmem>>, vector<256x128xf32>
      %c0_12 = arith.constant 0 : index
      %c0_13 = arith.constant 0 : index
      %13 = vector.load %arg5[%c0_12, %c0_13] : memref<256x128xf32, #tpu.memory_space<vmem>>, vector<256x128xf32>
      tpu.vector_store %arg5[%c0_12, %c0_13], %12 {strides = array<i32>} : memref<256x128xf32, #tpu.memory_space<vmem>>, vector<256x128xf32>,
      %cst_14 = arith.constant dense<0.000000e+00> : vector<128xf32>
      %14 = vector.multi_reduction <add>, %12, %cst_14 [0] : vector<256x128xf32> to vector<128xf32>
      %15 = vector.shape_cast %14 : vector<128xf32> to vector<1x128xf32>
      %16 = arith.mulf %12, %12 : vector<256x128xf32>
      %cst_15 = arith.constant dense<0.000000e+00> : vector<128xf32>
      %17 = vector.multi_reduction <add>, %16, %cst_15 [0] : vector<256x128xf32> to vector<128xf32>
      %18 = vector.shape_cast %17 : vector<128xf32> to vector<1x128xf32>
      %19 = vector.shape_cast %15 : vector<1x128xf32> to vector<1x1x128xf32>
      %20 = vector.shape_cast %19 : vector<1x1x128xf32> to vector<1x1x128xf32>
      %21 = vector.broadcast %20 : vector<1x1x128xf32> to vector<1x8x128xf32>
      %c0_16 = arith.constant 0 : index
      %c0_17 = arith.constant 0 : index
      %c0_18 = arith.constant 0 : index
      %22 = vector.load %arg6[%c0_16, %c0_17, %c0_18] : memref<1x8x128xf32, #tpu.memory_space<vmem>>, vector<1x8x128xf32>
      tpu.vector_store %arg6[%c0_16, %c0_17, %c0_18], %21 {strides = array<i32>} : memref<1x8x128xf32, #tpu.memory_space<vmem>>, vector<1x8x128xf32>,
      %23 = vector.shape_cast %18 : vector<1x128xf32> to vector<1x1x128xf32>
      %24 = vector.shape_cast %23 : vector<1x1x128xf32> to vector<1x1x128xf32>
      %25 = vector.broadcast %24 : vector<1x1x128xf32> to vector<1x8x128xf32>
      %c0_19 = arith.constant 0 : index
      %c0_20 = arith.constant 0 : index
      %c0_21 = arith.constant 0 : index
      %26 = vector.load %arg7[%c0_19, %c0_20, %c0_21] : memref<1x8x128xf32, #tpu.memory_space<vmem>>, vector<1x8x128xf32>
      tpu.vector_store %arg7[%c0_19, %c0_20, %c0_21], %25 {strides = array<i32>} : memref<1x8x128xf32, #tpu.memory_space<vmem>>, vector<1x8x128xf32>,
    } else {
    }
    return
  }
  func.func @transform_0(%arg0: i32, %arg1: i32, %arg2: i32) -> (i32, i32) {
    %c0_i32 = arith.constant 0 : i32
    return %arg0, %arg2 : i32, i32
  }
  func.func @transform_1(%arg0: i32, %arg1: i32, %arg2: i32) -> (i32, i32) {
    %c0_i32 = arith.constant 0 : i32
    return %arg2, %arg1 : i32, i32
  }
  func.func @transform_2(%arg0: i32, %arg1: i32, %arg2: i32) -> (i32, i32) {
    %c0_i32 = arith.constant 0 : i32
    return %arg0, %arg1 : i32, i32
  }
  func.func @transform_3(%arg0: i32, %arg1: i32, %arg2: i32) -> (i32, i32, i32) {
    %c0_i32 = arith.constant 0 : i32
    %c0_i32_0 = arith.constant 0 : i32
    return %arg0, %c0_i32, %arg1 : i32, i32, i32
  }
  func.func @transform_4(%arg0: i32, %arg1: i32, %arg2: i32) -> (i32, i32, i32) {
    %c0_i32 = arith.constant 0 : i32
    %c0_i32_0 = arith.constant 0 : i32
    return %arg0, %c0_i32, %arg1 : i32, i32, i32
  }
}

module attributes {stable_mosaic.version = 11 : i64} {
  func.func @_affine_act_kernel(%arg0: i32, %arg1: memref<256x128xf32, #tpu.memory_space<vmem>>, %arg2: memref<1x128xf32, #tpu.memory_space<vmem>>, %arg3: memref<1x128xf32, #tpu.memory_space<vmem>>, %arg4: memref<256x128xf32, #tpu.memory_space<vmem>>) attributes {dimension_semantics = [#tpu.dimension_semantics<parallel>], iteration_bounds = array<i64: 2>, scalar_prefetch = 0 : i64, scratch_operands = 0 : i64, tpu.core_type = #tpu.core_type<tc>, window_params = [{transform_indices = @transform_0, window_bounds = array<i64: 256, 128>}, {pipeline_mode = #tpu.pipeline_mode<synchronous>, transform_indices = @transform_1, window_bounds = array<i64: 1, 128>}, {pipeline_mode = #tpu.pipeline_mode<synchronous>, transform_indices = @transform_2, window_bounds = array<i64: 1, 128>}, {transform_indices = @transform_3, window_bounds = array<i64: 256, 128>}]} {
    %c0 = arith.constant 0 : index
    %c0_0 = arith.constant 0 : index
    %0 = vector.load %arg1[%c0, %c0_0] : memref<256x128xf32, #tpu.memory_space<vmem>>, vector<256x128xf32>
    %c0_1 = arith.constant 0 : index
    %c0_2 = arith.constant 0 : index
    %1 = vector.load %arg2[%c0_1, %c0_2] : memref<1x128xf32, #tpu.memory_space<vmem>>, vector<1x128xf32>
    %2 = vector.broadcast %1 : vector<1x128xf32> to vector<256x128xf32>
    %3 = arith.mulf %0, %2 : vector<256x128xf32>
    %c0_3 = arith.constant 0 : index
    %c0_4 = arith.constant 0 : index
    %4 = vector.load %arg3[%c0_3, %c0_4] : memref<1x128xf32, #tpu.memory_space<vmem>>, vector<1x128xf32>
    %5 = vector.broadcast %4 : vector<1x128xf32> to vector<256x128xf32>
    %6 = arith.addf %3, %5 : vector<256x128xf32>
    %cst = arith.constant 0.000000e+00 : f32
    %7 = vector.broadcast %cst : f32 to vector<256x128xf32>
    %8 = arith.cmpf ogt, %6, %7 : vector<256x128xf32>
    %cst_5 = arith.constant 1.000000e-01 : f32
    %9 = vector.broadcast %cst_5 : f32 to vector<256x128xf32>
    %10 = arith.mulf %9, %6 : vector<256x128xf32>
    %11 = arith.select %8, %6, %10 : vector<256x128xi1>, vector<256x128xf32>
    %c0_6 = arith.constant 0 : index
    %c0_7 = arith.constant 0 : index
    %12 = vector.load %arg4[%c0_6, %c0_7] : memref<256x128xf32, #tpu.memory_space<vmem>>, vector<256x128xf32>
    tpu.vector_store %arg4[%c0_6, %c0_7], %11 {strides = array<i32>} : memref<256x128xf32, #tpu.memory_space<vmem>>, vector<256x128xf32>,
    return
  }
  func.func @transform_0(%arg0: i32) -> (i32, i32) {
    %c0_i32 = arith.constant 0 : i32
    %c0_i32_0 = arith.constant 0 : i32
    return %arg0, %c0_i32 : i32, i32
  }
  func.func @transform_1(%arg0: i32) -> (i32, i32) {
    %c0_i32 = arith.constant 0 : i32
    %c0_i32_0 = arith.constant 0 : i32
    %c0_i32_1 = arith.constant 0 : i32
    return %c0_i32, %c0_i32_0 : i32, i32
  }
  func.func @transform_2(%arg0: i32) -> (i32, i32) {
    %c0_i32 = arith.constant 0 : i32
    %c0_i32_0 = arith.constant 0 : i32
    %c0_i32_1 = arith.constant 0 : i32
    return %c0_i32, %c0_i32_0 : i32, i32
  }
  func.func @transform_3(%arg0: i32) -> (i32, i32) {
    %c0_i32 = arith.constant 0 : i32
    %c0_i32_0 = arith.constant 0 : i32
    return %arg0, %c0_i32 : i32, i32
  }
}

module attributes {stable_mosaic.version = 11 : i64} {
  func.func @_mm_stats_kernel(%arg0: i32, %arg1: i32, %arg2: i32, %arg3: memref<256x384xbf16, #tpu.memory_space<vmem>>, %arg4: memref<384x128xbf16, #tpu.memory_space<vmem>>, %arg5: memref<256x128xf32, #tpu.memory_space<vmem>>, %arg6: memref<1x8x128xf32, #tpu.memory_space<vmem>>, %arg7: memref<1x8x128xf32, #tpu.memory_space<vmem>>, %arg8: memref<256x128xf32, #tpu.memory_space<vmem>>) attributes {dimension_semantics = [#tpu.dimension_semantics<parallel>, #tpu.dimension_semantics<parallel>, #tpu.dimension_semantics<arbitrary>], iteration_bounds = array<i64: 2, 1, 3>, scalar_prefetch = 0 : i64, scratch_operands = 1 : i64, tpu.core_type = #tpu.core_type<tc>, window_params = [{transform_indices = @transform_0, window_bounds = array<i64: 256, 384>}, {transform_indices = @transform_1, window_bounds = array<i64: 384, 128>}, {transform_indices = @transform_2, window_bounds = array<i64: 256, 128>}, {transform_indices = @transform_3, window_bounds = array<i64: 1, 8, 128>}, {transform_indices = @transform_4, window_bounds = array<i64: 1, 8, 128>}]} {
    %c0_i32 = arith.constant 0 : i32
    %0 = arith.cmpi eq, %arg2, %c0_i32 : i32
    %1 = arith.extui %0 : i1 to i32
    %c0_i32_0 = arith.constant 0 : i32
    %2 = arith.cmpi ne, %1, %c0_i32_0 : i32
    scf.if %2 {
      %cst_9 = arith.constant 0.000000e+00 : f32
      %12 = vector.broadcast %cst_9 : f32 to vector<256x128xf32>
      %c0_10 = arith.constant 0 : index
      %c0_11 = arith.constant 0 : index
      %13 = vector.load %arg8[%c0_10, %c0_11] : memref<256x128xf32, #tpu.memory_space<vmem>>, vector<256x128xf32>
      tpu.vector_store %arg8[%c0_10, %c0_11], %12 {strides = array<i32>} : memref<256x128xf32, #tpu.memory_space<vmem>>, vector<256x128xf32>,
    } else {
    }
    %c0 = arith.constant 0 : index
    %c0_1 = arith.constant 0 : index
    %3 = vector.load %arg8[%c0, %c0_1] : memref<256x128xf32, #tpu.memory_space<vmem>>, vector<256x128xf32>
    %c0_2 = arith.constant 0 : index
    %c0_3 = arith.constant 0 : index
    %4 = vector.load %arg3[%c0_2, %c0_3] : memref<256x384xbf16, #tpu.memory_space<vmem>>, vector<256x384xbf16>
    %c0_4 = arith.constant 0 : index
    %c0_5 = arith.constant 0 : index
    %5 = vector.load %arg4[%c0_4, %c0_5] : memref<384x128xbf16, #tpu.memory_space<vmem>>, vector<384x128xbf16>
    %cst = arith.constant dense<0.000000e+00> : vector<256x128xf32>
    %6 = tpu.matmul %4, %5, %cst {dimension_numbers = #tpu.dot_dimension_numbers<[1], [0], [0], [1], [0, 0, 1, 1], [], []>} : vector<256x384xbf16>, vector<384x128xbf16>, vector<256x128xf32> -> vector<256x128xf32>
    %7 = arith.addf %3, %6 : vector<256x128xf32>
    %c0_6 = arith.constant 0 : index
    %c0_7 = arith.constant 0 : index
    %8 = vector.load %arg8[%c0_6, %c0_7] : memref<256x128xf32, #tpu.memory_space<vmem>>, vector<256x128xf32>
    tpu.vector_store %arg8[%c0_6, %c0_7], %7 {strides = array<i32>} : memref<256x128xf32, #tpu.memory_space<vmem>>, vector<256x128xf32>,
    %c2_i32 = arith.constant 2 : i32
    %9 = arith.cmpi eq, %arg2, %c2_i32 : i32
    %10 = arith.extui %9 : i1 to i32
    %c0_i32_8 = arith.constant 0 : i32
    %11 = arith.cmpi ne, %10, %c0_i32_8 : i32
    scf.if %11 {
      %c0_9 = arith.constant 0 : index
      %c0_10 = arith.constant 0 : index
      %12 = vector.load %arg8[%c0_9, %c0_10] : memref<256x128xf32, #tpu.memory_space<vmem>>, vector<256x128xf32>
      %c0_11 = arith.constant 0 : index
      %c0_12 = arith.constant 0 : index
      %13 = vector.load %arg5[%c0_11, %c0_12] : memref<256x128xf32, #tpu.memory_space<vmem>>, vector<256x128xf32>
      tpu.vector_store %arg5[%c0_11, %c0_12], %12 {strides = array<i32>} : memref<256x128xf32, #tpu.memory_space<vmem>>, vector<256x128xf32>,
      %cst_13 = arith.constant dense<0.000000e+00> : vector<128xf32>
      %14 = vector.multi_reduction <add>, %12, %cst_13 [0] : vector<256x128xf32> to vector<128xf32>
      %15 = vector.shape_cast %14 : vector<128xf32> to vector<1x128xf32>
      %16 = arith.mulf %12, %12 : vector<256x128xf32>
      %cst_14 = arith.constant dense<0.000000e+00> : vector<128xf32>
      %17 = vector.multi_reduction <add>, %16, %cst_14 [0] : vector<256x128xf32> to vector<128xf32>
      %18 = vector.shape_cast %17 : vector<128xf32> to vector<1x128xf32>
      %19 = vector.shape_cast %15 : vector<1x128xf32> to vector<1x1x128xf32>
      %20 = vector.shape_cast %19 : vector<1x1x128xf32> to vector<1x1x128xf32>
      %21 = vector.broadcast %20 : vector<1x1x128xf32> to vector<1x8x128xf32>
      %c0_15 = arith.constant 0 : index
      %c0_16 = arith.constant 0 : index
      %c0_17 = arith.constant 0 : index
      %22 = vector.load %arg6[%c0_15, %c0_16, %c0_17] : memref<1x8x128xf32, #tpu.memory_space<vmem>>, vector<1x8x128xf32>
      tpu.vector_store %arg6[%c0_15, %c0_16, %c0_17], %21 {strides = array<i32>} : memref<1x8x128xf32, #tpu.memory_space<vmem>>, vector<1x8x128xf32>,
      %23 = vector.shape_cast %18 : vector<1x128xf32> to vector<1x1x128xf32>
      %24 = vector.shape_cast %23 : vector<1x1x128xf32> to vector<1x1x128xf32>
      %25 = vector.broadcast %24 : vector<1x1x128xf32> to vector<1x8x128xf32>
      %c0_18 = arith.constant 0 : index
      %c0_19 = arith.constant 0 : index
      %c0_20 = arith.constant 0 : index
      %26 = vector.load %arg7[%c0_18, %c0_19, %c0_20] : memref<1x8x128xf32, #tpu.memory_space<vmem>>, vector<1x8x128xf32>
      tpu.vector_store %arg7[%c0_18, %c0_19, %c0_20], %25 {strides = array<i32>} : memref<1x8x128xf32, #tpu.memory_space<vmem>>, vector<1x8x128xf32>,
    } else {
    }
    return
  }
  func.func @transform_0(%arg0: i32, %arg1: i32, %arg2: i32) -> (i32, i32) {
    %c0_i32 = arith.constant 0 : i32
    return %arg0, %arg2 : i32, i32
  }
  func.func @transform_1(%arg0: i32, %arg1: i32, %arg2: i32) -> (i32, i32) {
    %c0_i32 = arith.constant 0 : i32
    return %arg2, %arg1 : i32, i32
  }
  func.func @transform_2(%arg0: i32, %arg1: i32, %arg2: i32) -> (i32, i32) {
    %c0_i32 = arith.constant 0 : i32
    return %arg0, %arg1 : i32, i32
  }
  func.func @transform_3(%arg0: i32, %arg1: i32, %arg2: i32) -> (i32, i32, i32) {
    %c0_i32 = arith.constant 0 : i32
    %c0_i32_0 = arith.constant 0 : i32
    return %arg0, %c0_i32, %arg1 : i32, i32, i32
  }
  func.func @transform_4(%arg0: i32, %arg1: i32, %arg2: i32) -> (i32, i32, i32) {
    %c0_i32 = arith.constant 0 : i32
    %c0_i32_0 = arith.constant 0 : i32
    return %arg0, %c0_i32, %arg1 : i32, i32, i32
  }
}

module attributes {stable_mosaic.version = 11 : i64} {
  func.func @_affine_act_res_kernel(%arg0: i32, %arg1: memref<256x128xf32, #tpu.memory_space<vmem>>, %arg2: memref<1x128xf32, #tpu.memory_space<vmem>>, %arg3: memref<1x128xf32, #tpu.memory_space<vmem>>, %arg4: memref<256x128xf32, #tpu.memory_space<vmem>>, %arg5: memref<256x128xf32, #tpu.memory_space<vmem>>) attributes {dimension_semantics = [#tpu.dimension_semantics<parallel>], iteration_bounds = array<i64: 2>, scalar_prefetch = 0 : i64, scratch_operands = 0 : i64, tpu.core_type = #tpu.core_type<tc>, window_params = [{transform_indices = @transform_0, window_bounds = array<i64: 256, 128>}, {pipeline_mode = #tpu.pipeline_mode<synchronous>, transform_indices = @transform_1, window_bounds = array<i64: 1, 128>}, {pipeline_mode = #tpu.pipeline_mode<synchronous>, transform_indices = @transform_2, window_bounds = array<i64: 1, 128>}, {transform_indices = @transform_3, window_bounds = array<i64: 256, 128>}, {transform_indices = @transform_4, window_bounds = array<i64: 256, 128>}]} {
    %c0 = arith.constant 0 : index
    %c0_0 = arith.constant 0 : index
    %0 = vector.load %arg1[%c0, %c0_0] : memref<256x128xf32, #tpu.memory_space<vmem>>, vector<256x128xf32>
    %c0_1 = arith.constant 0 : index
    %c0_2 = arith.constant 0 : index
    %1 = vector.load %arg2[%c0_1, %c0_2] : memref<1x128xf32, #tpu.memory_space<vmem>>, vector<1x128xf32>
    %2 = vector.broadcast %1 : vector<1x128xf32> to vector<256x128xf32>
    %3 = arith.mulf %0, %2 : vector<256x128xf32>
    %c0_3 = arith.constant 0 : index
    %c0_4 = arith.constant 0 : index
    %4 = vector.load %arg3[%c0_3, %c0_4] : memref<1x128xf32, #tpu.memory_space<vmem>>, vector<1x128xf32>
    %5 = vector.broadcast %4 : vector<1x128xf32> to vector<256x128xf32>
    %6 = arith.addf %3, %5 : vector<256x128xf32>
    %cst = arith.constant 0.000000e+00 : f32
    %7 = vector.broadcast %cst : f32 to vector<256x128xf32>
    %8 = arith.cmpf ogt, %6, %7 : vector<256x128xf32>
    %cst_5 = arith.constant 1.000000e-01 : f32
    %9 = vector.broadcast %cst_5 : f32 to vector<256x128xf32>
    %10 = arith.mulf %9, %6 : vector<256x128xf32>
    %11 = arith.select %8, %6, %10 : vector<256x128xi1>, vector<256x128xf32>
    %c0_6 = arith.constant 0 : index
    %c0_7 = arith.constant 0 : index
    %12 = vector.load %arg4[%c0_6, %c0_7] : memref<256x128xf32, #tpu.memory_space<vmem>>, vector<256x128xf32>
    %13 = arith.addf %11, %12 : vector<256x128xf32>
    %c0_8 = arith.constant 0 : index
    %c0_9 = arith.constant 0 : index
    %14 = vector.load %arg5[%c0_8, %c0_9] : memref<256x128xf32, #tpu.memory_space<vmem>>, vector<256x128xf32>
    tpu.vector_store %arg5[%c0_8, %c0_9], %13 {strides = array<i32>} : memref<256x128xf32, #tpu.memory_space<vmem>>, vector<256x128xf32>,
    return
  }
  func.func @transform_0(%arg0: i32) -> (i32, i32) {
    %c0_i32 = arith.constant 0 : i32
    %c0_i32_0 = arith.constant 0 : i32
    return %arg0, %c0_i32 : i32, i32
  }
  func.func @transform_1(%arg0: i32) -> (i32, i32) {
    %c0_i32 = arith.constant 0 : i32
    %c0_i32_0 = arith.constant 0 : i32
    %c0_i32_1 = arith.constant 0 : i32
    return %c0_i32, %c0_i32_0 : i32, i32
  }
  func.func @transform_2(%arg0: i32) -> (i32, i32) {
    %c0_i32 = arith.constant 0 : i32
    %c0_i32_0 = arith.constant 0 : i32
    %c0_i32_1 = arith.constant 0 : i32
    return %c0_i32, %c0_i32_0 : i32, i32
  }
  func.func @transform_3(%arg0: i32) -> (i32, i32) {
    %c0_i32 = arith.constant 0 : i32
    %c0_i32_0 = arith.constant 0 : i32
    return %arg0, %c0_i32 : i32, i32
  }
  func.func @transform_4(%arg0: i32) -> (i32, i32) {
    %c0_i32 = arith.constant 0 : i32
    %c0_i32_0 = arith.constant 0 : i32
    return %arg0, %c0_i32 : i32, i32
  }
}

module attributes {stable_mosaic.version = 11 : i64} {
  func.func @_mm_stats_kernel(%arg0: i32, %arg1: i32, %arg2: i32, %arg3: memref<256x128xbf16, #tpu.memory_space<vmem>>, %arg4: memref<128x128xbf16, #tpu.memory_space<vmem>>, %arg5: memref<256x128xf32, #tpu.memory_space<vmem>>, %arg6: memref<1x8x128xf32, #tpu.memory_space<vmem>>, %arg7: memref<1x8x128xf32, #tpu.memory_space<vmem>>, %arg8: memref<256x128xf32, #tpu.memory_space<vmem>>) attributes {dimension_semantics = [#tpu.dimension_semantics<parallel>, #tpu.dimension_semantics<parallel>, #tpu.dimension_semantics<arbitrary>], iteration_bounds = array<i64: 2, 1, 1>, scalar_prefetch = 0 : i64, scratch_operands = 1 : i64, tpu.core_type = #tpu.core_type<tc>, window_params = [{transform_indices = @transform_0, window_bounds = array<i64: 256, 128>}, {transform_indices = @transform_1, window_bounds = array<i64: 128, 128>}, {transform_indices = @transform_2, window_bounds = array<i64: 256, 128>}, {transform_indices = @transform_3, window_bounds = array<i64: 1, 8, 128>}, {transform_indices = @transform_4, window_bounds = array<i64: 1, 8, 128>}]} {
    %c0_i32 = arith.constant 0 : i32
    %0 = arith.cmpi eq, %arg2, %c0_i32 : i32
    %1 = arith.extui %0 : i1 to i32
    %c0_i32_0 = arith.constant 0 : i32
    %2 = arith.cmpi ne, %1, %c0_i32_0 : i32
    scf.if %2 {
      %cst_10 = arith.constant 0.000000e+00 : f32
      %12 = vector.broadcast %cst_10 : f32 to vector<256x128xf32>
      %c0_11 = arith.constant 0 : index
      %c0_12 = arith.constant 0 : index
      %13 = vector.load %arg8[%c0_11, %c0_12] : memref<256x128xf32, #tpu.memory_space<vmem>>, vector<256x128xf32>
      tpu.vector_store %arg8[%c0_11, %c0_12], %12 {strides = array<i32>} : memref<256x128xf32, #tpu.memory_space<vmem>>, vector<256x128xf32>,
    } else {
    }
    %c0 = arith.constant 0 : index
    %c0_1 = arith.constant 0 : index
    %3 = vector.load %arg8[%c0, %c0_1] : memref<256x128xf32, #tpu.memory_space<vmem>>, vector<256x128xf32>
    %c0_2 = arith.constant 0 : index
    %c0_3 = arith.constant 0 : index
    %4 = vector.load %arg3[%c0_2, %c0_3] : memref<256x128xbf16, #tpu.memory_space<vmem>>, vector<256x128xbf16>
    %c0_4 = arith.constant 0 : index
    %c0_5 = arith.constant 0 : index
    %5 = vector.load %arg4[%c0_4, %c0_5] : memref<128x128xbf16, #tpu.memory_space<vmem>>, vector<128x128xbf16>
    %cst = arith.constant dense<0.000000e+00> : vector<256x128xf32>
    %6 = tpu.matmul %4, %5, %cst {dimension_numbers = #tpu.dot_dimension_numbers<[1], [0], [0], [1], [0, 0, 1, 1], [], []>} : vector<256x128xbf16>, vector<128x128xbf16>, vector<256x128xf32> -> vector<256x128xf32>
    %7 = arith.addf %3, %6 : vector<256x128xf32>
    %c0_6 = arith.constant 0 : index
    %c0_7 = arith.constant 0 : index
    %8 = vector.load %arg8[%c0_6, %c0_7] : memref<256x128xf32, #tpu.memory_space<vmem>>, vector<256x128xf32>
    tpu.vector_store %arg8[%c0_6, %c0_7], %7 {strides = array<i32>} : memref<256x128xf32, #tpu.memory_space<vmem>>, vector<256x128xf32>,
    %c0_i32_8 = arith.constant 0 : i32
    %9 = arith.cmpi eq, %arg2, %c0_i32_8 : i32
    %10 = arith.extui %9 : i1 to i32
    %c0_i32_9 = arith.constant 0 : i32
    %11 = arith.cmpi ne, %10, %c0_i32_9 : i32
    scf.if %11 {
      %c0_10 = arith.constant 0 : index
      %c0_11 = arith.constant 0 : index
      %12 = vector.load %arg8[%c0_10, %c0_11] : memref<256x128xf32, #tpu.memory_space<vmem>>, vector<256x128xf32>
      %c0_12 = arith.constant 0 : index
      %c0_13 = arith.constant 0 : index
      %13 = vector.load %arg5[%c0_12, %c0_13] : memref<256x128xf32, #tpu.memory_space<vmem>>, vector<256x128xf32>
      tpu.vector_store %arg5[%c0_12, %c0_13], %12 {strides = array<i32>} : memref<256x128xf32, #tpu.memory_space<vmem>>, vector<256x128xf32>,
      %cst_14 = arith.constant dense<0.000000e+00> : vector<128xf32>
      %14 = vector.multi_reduction <add>, %12, %cst_14 [0] : vector<256x128xf32> to vector<128xf32>
      %15 = vector.shape_cast %14 : vector<128xf32> to vector<1x128xf32>
      %16 = arith.mulf %12, %12 : vector<256x128xf32>
      %cst_15 = arith.constant dense<0.000000e+00> : vector<128xf32>
      %17 = vector.multi_reduction <add>, %16, %cst_15 [0] : vector<256x128xf32> to vector<128xf32>
      %18 = vector.shape_cast %17 : vector<128xf32> to vector<1x128xf32>
      %19 = vector.shape_cast %15 : vector<1x128xf32> to vector<1x1x128xf32>
      %20 = vector.shape_cast %19 : vector<1x1x128xf32> to vector<1x1x128xf32>
      %21 = vector.broadcast %20 : vector<1x1x128xf32> to vector<1x8x128xf32>
      %c0_16 = arith.constant 0 : index
      %c0_17 = arith.constant 0 : index
      %c0_18 = arith.constant 0 : index
      %22 = vector.load %arg6[%c0_16, %c0_17, %c0_18] : memref<1x8x128xf32, #tpu.memory_space<vmem>>, vector<1x8x128xf32>
      tpu.vector_store %arg6[%c0_16, %c0_17, %c0_18], %21 {strides = array<i32>} : memref<1x8x128xf32, #tpu.memory_space<vmem>>, vector<1x8x128xf32>,
      %23 = vector.shape_cast %18 : vector<1x128xf32> to vector<1x1x128xf32>
      %24 = vector.shape_cast %23 : vector<1x1x128xf32> to vector<1x1x128xf32>
      %25 = vector.broadcast %24 : vector<1x1x128xf32> to vector<1x8x128xf32>
      %c0_19 = arith.constant 0 : index
      %c0_20 = arith.constant 0 : index
      %c0_21 = arith.constant 0 : index
      %26 = vector.load %arg7[%c0_19, %c0_20, %c0_21] : memref<1x8x128xf32, #tpu.memory_space<vmem>>, vector<1x8x128xf32>
      tpu.vector_store %arg7[%c0_19, %c0_20, %c0_21], %25 {strides = array<i32>} : memref<1x8x128xf32, #tpu.memory_space<vmem>>, vector<1x8x128xf32>,
    } else {
    }
    return
  }
  func.func @transform_0(%arg0: i32, %arg1: i32, %arg2: i32) -> (i32, i32) {
    %c0_i32 = arith.constant 0 : i32
    return %arg0, %arg2 : i32, i32
  }
  func.func @transform_1(%arg0: i32, %arg1: i32, %arg2: i32) -> (i32, i32) {
    %c0_i32 = arith.constant 0 : i32
    return %arg2, %arg1 : i32, i32
  }
  func.func @transform_2(%arg0: i32, %arg1: i32, %arg2: i32) -> (i32, i32) {
    %c0_i32 = arith.constant 0 : i32
    return %arg0, %arg1 : i32, i32
  }
  func.func @transform_3(%arg0: i32, %arg1: i32, %arg2: i32) -> (i32, i32, i32) {
    %c0_i32 = arith.constant 0 : i32
    %c0_i32_0 = arith.constant 0 : i32
    return %arg0, %c0_i32, %arg1 : i32, i32, i32
  }
  func.func @transform_4(%arg0: i32, %arg1: i32, %arg2: i32) -> (i32, i32, i32) {
    %c0_i32 = arith.constant 0 : i32
    %c0_i32_0 = arith.constant 0 : i32
    return %arg0, %c0_i32, %arg1 : i32, i32, i32
  }
}

module attributes {stable_mosaic.version = 11 : i64} {
  func.func @_affine_act_res_kernel(%arg0: i32, %arg1: memref<256x128xf32, #tpu.memory_space<vmem>>, %arg2: memref<1x128xf32, #tpu.memory_space<vmem>>, %arg3: memref<1x128xf32, #tpu.memory_space<vmem>>, %arg4: memref<256x128xf32, #tpu.memory_space<vmem>>, %arg5: memref<256x128xf32, #tpu.memory_space<vmem>>) attributes {dimension_semantics = [#tpu.dimension_semantics<parallel>], iteration_bounds = array<i64: 2>, scalar_prefetch = 0 : i64, scratch_operands = 0 : i64, tpu.core_type = #tpu.core_type<tc>, window_params = [{transform_indices = @transform_0, window_bounds = array<i64: 256, 128>}, {pipeline_mode = #tpu.pipeline_mode<synchronous>, transform_indices = @transform_1, window_bounds = array<i64: 1, 128>}, {pipeline_mode = #tpu.pipeline_mode<synchronous>, transform_indices = @transform_2, window_bounds = array<i64: 1, 128>}, {transform_indices = @transform_3, window_bounds = array<i64: 256, 128>}, {transform_indices = @transform_4, window_bounds = array<i64: 256, 128>}]} {
    %c0 = arith.constant 0 : index
    %c0_0 = arith.constant 0 : index
    %0 = vector.load %arg1[%c0, %c0_0] : memref<256x128xf32, #tpu.memory_space<vmem>>, vector<256x128xf32>
    %c0_1 = arith.constant 0 : index
    %c0_2 = arith.constant 0 : index
    %1 = vector.load %arg2[%c0_1, %c0_2] : memref<1x128xf32, #tpu.memory_space<vmem>>, vector<1x128xf32>
    %2 = vector.broadcast %1 : vector<1x128xf32> to vector<256x128xf32>
    %3 = arith.mulf %0, %2 : vector<256x128xf32>
    %c0_3 = arith.constant 0 : index
    %c0_4 = arith.constant 0 : index
    %4 = vector.load %arg3[%c0_3, %c0_4] : memref<1x128xf32, #tpu.memory_space<vmem>>, vector<1x128xf32>
    %5 = vector.broadcast %4 : vector<1x128xf32> to vector<256x128xf32>
    %6 = arith.addf %3, %5 : vector<256x128xf32>
    %cst = arith.constant 0.000000e+00 : f32
    %7 = vector.broadcast %cst : f32 to vector<256x128xf32>
    %8 = arith.cmpf ogt, %6, %7 : vector<256x128xf32>
    %cst_5 = arith.constant 1.000000e-01 : f32
    %9 = vector.broadcast %cst_5 : f32 to vector<256x128xf32>
    %10 = arith.mulf %9, %6 : vector<256x128xf32>
    %11 = arith.select %8, %6, %10 : vector<256x128xi1>, vector<256x128xf32>
    %c0_6 = arith.constant 0 : index
    %c0_7 = arith.constant 0 : index
    %12 = vector.load %arg4[%c0_6, %c0_7] : memref<256x128xf32, #tpu.memory_space<vmem>>, vector<256x128xf32>
    %13 = arith.addf %11, %12 : vector<256x128xf32>
    %c0_8 = arith.constant 0 : index
    %c0_9 = arith.constant 0 : index
    %14 = vector.load %arg5[%c0_8, %c0_9] : memref<256x128xf32, #tpu.memory_space<vmem>>, vector<256x128xf32>
    tpu.vector_store %arg5[%c0_8, %c0_9], %13 {strides = array<i32>} : memref<256x128xf32, #tpu.memory_space<vmem>>, vector<256x128xf32>,
    return
  }
  func.func @transform_0(%arg0: i32) -> (i32, i32) {
    %c0_i32 = arith.constant 0 : i32
    %c0_i32_0 = arith.constant 0 : i32
    return %arg0, %c0_i32 : i32, i32
  }
  func.func @transform_1(%arg0: i32) -> (i32, i32) {
    %c0_i32 = arith.constant 0 : i32
    %c0_i32_0 = arith.constant 0 : i32
    %c0_i32_1 = arith.constant 0 : i32
    return %c0_i32, %c0_i32_0 : i32, i32
  }
  func.func @transform_2(%arg0: i32) -> (i32, i32) {
    %c0_i32 = arith.constant 0 : i32
    %c0_i32_0 = arith.constant 0 : i32
    %c0_i32_1 = arith.constant 0 : i32
    return %c0_i32, %c0_i32_0 : i32, i32
  }
  func.func @transform_3(%arg0: i32) -> (i32, i32) {
    %c0_i32 = arith.constant 0 : i32
    %c0_i32_0 = arith.constant 0 : i32
    return %arg0, %c0_i32 : i32, i32
  }
  func.func @transform_4(%arg0: i32) -> (i32, i32) {
    %c0_i32 = arith.constant 0 : i32
    %c0_i32_0 = arith.constant 0 : i32
    return %arg0, %c0_i32 : i32, i32
  }
}

</mosaic_0001>

<bundles_post_ra>
// kernel: residual_block_forward.9
= control target key start
LH: loop header
LB: loop body
LE: loop exit
PB: predicated region body
PF: predicated region fallthrough
CT: control target
= control target key end

     0   :  { %s517_s12 = smov 0   ;;  %s679_s0 = inlined_call_operand.vmem [shape: f32[512,128], index: 0, kind: input, shape index: {}]   ;;  %s680_s1 = inlined_call_operand.vmem [shape: f32[1,128], index: 1, kind: input, shape index: {}]   ;;  %s681_s2 = inlined_call_operand.vmem [shape: f32[1,128], index: 2, kind: input, shape index: {}]   ;;  %s682_s3 = inlined_call_operand.vmem [shape: f32[512,128], index: 3, kind: output, shape index: {}]  }
   0x1 LB: > { %s468_s13 = sadd.s32 4294967295, %s495_s12   ;;  %p472_p0 = scmp.ge.s32.totalorder %s495_s12, 1  ;;  %s495_s12 = sphi %s517_s12, %s13_s12  }
   0x2   : > { %p138_p1 = scmp.lt.s32.totalorder %s495_s12, 3 }
   0x4   : > { %p139_p2 = pnand %p472_p0, %p138_p1 }
   0x5   : > { %s473_s14 = sshll.u32 (!%p139_p2), %s468_s13, 5  ;;  %v531_v0 = vld [vmem:[%s680_s1] ss:$0 sm:$0xff] (!%p139_p2) }
   0x6   : > { %142 = sbr.rel (%p139_p2) target bundleno = 62 (0x3e), region = 32  ;;  %p163_p3 = scmp.lt.s32.totalorder (!%p139_p2), %s473_s14, 63  ;;  %v541_v1 = vld [vmem:[%s681_s2] ss:$0 sm:$0xff] (!%p139_p2) }
   0xd   : > { %s684_s14 = smov (!%p163_p3, %s473_s14), 63 }
   0xe   : > { %s474_s15 = sshll.u32 %s684_s14, 3 }
   0xf   : > { %s536_s20 = scalar_lea.vmem %s679_s0, %s474_s15  ;;  %s569_s25 = scalar_lea.vmem %s682_s3, %s474_s15 }
  0x10   : > { %v174_v2 = vld [vmem:[%s536_s20] sm:$0xff]  ;;  %v175_v3 = vld [vmem:[%s536_s20 + $0x8] sm:$0xff]  ;;  %v176_v4 = vld [vmem:[%s536_s20 + $0x10] sm:$0xff] }
  0x11   : > { %v213_v5 = vmul.f32 %v531_v0, %v174_v2  ;;  %v214_v6 = vmul.f32 %v531_v0, %v175_v3  ;;  %v215_v7 = vmul.f32 %v531_v0, %v176_v4  ;;  %v177_v8 = vld [vmem:[%s536_s20 + $0x18] sm:$0xff]  ;;  %v178_v9 = vld [vmem:[%s536_s20 + $0x20] sm:$0xff]  ;;  %v179_v10 = vld [vmem:[%s536_s20 + $0x28] sm:$0xff] }
  0x12   : > { %v216_v11 = vmul.f32 %v531_v0, %v177_v8  ;;  %v217_v12 = vmul.f32 %v531_v0, %v178_v9  ;;  %v218_v13 = vmul.f32 %v531_v0, %v179_v10  ;;  %v180_v14 = vld [vmem:[%s536_s20 + $0x30] sm:$0xff]  ;;  %v181_v15 = vld [vmem:[%s536_s20 + $0x38] sm:$0xff]  ;;  %v182_v24 = vld [vmem:[%s536_s20 + $0x40] sm:$0xff] }
  0x13   : > { %v252_v16 = vadd.f32 %v541_v1, %v213_v5  ;;  %v253_v17 = vadd.f32 %v541_v1, %v214_v6  ;;  %v254_v18 = vadd.f32 %v541_v1, %v215_v7  ;;  %v219_v19 = vmul.f32 %v531_v0, %v180_v14  ;;  %v183_v32 = vld [vmem:[%s536_s20 + $0x48] sm:$0xff]  ;;  %v184_v33 = vld [vmem:[%s536_s20 + $0x50] sm:$0xff]  ;;  %v185_v34 = vld [vmem:[%s536_s20 + $0x58] sm:$0xff] }
  0x14   : > { %v255_v20 = vadd.f32 %v541_v1, %v216_v11  ;;  %v256_v21 = vadd.f32 %v541_v1, %v217_v12  ;;  %v257_v22 = vadd.f32 %v541_v1, %v218_v13  ;;  %v220_v23 = vmul.f32 %v531_v0, %v181_v15  ;;  %v186_v46 = vld [vmem:[%s536_s20 + $0x60] sm:$0xff]  ;;  %v187_v47 = vld [vmem:[%s536_s20 + $0x68] sm:$0xff]  ;;  %v188_v58 = vld [vmem:[%s536_s20 + $0x70] sm:$0xff] }
  0x15   : > { %vm284_vm0 = vcmp.gt.f32.partialorder %v252_v16, 0.0  ;;  %v316_v25 = vmul.f32 0.1, %v252_v16  ;;  %vm285_vm1 = vcmp.gt.f32.partialorder %v253_v17, 0.0  ;;  %v317_v26 = vmul.f32 0.1, %v253_v17 }
  0x16   : > { %vm286_vm2 = vcmp.gt.f32.partialorder %v254_v18, 0.0  ;;  %v318_v27 = vmul.f32 0.1, %v254_v18  ;;  %vm287_vm3 = vcmp.gt.f32.partialorder %v255_v20, 0.0  ;;  %v319_v28 = vmul.f32 0.1, %v255_v20 }
  0x17   : > { %v348_v29 = vsel %vm284_vm0, %v252_v16, %v316_v25  ;;  %v349_v30 = vsel %vm285_vm1, %v253_v17, %v317_v26  ;;  %vm288_vm4 = vcmp.gt.f32.partialorder %v256_v21, 0.0  ;;  %v320_v31 = vmul.f32 0.1, %v256_v21  ;;  %v189_v59 = vld [vmem:[%s536_s20 + $0x78] sm:$0xff]  ;;  %v190_v6 = vld [vmem:[%s536_s20 + $0x80] sm:$0xff]  ;;  %v191_v7 = vld [vmem:[%s536_s20 + $0x88] sm:$0xff] }
  0x18   : > { %380 = vst [vmem:[%s569_s25] sm:$0xff] %v348_v29  ;;  %381 = vst [vmem:[%s569_s25 + $0x8] sm:$0xff] %v349_v30  ;;  %v350_v35 = vsel %vm286_vm2, %v254_v18, %v318_v27  ;;  %v351_v36 = vsel %vm287_vm3, %v255_v20, %v319_v28  ;;  %vm289_vm5 = vcmp.gt.f32.partialorder %v257_v22, 0.0  ;;  %v321_v37 = vmul.f32 0.1, %v257_v22  ;;  %v192_v12 = vld [vmem:[%s536_s20 + $0x90] sm:$0xff]  ;;  %v193_v13 = vld [vmem:[%s536_s20 + $0x98] sm:$0xff] }
  0x19   : > { %382 = vst [vmem:[%s569_s25 + $0x10] sm:$0xff] %v350_v35  ;;  %383 = vst [vmem:[%s569_s25 + $0x18] sm:$0xff] %v351_v36  ;;  %v352_v38 = vsel %vm288_vm4, %v256_v21, %v320_v31  ;;  %v258_v39 = vadd.f32 %v541_v1, %v219_v19  ;;  %v259_v40 = vadd.f32 %v541_v1, %v220_v23  ;;  %v195_v25 = vld [vmem:[%s536_s20 + $0xa8] sm:$0xff]  ;;  %v196_v36 = vld [vmem:[%s536_s20 + $0xb0] sm:$0xff] }
  0x1a   : > { %v221_v41 = vmul.f32 %v531_v0, %v182_v24  ;;  %384 = vst [vmem:[%s569_s25 + $0x20] sm:$0xff] %v352_v38  ;;  %v353_v42 = vsel %vm289_vm5, %v257_v22, %v321_v37  ;;  %v222_v43 = vmul.f32 %v531_v0, %v183_v32  ;;  %v223_v44 = vmul.f32 %v531_v0, %v184_v33  ;;  %v194_v24 = vld [vmem:[%s536_s20 + $0xa0] sm:$0xff]  ;;  %v197_v37 = vld [vmem:[%s536_s20 + $0xb8] sm:$0xff] }
  0x1b   : > { %v224_v45 = vmul.f32 %v531_v0, %v185_v34  ;;  %385 = vst [vmem:[%s569_s25 + $0x28] sm:$0xff] %v353_v42  ;;  %vm290_vm6 = vcmp.gt.f32.partialorder %v258_v39, 0.0  ;;  %v322_v48 = vmul.f32 0.1, %v258_v39  ;;  %vm291_vm7 = vcmp.gt.f32.partialorder %v259_v40, 0.0 }
  0x1c   : > { %v323_v49 = vmul.f32 0.1, %v259_v40  ;;  %v260_v50 = vadd.f32 %v541_v1, %v221_v41  ;;  %v261_v51 = vadd.f32 %v541_v1, %v222_v43  ;;  %v262_v52 = vadd.f32 %v541_v1, %v223_v44 }
  0x1d   : > { %v263_v53 = vadd.f32 %v541_v1, %v224_v45  ;;  %v354_v54 = vsel %vm290_vm6, %v258_v39, %v322_v48  ;;  %v225_v56 = vmul.f32 %v531_v0, %v186_v46  ;;  %v226_v57 = vmul.f32 %v531_v0, %v187_v47  ;;  %v198_v46 = vld [vmem:[%s536_s20 + $0xc0] sm:$0xff]  ;;  %v199_v47 = vld [vmem:[%s536_s20 + $0xc8] sm:$0xff] }
  0x1e   : > { %v355_v55 = vsel %vm291_vm7, %v259_v40, %v323_v49  ;;  %386 = vst [vmem:[%s569_s25 + $0x30] sm:$0xff] %v354_v54  ;;  %vm292_vm8 = vcmp.gt.f32.partialorder %v260_v50, 0.0  ;;  %v324_v60 = vmul.f32 0.1, %v260_v50  ;;  %vm293_vm9 = vcmp.gt.f32.partialorder %v261_v51, 0.0 }
  0x1f   : > { %387 = vst [vmem:[%s569_s25 + $0x38] sm:$0xff] %v355_v55  ;;  %v325_v61 = vmul.f32 0.1, %v261_v51  ;;  %vm294_vm10 = vcmp.gt.f32.partialorder %v262_v52, 0.0  ;;  %v326_v62 = vmul.f32 0.1, %v262_v52  ;;  %v264_v4 = vadd.f32 %v541_v1, %v225_v56 }
  0x20   : > { %vm295_vm11 = vcmp.gt.f32.partialorder %v263_v53, 0.0  ;;  %v327_v63 = vmul.f32 0.1, %v263_v53  ;;  %v356_v2 = vsel %vm292_vm8, %v260_v50, %v324_v60  ;;  %v265_v5 = vadd.f32 %v541_v1, %v226_v57 }
  0x21   : > { %v357_v3 = vsel %vm293_vm9, %v261_v51, %v325_v61  ;;  %388 = vst [vmem:[%s569_s25 + $0x40] sm:$0xff] %v356_v2  ;;  %v358_v8 = vsel %vm294_vm10, %v262_v52, %v326_v62  ;;  %v227_v10 = vmul.f32 %v531_v0, %v188_v58  ;;  %v228_v11 = vmul.f32 %v531_v0, %v189_v59  ;;  %v200_v52 = vld [vmem:[%s536_s20 + $0xd0] sm:$0xff]  ;;  %v202_v2 = vld [vmem:[%s536_s20 + $0xe0] sm:$0xff] }
  0x22   : > { %389 = vst [vmem:[%s569_s25 + $0x48] sm:$0xff] %v357_v3  ;;  %v359_v9 = vsel %vm295_vm11, %v263_v53, %v327_v63  ;;  %390 = vst [vmem:[%s569_s25 + $0x50] sm:$0xff] %v358_v8  ;;  %vm296_vm12 = vcmp.gt.f32.partialorder %v264_v4, 0.0  ;;  %v328_v14 = vmul.f32 0.1, %v264_v4  ;;  %vm297_vm13 = vcmp.gt.f32.partialorder %v265_v5, 0.0 }
  0x23   : > { %391 = vst [vmem:[%s569_s25 + $0x58] sm:$0xff] %v359_v9  ;;  %v329_v15 = vmul.f32 0.1, %v265_v5  ;;  %v266_v16 = vadd.f32 %v541_v1, %v227_v10  ;;  %v267_v17 = vadd.f32 %v541_v1, %v228_v11  ;;  %v229_v18 = vmul.f32 %v531_v0, %v190_v6  ;;  %v201_v53 = vld [vmem:[%s536_s20 + $0xd8] sm:$0xff]  ;;  %v203_v3 = vld [vmem:[%s536_s20 + $0xe8] sm:$0xff] }
  0x24   : > { %v230_v19 = vmul.f32 %v531_v0, %v191_v7  ;;  %v360_v20 = vsel %vm296_vm12, %v264_v4, %v328_v14  ;;  %v231_v22 = vmul.f32 %v531_v0, %v192_v12  ;;  %v232_v23 = vmul.f32 %v531_v0, %v193_v13  ;;  %v204_v14 = vld [vmem:[%s536_s20 + $0xf0] sm:$0xff] }
  0x25   : > { %v361_v21 = vsel %vm297_vm13, %v265_v5, %v329_v15  ;;  %392 = vst [vmem:[%s569_s25 + $0x60] sm:$0xff] %v360_v20  ;;  %vm298_vm14 = vcmp.gt.f32.partialorder %v266_v16, 0.0  ;;  %v330_v26 = vmul.f32 0.1, %v266_v16  ;;  %vm299_vm15 = vcmp.gt.f32.partialorder %v267_v17, 0.0  ;;  %v205_v15 = vld [vmem:[%s536_s20 + $0xf8] sm:$0xff] }
  0x26   : > { %393 = vst [vmem:[%s569_s25 + $0x68] sm:$0xff] %v361_v21  ;;  %v331_v27 = vmul.f32 0.1, %v267_v17  ;;  %v268_v28 = vadd.f32 %v541_v1, %v229_v18  ;;  %v269_v29 = vadd.f32 %v541_v1, %v230_v19  ;;  %v270_v30 = vadd.f32 %v541_v1, %v231_v22 }
  0x27   : > { %v271_v31 = vadd.f32 %v541_v1, %v232_v23  ;;  %v362_v32 = vsel %vm298_vm14, %v266_v16, %v330_v26  ;;  %v233_v34 = vmul.f32 %v531_v0, %v194_v24  ;;  %v234_v35 = vmul.f32 %v531_v0, %v195_v25 }
  0x28   : > { %v363_v33 = vsel %vm299_vm15, %v267_v17, %v331_v27  ;;  %394 = vst [vmem:[%s569_s25 + $0x70] sm:$0xff] %v362_v32  ;;  %vm300_vm0 = vcmp.gt.f32.partialorder %v268_v28, 0.0  ;;  %v332_v38 = vmul.f32 0.1, %v268_v28  ;;  %vm301_vm1 = vcmp.gt.f32.partialorder %v269_v29, 0.0 }
  0x29   : > { %395 = vst [vmem:[%s569_s25 + $0x78] sm:$0xff] %v363_v33  ;;  %v333_v39 = vmul.f32 0.1, %v269_v29  ;;  %vm302_vm2 = vcmp.gt.f32.partialorder %v270_v30, 0.0  ;;  %v334_v40 = vmul.f32 0.1, %v270_v30  ;;  %v272_v44 = vadd.f32 %v541_v1, %v233_v34 }
  0x2a   : > { %vm303_vm3 = vcmp.gt.f32.partialorder %v271_v31, 0.0  ;;  %v335_v41 = vmul.f32 0.1, %v271_v31  ;;  %v364_v42 = vsel %vm300_vm0, %v268_v28, %v332_v38  ;;  %v273_v45 = vadd.f32 %v541_v1, %v234_v35 }
  0x2b   : > { %v365_v43 = vsel %vm301_vm1, %v269_v29, %v333_v39  ;;  %396 = vst [vmem:[%s569_s25 + $0x80] sm:$0xff] %v364_v42  ;;  %v366_v48 = vsel %vm302_vm2, %v270_v30, %v334_v40  ;;  %v235_v50 = vmul.f32 %v531_v0, %v196_v36  ;;  %v236_v51 = vmul.f32 %v531_v0, %v197_v37 }
  0x2c   : > { %397 = vst [vmem:[%s569_s25 + $0x88] sm:$0xff] %v365_v43  ;;  %v367_v49 = vsel %vm303_vm3, %v271_v31, %v335_v41  ;;  %398 = vst [vmem:[%s569_s25 + $0x90] sm:$0xff] %v366_v48  ;;  %vm304_vm4 = vcmp.gt.f32.partialorder %v272_v44, 0.0  ;;  %v336_v54 = vmul.f32 0.1, %v272_v44  ;;  %vm305_vm5 = vcmp.gt.f32.partialorder %v273_v45, 0.0 }
  0x2d   : > { %399 = vst [vmem:[%s569_s25 + $0x98] sm:$0xff] %v367_v49  ;;  %v337_v55 = vmul.f32 0.1, %v273_v45  ;;  %v274_v56 = vadd.f32 %v541_v1, %v235_v50  ;;  %v275_v57 = vadd.f32 %v541_v1, %v236_v51  ;;  %v237_v58 = vmul.f32 %v531_v0, %v198_v46 }
  0x2e   : > { %v238_v59 = vmul.f32 %v531_v0, %v199_v47  ;;  %v368_v60 = vsel %vm304_vm4, %v272_v44, %v336_v54  ;;  %v239_v62 = vmul.f32 %v531_v0, %v200_v52  ;;  %v240_v63 = vmul.f32 %v531_v0, %v201_v53 }
  0x2f   : > { %v369_v61 = vsel %vm305_vm5, %v273_v45, %v337_v55  ;;  %400 = vst [vmem:[%s569_s25 + $0xa0] sm:$0xff] %v368_v60  ;;  %vm306_vm6 = vcmp.gt.f32.partialorder %v274_v56, 0.0  ;;  %v338_v4 = vmul.f32 0.1, %v274_v56  ;;  %vm307_vm7 = vcmp.gt.f32.partialorder %v275_v57, 0.0 }
  0x30   : > { %401 = vst [vmem:[%s569_s25 + $0xa8] sm:$0xff] %v369_v61  ;;  %v339_v5 = vmul.f32 0.1, %v275_v57  ;;  %v276_v6 = vadd.f32 %v541_v1, %v237_v58  ;;  %v277_v7 = vadd.f32 %v541_v1, %v238_v59  ;;  %v278_v8 = vadd.f32 %v541_v1, %v239_v62 }
  0x31   : > { %v279_v9 = vadd.f32 %v541_v1, %v240_v63  ;;  %v370_v10 = vsel %vm306_vm6, %v274_v56, %v338_v4  ;;  %v241_v12 = vmul.f32 %v531_v0, %v202_v2  ;;  %v242_v13 = vmul.f32 %v531_v0, %v203_v3 }
  0x32   : > { %v371_v11 = vsel %vm307_vm7, %v275_v57, %v339_v5  ;;  %402 = vst [vmem:[%s569_s25 + $0xb0] sm:$0xff] %v370_v10  ;;  %vm308_vm8 = vcmp.gt.f32.partialorder %v276_v6, 0.0  ;;  %v340_v16 = vmul.f32 0.1, %v276_v6  ;;  %vm309_vm9 = vcmp.gt.f32.partialorder %v277_v7, 0.0 }
  0x33   : > { %403 = vst [vmem:[%s569_s25 + $0xb8] sm:$0xff] %v371_v11  ;;  %v341_v17 = vmul.f32 0.1, %v277_v7  ;;  %vm310_vm10 = vcmp.gt.f32.partialorder %v278_v8, 0.0  ;;  %v342_v18 = vmul.f32 0.1, %v278_v8  ;;  %v280_v22 = vadd.f32 %v541_v1, %v241_v12 }
  0x34   : > { %vm311_vm11 = vcmp.gt.f32.partialorder %v279_v9, 0.0  ;;  %v343_v19 = vmul.f32 0.1, %v279_v9  ;;  %v372_v20 = vsel %vm308_vm8, %v276_v6, %v340_v16  ;;  %v281_v23 = vadd.f32 %v541_v1, %v242_v13 }
  0x35   : > { %v373_v21 = vsel %vm309_vm9, %v277_v7, %v341_v17  ;;  %404 = vst [vmem:[%s569_s25 + $0xc0] sm:$0xff] %v372_v20  ;;  %v374_v24 = vsel %vm310_vm10, %v278_v8, %v342_v18  ;;  %v243_v26 = vmul.f32 %v531_v0, %v204_v14  ;;  %v244_v27 = vmul.f32 %v531_v0, %v205_v15 }
  0x36   : > { %405 = vst [vmem:[%s569_s25 + $0xc8] sm:$0xff] %v373_v21  ;;  %v375_v25 = vsel %vm311_vm11, %v279_v9, %v343_v19  ;;  %406 = vst [vmem:[%s569_s25 + $0xd0] sm:$0xff] %v374_v24  ;;  %vm312_vm12 = vcmp.gt.f32.partialorder %v280_v22, 0.0  ;;  %v344_v28 = vmul.f32 0.1, %v280_v22  ;;  %vm313_vm13 = vcmp.gt.f32.partialorder %v281_v23, 0.0 }
  0x37   : > { %407 = vst [vmem:[%s569_s25 + $0xd8] sm:$0xff] %v375_v25  ;;  %v345_v29 = vmul.f32 0.1, %v281_v23  ;;  %v282_v30 = vadd.f32 %v541_v1, %v243_v26  ;;  %v283_v31 = vadd.f32 %v541_v1, %v244_v27 }
  0x38   : > { %v376_v32 = vsel %vm312_vm12, %v280_v22, %v344_v28 }
  0x39   : > { %v377_v33 = vsel %vm313_vm13, %v281_v23, %v345_v29  ;;  %408 = vst [vmem:[%s569_s25 + $0xe0] sm:$0xff] %v376_v32  ;;  %vm314_vm14 = vcmp.gt.f32.partialorder %v282_v30, 0.0  ;;  %v346_v34 = vmul.f32 0.1, %v282_v30  ;;  %vm315_vm15 = vcmp.gt.f32.partialorder %v283_v31, 0.0 }
  0x3a   : > { %409 = vst [vmem:[%s569_s25 + $0xe8] sm:$0xff] %v377_v33  ;;  %v347_v0 = vmul.f32 0.1, %v283_v31 }
  0x3b   : > { %v378_v35 = vsel %vm314_vm14, %v282_v30, %v346_v34 }
  0x3c   : > { %v379_v36 = vsel %vm315_vm15, %v283_v31, %v347_v0  ;;  %410 = vst [vmem:[%s569_s25 + $0xf0] sm:$0xff] %v378_v35 }
  0x3d   : > { %411 = vst [vmem:[%s569_s25 + $0xf8] sm:$0xff] %v379_v36 }
  0x3e PF: > { %s13_s12 = sadd.s32 1, %s495_s12  }
  0x3f   : > { %p10_p4 = scmp.ge.s32.totalorder %s13_s12, 4  }
  0x41   :  { %12 = sbr.rel (!%p10_p4) target bundleno = 1 (0x1), region = 62 }

// kernel: residual_block_forward.8
= control target key start
LH: loop header
LB: loop body
LE: loop exit
PB: predicated region body
PF: predicated region fallthrough
CT: control target
= control target key end

     0   :  { %10 = vsyncpa [#allocation4], 0  ;;  %s1415_s15 = smov 0   ;;  %s1417_s16 = smov 0   ;;  %s1638_s0 = inlined_call_operand.vmem [shape: bf16[512,128], index: 0, kind: input, shape index: {}]   ;;  %s1639_s1 = inlined_call_operand.hbm [shape: bf16[128,128], index: 1, kind: input, shape index: {}]   ;;  %s1640_s2 = inlined_call_operand.vmem [shape: f32[512,128], index: 2, kind: output, shape index: {0}]   ;;  %s1641_s3 = inlined_call_operand.vmem [shape: f32[2,8,128], index: 3, kind: output, shape index: {1}]   ;;  %s1642_s4 = inlined_call_operand.vmem [shape: f32[2,8,128], index: 4, kind: output, shape index: {2}]  }
   0x1   :  { %s1419_s17 = smov 0  }
   0x2 LB: > { %s1143_s18 = sadd.s32 4294967295, %s1385_s17   ;;  %s35_s19 = sadd.s32 1, %s1381_s16  ;;  %s1385_s17 = sphi %s1419_s17, %s16_s17   ;;  %s1381_s16 = sphi %s1417_s16, %s1652_s16   ;;  %s1377_s15 = sphi %s1415_s15, %s1651_s15  }
   0x3   : > { %p37_p0 = scmp.ge.s32.totalorder %s35_s19, 2  ;;  %p1145_p1 = scmp.ge.s32.totalorder %s1385_s17, 1 }
   0x4   : > { %p180_p2 = scmp.lt.s32.totalorder %s1385_s17, 3  ;;  %p1440_p4 = scmp.eq.s32.totalorder %s1143_s18, 0 }
   0x5   : > { %s1654_s19 = smov (%p37_p0, %s35_s19), 0  ;;  %s1387_s22 = smov [#allocation3]  }
   0x6   : > { %p1436_p3 = pnand %p1145_p1, %p180_p2  ;;  %s196_s23 = sshll.u32 %s1387_s22, 4  ;;  %s197_s23 = int_to_ptr.vmem [resolvable:$true] %s196_s23 }
   0x7   : > { %s1647_s21 = scalar_select %p1440_p4, 1, 0 }
   0x8   : > { %s1646_s20 = scalar_select %p1436_p3, 1, 0 }
   0x9   : > { %p1274_p5 = pneg %p1436_p3  ;;  %s1331_s27 = scalar_lea.hbm %s1639_s1, 1024 }
   0xa   : > { %p1332_p7 = scmp.ne.s32.totalorder %s1639_s1, %s1331_s27  ;;  %p1338_p11 = scmp.lt.u32.totalorder %s1331_s27, %s1639_s1 }
   0xb   : > { %p1448_p6 = pnand %p1440_p4, %p1274_p5 }
   0xd   : > { %p1333_p8 = pneg %p1448_p6 }
   0xf   : > { %p1334_p9 = pnand %p1333_p8, %p1332_p7 }
  0x11   : > { %p1335_p10 = pneg %p1334_p9 }
  0x13   : > { %p1340_p12 = pnand %p1338_p11, %p1335_p10 }
  0x15   : > { %1343 = shalt.err (!%p1340_p12)
}
  0x16   : > { %s1344_s6 = scalar_lea.vmem %s197_s23, 1024  ;;  %p1352_p2 = scmp.lt.s32.totalorder %s197_s23, %s197_s23 }
  0x17   : > { %p1345_p13 = scmp.ne.s32.totalorder %s197_s23, %s1344_s6  ;;  %p1353_p5 = scmp.lt.s32.totalorder %s1344_s6, %s1344_s6 }
  0x19   : > { %p1347_p0 = pnand %p1345_p13, %p1333_p8  ;;  %p1354_p4 = por %p1353_p5, %p1352_p2 }
  0x1b   : > { %p1348_p1 = pneg %p1347_p0 }
  0x1d   : > { %p1355_p3 = pnand %p1354_p4, %p1348_p1 }
  0x1f   : > { %1358 = shalt.err (!%p1355_p3)
}
  0x20   : > { %s1388_s7 = smov 64   ;;  %s1389_s8 = smov 4  }
  0x21   : > { %1277 = dma.hbm_to_vmem [thread:$0]  (!%p1448_p6), %s1639_s1, 1024, %s197_s23, [#allocation4], %s1388_s7, %s1388_s7, %s1389_s8  }
  0x22   : > { %p1649_p7 = scmp.ne.s32.totalorder %s1646_s20, 0 }
  0x23   : > { %p1650_p9 = scmp.ne.s32.totalorder (!%p1649_p7), %s1647_s21, 0 }
  0x24   : > { %224 = sbr.rel (%p1649_p7) target bundleno = 369 (0x171), region = 28 }
  0x2b   : > { %1372 = dma.done.wait (%p1650_p9), [#allocation4], 1024  }
  0x2c   : > { %1374 = vsyncadd (%p1650_p9), [#allocation4], 4294966272  ;;  %s1150_s11 = sshll.u32 %s1377_s15, 5  ;;  %v1307_v0 = vld [vmem:[#allocation3] sm:$0xff]   ;;  %v1308_v1 = vld [vmem:[#allocation3 + $0x8] sm:$0xff]   ;;  %p289_p4 = scmp.lt.s32.totalorder %s1377_s15, 1 }
  0x2d   : > { %p271_p3 = scmp.lt.s32.totalorder %s1150_s11, 63  ;;  %1206 = vmatprep.subr.bf16.mxu0 %v1307_v0  ;;  %1254 = vmatprep.subr.bf16.mxu1 %v1307_v0  ;;  %v1309_v2 = vld [vmem:[#allocation3 + $0x10] sm:$0xff]   ;;  %v1310_v3 = vld [vmem:[#allocation3 + $0x18] sm:$0xff]   ;;  %v1311_v5 = vld [vmem:[#allocation3 + $0x20] sm:$0xff]  }
  0x2e   : > { %1207 = vmatpush3.bf16.msra.mxu0 %v1307_v0  ;;  %1262 = vmatpush3.bf16.msra.mxu1 %v1307_v0  ;;  %v1312_v6 = vld [vmem:[#allocation3 + $0x28] sm:$0xff]   ;;  %v1313_v8 = vld [vmem:[#allocation3 + $0x30] sm:$0xff]   ;;  %v1314_v9 = vld [vmem:[#allocation3 + $0x38] sm:$0xff]   ;;  %s1658_s15 = smov (!%p289_p4, %s1377_s15), 1 }
  0x2f   : > { %s1656_s11 = smov (!%p271_p3, %s1150_s11), 63  ;;  %1208 = vmatprep.subr.bf16.mxu0 %v1308_v1  ;;  %1255 = vmatprep.subr.bf16.mxu1 %v1308_v1  ;;  %s1154_s24 = sshll.u32 %s1658_s15, 3 }
  0x30   : > { %s1151_s12 = sshll.u32 %s1656_s11, 2  ;;  %s1153_s20 = sshll.u32 %s1656_s11, 3 }
  0x31   : > { %s1481_s18 = scalar_lea.vmem %s1638_s0, %s1151_s12  ;;  %s1503_s23 = scalar_lea.vmem %s1640_s2, %s1153_s20 }
  0x32   : > { %1209 = vmatpush3.bf16.msra.mxu0 %v1308_v1  ;;  %1263 = vmatpush3.bf16.msra.mxu1 %v1308_v1  ;;  %v1315_v4 = vld [vmem:[%s1481_s18] sm:$0xff]   ;;  %v1316_v10 = vld [vmem:[%s1481_s18 + $0x8] sm:$0xff]   ;;  %v1317_v12 = vld [vmem:[%s1481_s18 + $0x10] sm:$0xff]   ;;  %s295_s27 = scalar_lea.vmem %s1641_s3, %s1154_s24  ;;  %s302_s30 = scalar_lea.vmem %s1642_s4, %s1154_s24 }
  0x33   : > { %1210 = vmatprep.subr.bf16.mxu0 %v1309_v2  ;;  %1256 = vmatprep.subr.bf16.mxu1 %v1309_v2  ;;  %v1323_v7 = vld [vmem:[%s1481_s18 + $0x40] sm:$0xff]   ;;  %v1324_v11 = vld [vmem:[%s1481_s18 + $0x48] sm:$0xff]   ;;  %v1325_v13 = vld [vmem:[%s1481_s18 + $0x50] sm:$0xff]  }
  0x34   : > { %1222 = vmatprep.mubr.bf16.mxu0 %v1315_v4  ;;  %1238 = vmatprep.mubr.bf16.mxu1 %v1323_v7  ;;  %v1318_v14 = vld [vmem:[%s1481_s18 + $0x18] sm:$0xff]   ;;  %v1319_v16 = vld [vmem:[%s1481_s18 + $0x20] sm:$0xff]   ;;  %v1320_v18 = vld [vmem:[%s1481_s18 + $0x28] sm:$0xff]  }
  0x35   : > { %v1326_v15 = vld [vmem:[%s1481_s18 + $0x58] sm:$0xff]   ;;  %v1327_v17 = vld [vmem:[%s1481_s18 + $0x60] sm:$0xff]   ;;  %v1328_v19 = vld [vmem:[%s1481_s18 + $0x68] sm:$0xff]  }
  0x36   : > { %1211 = vmatpush3.bf16.msra.mxu0 %v1309_v2  ;;  %1264 = vmatpush3.bf16.msra.mxu1 %v1309_v2  ;;  %v1321_v20 = vld [vmem:[%s1481_s18 + $0x30] sm:$0xff]   ;;  %v1322_v22 = vld [vmem:[%s1481_s18 + $0x38] sm:$0xff]  }
  0x37   : > { %1212 = vmatprep.subr.bf16.mxu0 %v1310_v3  ;;  %1257 = vmatprep.subr.bf16.mxu1 %v1310_v3  ;;  %v1329_v21 = vld [vmem:[%s1481_s18 + $0x70] sm:$0xff]   ;;  %v1330_v23 = vld [vmem:[%s1481_s18 + $0x78] sm:$0xff]  }
  0x3a   : > { %1213 = vmatpush3.bf16.msra.mxu0 %v1310_v3  ;;  %1265 = vmatpush3.bf16.msra.mxu1 %v1310_v3 }
  0x3b   : > { %1214 = vmatprep.subr.bf16.mxu0 %v1311_v5  ;;  %1258 = vmatprep.subr.bf16.mxu1 %v1311_v5 }
  0x3e   : > { %1215 = vmatpush3.bf16.msra.mxu0 %v1311_v5  ;;  %1266 = vmatpush3.bf16.msra.mxu1 %v1311_v5 }
  0x3f   : > { %1216 = vmatprep.subr.bf16.mxu0 %v1312_v6  ;;  %1259 = vmatprep.subr.bf16.mxu1 %v1312_v6 }
  0x42   : > { %1217 = vmatpush3.bf16.msra.mxu0 %v1312_v6  ;;  %1267 = vmatpush3.bf16.msra.mxu1 %v1312_v6 }
  0x43   : > { %1218 = vmatprep.subr.bf16.mxu0 %v1313_v8  ;;  %1260 = vmatprep.subr.bf16.mxu1 %v1313_v8 }
  0x46   : > { %1219 = vmatpush3.bf16.msra.mxu0 %v1313_v8  ;;  %1268 = vmatpush3.bf16.msra.mxu1 %v1313_v8 }
  0x47   : > { %1220 = vmatprep.subr.bf16.mxu0 %v1314_v9  ;;  %1261 = vmatprep.subr.bf16.mxu1 %v1314_v9 }
  0x4a   : > { %1221 = vmatpush3.bf16.msra.mxu0 %v1314_v9  ;;  %1269 = vmatpush3.bf16.msra.mxu1 %v1314_v9 }
  0x4d   : > { %1223 = vmatmul.mubr.bf16.vlgmr.msra.gmra.mrb[0].mxu0 %v1316_v10  ;;  %1239 = vmatmul.mubr.bf16.vlgmr.msra.gmra.mrb[0].mxu1 %v1324_v11 }
  0x4e   : > { %1226 = vmatprep.mubr.bf16.mxu0 %v1317_v12  ;;  %1242 = vmatprep.mubr.bf16.mxu1 %v1325_v13 }
  0x55   : > { %1227 = vmatmul.mubr.bf16.gmra.mrb[4].mxu0 %v1318_v14  ;;  %1243 = vmatmul.mubr.bf16.gmra.mrb[4].mxu1 %v1326_v15 }
  0x56   : > { %1230 = vmatprep.mubr.bf16.mxu0 %v1319_v16  ;;  %1246 = vmatprep.mubr.bf16.mxu1 %v1327_v17 }
  0x5d   : > { %1231 = vmatmul.mubr.bf16.gmra.mrb[8].mxu0 %v1320_v18  ;;  %1247 = vmatmul.mubr.bf16.gmra.mrb[8].mxu1 %v1328_v19 }
  0x5e   : > { %1234 = vmatprep.mubr.bf16.mxu0 %v1321_v20  ;;  %1250 = vmatprep.mubr.bf16.mxu1 %v1329_v21 }
  0x65   : > { %1235 = vmatmul.mubr.bf16.gmra.mrb[12].mxu0 %v1322_v22  ;;  %1251 = vmatmul.mubr.bf16.gmra.mrb[12].mxu1 %v1330_v23 }
 0x120   : > { %v1224_v24 = vpop.f32.mrb[0].mxu0  ;;  %v1505_v25 = vpop.f32.mrb[0].mxu1 }
 0x121   : > { %826 = vst [vmem:[%s1503_s23 + $0x10] sm:$0xff] %v1224_v24  ;;  %v598_v26 = vpop.f32.mrb[1].mxu0  ;;  %842 = vst [vmem:[%s1503_s23 + $0x90] sm:$0xff] %v1505_v25  ;;  %v1510_v27 = vpop.f32.mrb[1].mxu1  ;;  %v895_v35 = vmul.f32 %v1224_v24, %v1224_v24 }
 0x122   : > { %824 = vst [vmem:[%s1503_s23] sm:$0xff] %v598_v26  ;;  %v1225_v28 = vpop.f32.mrb[2].mxu0  ;;  %840 = vst [vmem:[%s1503_s23 + $0x80] sm:$0xff] %v1510_v27  ;;  %v1515_v29 = vpop.f32.mrb[2].mxu1  ;;  %v893_v32 = vmul.f32 %v598_v26, %v598_v26 }
 0x123   : > { %827 = vst [vmem:[%s1503_s23 + $0x18] sm:$0xff] %v1225_v28  ;;  %v601_v30 = vpop.f32.mrb[3].mxu0  ;;  %843 = vst [vmem:[%s1503_s23 + $0x98] sm:$0xff] %v1515_v29  ;;  %v1520_v31 = vpop.f32.mrb[3].mxu1  ;;  %v896_v38 = vmul.f32 %v1225_v28, %v1225_v28 }
 0x124   : > { %825 = vst [vmem:[%s1503_s23 + $0x8] sm:$0xff] %v601_v30  ;;  %v856_v33 = vadd.f32 %v601_v30, %v598_v26  ;;  %v894_v34 = vmul.f32 %v601_v30, %v601_v30  ;;  %841 = vst [vmem:[%s1503_s23 + $0x88] sm:$0xff] %v1520_v31 }
 0x126   : > { %v857_v36 = vadd.f32 %v1224_v24, %v856_v33  ;;  %v925_v37 = vadd.f32 %v894_v34, %v893_v32 }
 0x128   : > { %v926_v39 = vadd.f32 %v925_v37, %v895_v35  ;;  %v1228_v40 = vpop.f32.mrb[4].mxu0  ;;  %v858_v41 = vadd.f32 %v1225_v28, %v857_v36  ;;  %v1525_v42 = vpop.f32.mrb[4].mxu1 }
 0x129   : > { %830 = vst [vmem:[%s1503_s23 + $0x30] sm:$0xff] %v1228_v40  ;;  %v614_v43 = vpop.f32.mrb[5].mxu0  ;;  %846 = vst [vmem:[%s1503_s23 + $0xb0] sm:$0xff] %v1525_v42  ;;  %v1530_v44 = vpop.f32.mrb[5].mxu1  ;;  %v899_v55 = vmul.f32 %v1228_v40, %v1228_v40 }
 0x12a   : > { %828 = vst [vmem:[%s1503_s23 + $0x20] sm:$0xff] %v614_v43  ;;  %v859_v45 = vadd.f32 %v858_v41, %v614_v43  ;;  %v897_v46 = vmul.f32 %v614_v43, %v614_v43  ;;  %v927_v47 = vadd.f32 %v926_v39, %v896_v38  ;;  %v1229_v48 = vpop.f32.mrb[6].mxu0  ;;  %844 = vst [vmem:[%s1503_s23 + $0xa0] sm:$0xff] %v1530_v44  ;;  %v1535_v49 = vpop.f32.mrb[6].mxu1 }
 0x12b   : > { %831 = vst [vmem:[%s1503_s23 + $0x38] sm:$0xff] %v1229_v48  ;;  %v617_v50 = vpop.f32.mrb[7].mxu0  ;;  %847 = vst [vmem:[%s1503_s23 + $0xb8] sm:$0xff] %v1535_v49  ;;  %v1540_v51 = vpop.f32.mrb[7].mxu1  ;;  %v900_v58 = vmul.f32 %v1229_v48, %v1229_v48  ;;  %v909_v41 = vmul.f32 %v1510_v27, %v1510_v27 }
 0x12c   : > { %v928_v52 = vadd.f32 %v927_v47, %v897_v46  ;;  %829 = vst [vmem:[%s1503_s23 + $0x28] sm:$0xff] %v617_v50  ;;  %v860_v53 = vadd.f32 %v859_v45, %v617_v50  ;;  %v898_v54 = vmul.f32 %v617_v50, %v617_v50  ;;  %845 = vst [vmem:[%s1503_s23 + $0xa8] sm:$0xff] %v1540_v51 }
 0x12d   : > { %v911_v50 = vmul.f32 %v1505_v25, %v1505_v25 }
 0x12e   : > { %v861_v56 = vadd.f32 %v1228_v40, %v860_v53  ;;  %v929_v57 = vadd.f32 %v928_v52, %v898_v54  ;;  %v912_v54 = vmul.f32 %v1515_v29, %v1515_v29 }
 0x130   : > { %v930_v59 = vadd.f32 %v929_v57, %v899_v55  ;;  %v1232_v60 = vpop.f32.mrb[8].mxu0  ;;  %v862_v61 = vadd.f32 %v1229_v48, %v861_v56  ;;  %v1545_v62 = vpop.f32.mrb[8].mxu1  ;;  %v910_v48 = vmul.f32 %v1520_v31, %v1520_v31 }
 0x131   : > { %834 = vst [vmem:[%s1503_s23 + $0x50] sm:$0xff] %v1232_v60  ;;  %v630_v63 = vpop.f32.mrb[9].mxu0  ;;  %850 = vst [vmem:[%s1503_s23 + $0xd0] sm:$0xff] %v1545_v62  ;;  %v1550_v0 = vpop.f32.mrb[9].mxu1  ;;  %v903_v11 = vmul.f32 %v1232_v60, %v1232_v60 }
 0x132   : > { %832 = vst [vmem:[%s1503_s23 + $0x40] sm:$0xff] %v630_v63  ;;  %v863_v1 = vadd.f32 %v862_v61, %v630_v63  ;;  %v901_v2 = vmul.f32 %v630_v63, %v630_v63  ;;  %v931_v3 = vadd.f32 %v930_v59, %v900_v58  ;;  %v1233_v4 = vpop.f32.mrb[10].mxu0  ;;  %848 = vst [vmem:[%s1503_s23 + $0xc0] sm:$0xff] %v1550_v0  ;;  %v1555_v5 = vpop.f32.mrb[10].mxu1 }
 0x133   : > { %835 = vst [vmem:[%s1503_s23 + $0x58] sm:$0xff] %v1233_v4  ;;  %v633_v6 = vpop.f32.mrb[11].mxu0  ;;  %851 = vst [vmem:[%s1503_s23 + $0xd8] sm:$0xff] %v1555_v5  ;;  %v1560_v7 = vpop.f32.mrb[11].mxu1  ;;  %v904_v14 = vmul.f32 %v1233_v4, %v1233_v4 }
 0x134   : > { %v932_v8 = vadd.f32 %v931_v3, %v901_v2  ;;  %833 = vst [vmem:[%s1503_s23 + $0x48] sm:$0xff] %v633_v6  ;;  %v864_v9 = vadd.f32 %v863_v1, %v633_v6  ;;  %v902_v10 = vmul.f32 %v633_v6, %v633_v6  ;;  %849 = vst [vmem:[%s1503_s23 + $0xc8] sm:$0xff] %v1560_v7 }
 0x136   : > { %v865_v12 = vadd.f32 %v1232_v60, %v864_v9  ;;  %v933_v13 = vadd.f32 %v932_v8, %v902_v10  ;;  %v914_v60 = vmul.f32 %v1540_v51, %v1540_v51  ;;  %v918_v8 = vmul.f32 %v1560_v7, %v1560_v7 }
 0x138   : > { %v934_v15 = vadd.f32 %v933_v13, %v903_v11  ;;  %v1236_v16 = vpop.f32.mrb[12].mxu0  ;;  %v866_v17 = vadd.f32 %v1233_v4, %v865_v12  ;;  %v1565_v18 = vpop.f32.mrb[12].mxu1 }
 0x139   : > { %838 = vst [vmem:[%s1503_s23 + $0x70] sm:$0xff] %v1236_v16  ;;  %v646_v19 = vpop.f32.mrb[13].mxu0  ;;  %854 = vst [vmem:[%s1503_s23 + $0xf0] sm:$0xff] %v1565_v18  ;;  %v710_v20 = vpop.f32.mrb[13].mxu1  ;;  %v907_v35 = vmul.f32 %v1236_v16, %v1236_v16 }
 0x13a   : > { %836 = vst [vmem:[%s1503_s23 + $0x60] sm:$0xff] %v646_v19  ;;  %v867_v21 = vadd.f32 %v866_v17, %v646_v19  ;;  %v905_v22 = vmul.f32 %v646_v19, %v646_v19  ;;  %v935_v23 = vadd.f32 %v934_v15, %v904_v14  ;;  %v1237_v24 = vpop.f32.mrb[14].mxu0  ;;  %852 = vst [vmem:[%s1503_s23 + $0xe0] sm:$0xff] %v710_v20  ;;  %v1572_v26 = vpop.f32.mrb[14].mxu1 }
 0x13b   : > { %839 = vst [vmem:[%s1503_s23 + $0x78] sm:$0xff] %v1237_v24  ;;  %v649_v28 = vpop.f32.mrb[15].mxu0  ;;  %855 = vst [vmem:[%s1503_s23 + $0xf8] sm:$0xff] %v1572_v26  ;;  %v713_v30 = vpop.f32.mrb[15].mxu1  ;;  %v908_v38 = vmul.f32 %v1237_v24, %v1237_v24  ;;  %v921_v12 = vmul.f32 %v710_v20, %v710_v20  ;;  %v923_v17 = vmul.f32 %v1565_v18, %v1565_v18 }
 0x13c   : > { %v936_v32 = vadd.f32 %v935_v23, %v905_v22  ;;  %837 = vst [vmem:[%s1503_s23 + $0x68] sm:$0xff] %v649_v28  ;;  %v868_v33 = vadd.f32 %v867_v21, %v649_v28  ;;  %v906_v34 = vmul.f32 %v649_v28, %v649_v28  ;;  %853 = vst [vmem:[%s1503_s23 + $0xe8] sm:$0xff] %v713_v30 }
 0x13d   : > { %v924_v21 = vmul.f32 %v1572_v26, %v1572_v26 }
 0x13e   : > { %v869_v36 = vadd.f32 %v1236_v16, %v868_v33  ;;  %v937_v37 = vadd.f32 %v936_v32, %v906_v34 }
 0x140   : > { %v938_v39 = vadd.f32 %v937_v37, %v907_v35  ;;  %v870_v40 = vadd.f32 %v1237_v24, %v869_v36 }
 0x142   : > { %v871_v43 = vadd.f32 %v870_v40, %v1510_v27  ;;  %v939_v45 = vadd.f32 %v938_v39, %v908_v38  ;;  %v913_v27 = vmul.f32 %v1530_v44, %v1530_v44 }
 0x144   : > { %v940_v46 = vadd.f32 %v939_v45, %v909_v41  ;;  %v872_v47 = vadd.f32 %v871_v43, %v1520_v31 }
 0x146   : > { %v873_v52 = vadd.f32 %v1505_v25, %v872_v47  ;;  %v941_v53 = vadd.f32 %v940_v46, %v910_v48  ;;  %v915_v25 = vmul.f32 %v1525_v42, %v1525_v42 }
 0x148   : > { %v942_v55 = vadd.f32 %v941_v53, %v911_v50  ;;  %v874_v56 = vadd.f32 %v1515_v29, %v873_v52  ;;  %v916_v29 = vmul.f32 %v1535_v49, %v1535_v49 }
 0x14a   : > { %v875_v57 = vadd.f32 %v874_v56, %v1530_v44  ;;  %v943_v58 = vadd.f32 %v942_v55, %v912_v54  ;;  %v917_v44 = vmul.f32 %v1550_v0, %v1550_v0 }
 0x14c   : > { %v944_v59 = vadd.f32 %v943_v58, %v913_v27  ;;  %v876_v31 = vadd.f32 %v875_v57, %v1540_v51 }
 0x14e   : > { %v877_v61 = vadd.f32 %v1525_v42, %v876_v31  ;;  %v945_v63 = vadd.f32 %v944_v59, %v914_v60  ;;  %v919_v42 = vmul.f32 %v1545_v62, %v1545_v62 }
 0x150   : > { %v946_v1 = vadd.f32 %v945_v63, %v915_v25  ;;  %v878_v2 = vadd.f32 %v1535_v49, %v877_v61  ;;  %v920_v49 = vmul.f32 %v1555_v5, %v1555_v5 }
 0x152   : > { %v879_v3 = vadd.f32 %v878_v2, %v1550_v0  ;;  %v947_v4 = vadd.f32 %v946_v1, %v916_v29 }
 0x154   : > { %v948_v6 = vadd.f32 %v947_v4, %v917_v44  ;;  %v880_v51 = vadd.f32 %v879_v3, %v1560_v7  ;;  %v922_v7 = vmul.f32 %v713_v30, %v713_v30 }
 0x156   : > { %v881_v9 = vadd.f32 %v1545_v62, %v880_v51  ;;  %v949_v10 = vadd.f32 %v948_v6, %v918_v8 }
 0x158   : > { %v950_v11 = vadd.f32 %v949_v10, %v919_v42  ;;  %v882_v0 = vadd.f32 %v1555_v5, %v881_v9 }
 0x15a   : > { %v883_v13 = vadd.f32 %v882_v0, %v710_v20  ;;  %v951_v14 = vadd.f32 %v950_v11, %v920_v49 }
 0x15c   : > { %v952_v15 = vadd.f32 %v951_v14, %v921_v12  ;;  %v884_v16 = vadd.f32 %v883_v13, %v713_v30 }
 0x15e   : > { %v885_v19 = vadd.f32 %v1565_v18, %v884_v16  ;;  %v953_v62 = vadd.f32 %v952_v15, %v922_v7 }
 0x160   : > { %v886_v22 = vadd.f32 %v1572_v26, %v885_v19  ;;  %v954_v5 = vadd.f32 %v953_v62, %v923_v17 }
 0x162   : > { %v887_v23 = vrot.slane %v886_v22, 4  ;;  %v955_v24 = vadd.f32 %v954_v5, %v924_v21 }
 0x164   : > { %v888_v20 = vadd.f32 %v887_v23, %v886_v22  ;;  %v956_v28 = vrot.slane %v955_v24, 4 }
 0x166   : > { %v889_v32 = vrot.slane %v888_v20, 2  ;;  %v957_v30 = vadd.f32 %v956_v28, %v955_v24 }
 0x168   : > { %v890_v33 = vadd.f32 %v889_v32, %v888_v20  ;;  %v958_v34 = vrot.slane %v957_v30, 2 }
 0x16a   : > { %v891_v35 = vrot.slane %v890_v33, 1  ;;  %v959_v18 = vadd.f32 %v958_v34, %v957_v30 }
 0x16c   : > { %v892_v36 = vadd.f32 %v891_v35, %v890_v33  ;;  %v960_v37 = vrot.slane %v959_v18, 1 }
 0x16e   : > { %v961_v26 = vadd.f32 %v960_v37, %v959_v18  ;;  %962 = vst [vmem:[%s295_s27] sm:$0xff] %v892_v36 }
 0x170   : > { %963 = vst [vmem:[%s302_s30] sm:$0xff] %v961_v26 }
 0x171 PF: > { %s16_s17 = sadd.s32 1, %s1385_s17   ;;  %s1651_s15 = smov %s1381_s16 }
 0x172   : > { %p13_p6 = scmp.ge.s32.totalorder %s16_s17, 4   ;;  %s1652_s16 = smov %s1654_s19 }
 0x174   :  { %15 = sbr.rel (!%p13_p6) target bundleno = 2 (0x2), region = 96 }
 0x17b   :  { %1032 = vsyncpa [#allocation4], 1 }
 0x17c   :  { %1034 = vsyncpa [#allocation4 + $0x1], 1 }

// kernel: residual_block_forward.11
= control target key start
LH: loop header
LB: loop body
LE: loop exit
PB: predicated region body
PF: predicated region fallthrough
CT: control target
= control target key end

     0   :  { %s649_s15 = smov 0   ;;  %s854_s0 = inlined_call_operand.vmem [shape: f32[512,128], index: 0, kind: input, shape index: {}]   ;;  %s855_s1 = inlined_call_operand.vmem [shape: f32[1,128], index: 1, kind: input, shape index: {}]   ;;  %s856_s2 = inlined_call_operand.vmem [shape: f32[1,128], index: 2, kind: input, shape index: {}]   ;;  %s857_s3 = inlined_call_operand.vmem [shape: f32[512,128], index: 3, kind: input, shape index: {}]   ;;  %s858_s4 = inlined_call_operand.vmem [shape: f32[512,128], index: 4, kind: output, shape index: {}]  }
   0x1 LB: > { %s593_s16 = sadd.s32 4294967295, %s622_s15   ;;  %p597_p0 = scmp.ge.s32.totalorder %s622_s15, 1  ;;  %s622_s15 = sphi %s649_s15, %s14_s15  }
   0x2   : > { %p174_p1 = scmp.lt.s32.totalorder %s622_s15, 3 }
   0x4   : > { %p175_p2 = pnand %p597_p0, %p174_p1 }
   0x5   : > { %s598_s17 = sshll.u32 (!%p175_p2), %s593_s16, 5  ;;  %v662_v0 = vld [vmem:[%s855_s1] ss:$0 sm:$0xff] (!%p175_p2) }
   0x6   : > { %178 = sbr.rel (%p175_p2) target bundleno = 72 (0x48), region = 36  ;;  %p206_p3 = scmp.lt.s32.totalorder (!%p175_p2), %s598_s17, 63  ;;  %v674_v2 = vld [vmem:[%s856_s2] ss:$0 sm:$0xff] (!%p175_p2) }
   0xd   : > { %s860_s17 = smov (!%p206_p3, %s598_s17), 63 }
   0xe   : > { %s657_s18 = sshll.u32 %s860_s17, 3 }
   0xf   : > { %s668_s23 = scalar_lea.vmem %s854_s0, %s657_s18  ;;  %s681_s28 = scalar_lea.vmem %s857_s3, %s657_s18 }
  0x10   : > { %v223_v1 = vld [vmem:[%s668_s23] sm:$0xff]  ;;  %v224_v3 = vld [vmem:[%s668_s23 + $0x8] sm:$0xff]  ;;  %v225_v6 = vld [vmem:[%s668_s23 + $0x10] sm:$0xff]  ;;  %s706_s5 = scalar_lea.vmem %s858_s4, %s657_s18 }
  0x11   : > { %v262_v4 = vmul.f32 %v662_v0, %v223_v1  ;;  %v263_v5 = vmul.f32 %v662_v0, %v224_v3  ;;  %v264_v7 = vmul.f32 %v662_v0, %v225_v6  ;;  %v226_v8 = vld [vmem:[%s668_s23 + $0x18] sm:$0xff]  ;;  %v227_v9 = vld [vmem:[%s668_s23 + $0x20] sm:$0xff]  ;;  %v228_v14 = vld [vmem:[%s668_s23 + $0x28] sm:$0xff] }
  0x12   : > { %v265_v12 = vmul.f32 %v662_v0, %v226_v8  ;;  %v266_v13 = vmul.f32 %v662_v0, %v227_v9  ;;  %v429_v15 = vld [vmem:[%s681_s28] sm:$0xff]  ;;  %v430_v16 = vld [vmem:[%s681_s28 + $0x8] sm:$0xff]  ;;  %v267_v18 = vmul.f32 %v662_v0, %v228_v14  ;;  %v229_v19 = vld [vmem:[%s668_s23 + $0x30] sm:$0xff] }
  0x13   : > { %v301_v10 = vadd.f32 %v674_v2, %v262_v4  ;;  %v302_v11 = vadd.f32 %v674_v2, %v263_v5  ;;  %v303_v17 = vadd.f32 %v674_v2, %v264_v7  ;;  %v431_v23 = vld [vmem:[%s681_s28 + $0x10] sm:$0xff]  ;;  %v268_v29 = vmul.f32 %v662_v0, %v229_v19  ;;  %v230_v30 = vld [vmem:[%s668_s23 + $0x38] sm:$0xff]  ;;  %v231_v35 = vld [vmem:[%s668_s23 + $0x40] sm:$0xff] }
  0x14   : > { %v304_v24 = vadd.f32 %v674_v2, %v265_v12  ;;  %v305_v25 = vadd.f32 %v674_v2, %v266_v13  ;;  %v306_v28 = vadd.f32 %v674_v2, %v267_v18  ;;  %v432_v34 = vld [vmem:[%s681_s28 + $0x18] sm:$0xff]  ;;  %v232_v36 = vld [vmem:[%s668_s23 + $0x48] sm:$0xff]  ;;  %v433_v40 = vld [vmem:[%s681_s28 + $0x20] sm:$0xff]  ;;  %v269_v44 = vmul.f32 %v662_v0, %v230_v30 }
  0x15   : > { %vm333_vm0 = vcmp.gt.f32.partialorder %v301_v10, 0.0  ;;  %v365_v20 = vmul.f32 0.1, %v301_v10  ;;  %vm334_vm1 = vcmp.gt.f32.partialorder %v302_v11, 0.0  ;;  %v366_v21 = vmul.f32 0.1, %v302_v11 }
  0x16   : > { %vm335_vm2 = vcmp.gt.f32.partialorder %v303_v17, 0.0  ;;  %v367_v22 = vmul.f32 0.1, %v303_v17  ;;  %vm336_vm3 = vcmp.gt.f32.partialorder %v304_v24, 0.0  ;;  %v368_v38 = vmul.f32 0.1, %v304_v24 }
  0x17   : > { %v397_v26 = vsel %vm333_vm0, %v301_v10, %v365_v20  ;;  %v398_v27 = vsel %vm334_vm1, %v302_v11, %v366_v21  ;;  %vm337_vm4 = vcmp.gt.f32.partialorder %v305_v25, 0.0  ;;  %v369_v39 = vmul.f32 0.1, %v305_v25  ;;  %v434_v42 = vld [vmem:[%s681_s28 + $0x28] sm:$0xff]  ;;  %v233_v49 = vld [vmem:[%s668_s23 + $0x50] sm:$0xff]  ;;  %v234_v50 = vld [vmem:[%s668_s23 + $0x58] sm:$0xff] }
  0x18   : > { %v461_v31 = vadd.f32 %v429_v15, %v397_v26  ;;  %v462_v32 = vadd.f32 %v430_v16, %v398_v27  ;;  %v399_v33 = vsel %vm335_vm2, %v303_v17, %v367_v22  ;;  %vm338_vm5 = vcmp.gt.f32.partialorder %v306_v28, 0.0  ;;  %v235_v51 = vld [vmem:[%s668_s23 + $0x60] sm:$0xff]  ;;  %v435_v57 = vld [vmem:[%s681_s28 + $0x30] sm:$0xff]  ;;  %v436_v60 = vld [vmem:[%s681_s28 + $0x38] sm:$0xff] }
  0x19   : > { %v463_v37 = vadd.f32 %v431_v23, %v399_v33  ;;  %v370_v41 = vmul.f32 0.1, %v306_v28  ;;  %v307_v43 = vadd.f32 %v674_v2, %v268_v29  ;;  %v400_v45 = vsel %vm336_vm3, %v304_v24, %v368_v38  ;;  %v437_v5 = vld [vmem:[%s681_s28 + $0x40] sm:$0xff]  ;;  %v236_v6 = vld [vmem:[%s668_s23 + $0x68] sm:$0xff]  ;;  %v439_v18 = vld [vmem:[%s681_s28 + $0x50] sm:$0xff] }
  0x1a   : > { %493 = vst [vmem:[%s706_s5] sm:$0xff] %v461_v31  ;;  %494 = vst [vmem:[%s706_s5 + $0x8] sm:$0xff] %v462_v32  ;;  %v401_v46 = vsel %vm337_vm4, %v305_v25, %v369_v39  ;;  %v270_v47 = vmul.f32 %v662_v0, %v231_v35  ;;  %v271_v48 = vmul.f32 %v662_v0, %v232_v36  ;;  %v438_v10 = vld [vmem:[%s681_s28 + $0x48] sm:$0xff]  ;;  %v237_v20 = vld [vmem:[%s668_s23 + $0x70] sm:$0xff] }
  0x1b   : > { %495 = vst [vmem:[%s706_s5 + $0x10] sm:$0xff] %v463_v37  ;;  %v464_v52 = vadd.f32 %v432_v34, %v400_v45  ;;  %v465_v53 = vadd.f32 %v433_v40, %v401_v46  ;;  %v402_v54 = vsel %vm338_vm5, %v306_v28, %v370_v41  ;;  %vm339_vm6 = vcmp.gt.f32.partialorder %v307_v43, 0.0  ;;  %v238_v21 = vld [vmem:[%s668_s23 + $0x78] sm:$0xff]  ;;  %v441_v26 = vld [vmem:[%s681_s28 + $0x60] sm:$0xff]  ;;  %v240_v34 = vld [vmem:[%s668_s23 + $0x88] sm:$0xff] }
  0x1c   : > { %v466_v55 = vadd.f32 %v434_v42, %v402_v54  ;;  %v371_v56 = vmul.f32 0.1, %v307_v43  ;;  %v308_v58 = vadd.f32 %v674_v2, %v269_v44  ;;  %v309_v59 = vadd.f32 %v674_v2, %v270_v47  ;;  %v440_v25 = vld [vmem:[%s681_s28 + $0x58] sm:$0xff]  ;;  %v239_v27 = vld [vmem:[%s668_s23 + $0x80] sm:$0xff]  ;;  %v241_v39 = vld [vmem:[%s668_s23 + $0x90] sm:$0xff] }
  0x1d   : > { %496 = vst [vmem:[%s706_s5 + $0x18] sm:$0xff] %v464_v52  ;;  %497 = vst [vmem:[%s706_s5 + $0x20] sm:$0xff] %v465_v53  ;;  %v310_v61 = vadd.f32 %v674_v2, %v271_v48  ;;  %v272_v62 = vmul.f32 %v662_v0, %v233_v49  ;;  %v273_v63 = vmul.f32 %v662_v0, %v234_v50  ;;  %v242_v40 = vld [vmem:[%s668_s23 + $0x98] sm:$0xff]  ;;  %v243_v41 = vld [vmem:[%s668_s23 + $0xa0] sm:$0xff] }
  0x1e   : > { %v274_v1 = vmul.f32 %v662_v0, %v235_v51  ;;  %498 = vst [vmem:[%s706_s5 + $0x28] sm:$0xff] %v466_v55  ;;  %v403_v3 = vsel %vm339_vm6, %v307_v43, %v371_v56  ;;  %vm340_vm7 = vcmp.gt.f32.partialorder %v308_v58, 0.0  ;;  %v372_v4 = vmul.f32 0.1, %v308_v58  ;;  %v442_v45 = vld [vmem:[%s681_s28 + $0x68] sm:$0xff]  ;;  %v443_v56 = vld [vmem:[%s681_s28 + $0x70] sm:$0xff] }
  0x1f   : > { %vm341_vm8 = vcmp.gt.f32.partialorder %v309_v59, 0.0  ;;  %v467_v7 = vadd.f32 %v435_v57, %v403_v3  ;;  %v373_v8 = vmul.f32 0.1, %v309_v59  ;;  %vm342_vm9 = vcmp.gt.f32.partialorder %v310_v61, 0.0  ;;  %v444_v57 = vld [vmem:[%s681_s28 + $0x78] sm:$0xff] }
  0x20   : > { %v374_v9 = vmul.f32 0.1, %v310_v61  ;;  %v404_v11 = vsel %vm340_vm7, %v308_v58, %v372_v4  ;;  %v311_v12 = vadd.f32 %v674_v2, %v272_v62  ;;  %v312_v13 = vadd.f32 %v674_v2, %v273_v63 }
  0x21   : > { %v313_v14 = vadd.f32 %v674_v2, %v274_v1  ;;  %499 = vst [vmem:[%s706_s5 + $0x30] sm:$0xff] %v467_v7  ;;  %v468_v15 = vadd.f32 %v436_v60, %v404_v11  ;;  %v405_v16 = vsel %vm341_vm8, %v309_v59, %v373_v8  ;;  %v275_v19 = vmul.f32 %v662_v0, %v236_v6  ;;  %v445_v60 = vld [vmem:[%s681_s28 + $0x80] sm:$0xff]  ;;  %v446_v7 = vld [vmem:[%s681_s28 + $0x88] sm:$0xff] }
  0x22   : > { %v406_v17 = vsel %vm342_vm9, %v310_v61, %v374_v9  ;;  %v469_v22 = vadd.f32 %v437_v5, %v405_v16  ;;  %vm343_vm10 = vcmp.gt.f32.partialorder %v311_v12, 0.0  ;;  %v375_v24 = vmul.f32 0.1, %v311_v12  ;;  %v244_v8 = vld [vmem:[%s668_s23 + $0xa8] sm:$0xff]  ;;  %v245_v9 = vld [vmem:[%s668_s23 + $0xb0] sm:$0xff] }
  0x23   : > { %v470_v23 = vadd.f32 %v438_v10, %v406_v17  ;;  %500 = vst [vmem:[%s706_s5 + $0x38] sm:$0xff] %v468_v15  ;;  %vm344_vm11 = vcmp.gt.f32.partialorder %v312_v13, 0.0  ;;  %v376_v28 = vmul.f32 0.1, %v312_v13  ;;  %vm345_vm12 = vcmp.gt.f32.partialorder %v313_v14, 0.0  ;;  %v246_v15 = vld [vmem:[%s668_s23 + $0xb8] sm:$0xff] }
  0x24   : > { %v377_v29 = vmul.f32 0.1, %v313_v14  ;;  %501 = vst [vmem:[%s706_s5 + $0x40] sm:$0xff] %v469_v22  ;;  %v407_v30 = vsel %vm343_vm10, %v311_v12, %v375_v24  ;;  %v314_v31 = vadd.f32 %v674_v2, %v275_v19  ;;  %v276_v32 = vmul.f32 %v662_v0, %v237_v20  ;;  %v449_v20 = vld [vmem:[%s681_s28 + $0xa0] sm:$0xff] }
  0x25   : > { %502 = vst [vmem:[%s706_s5 + $0x48] sm:$0xff] %v470_v23  ;;  %v277_v33 = vmul.f32 %v662_v0, %v238_v21  ;;  %v471_v35 = vadd.f32 %v439_v18, %v407_v30  ;;  %v408_v36 = vsel %vm344_vm11, %v312_v13, %v376_v28  ;;  %v278_v38 = vmul.f32 %v662_v0, %v239_v27  ;;  %v447_v13 = vld [vmem:[%s681_s28 + $0x90] sm:$0xff]  ;;  %v247_v23 = vld [vmem:[%s668_s23 + $0xc0] sm:$0xff]  ;;  %v248_v28 = vld [vmem:[%s668_s23 + $0xc8] sm:$0xff] }
  0x26   : > { %v409_v37 = vsel %vm345_vm12, %v313_v14, %v377_v29  ;;  %v472_v42 = vadd.f32 %v440_v25, %v408_v36  ;;  %vm346_vm13 = vcmp.gt.f32.partialorder %v314_v31, 0.0  ;;  %v378_v44 = vmul.f32 0.1, %v314_v31  ;;  %v448_v14 = vld [vmem:[%s681_s28 + $0x98] sm:$0xff]  ;;  %v249_v29 = vld [vmem:[%s668_s23 + $0xd0] sm:$0xff] }
  0x27   : > { %v473_v43 = vadd.f32 %v441_v26, %v409_v37  ;;  %503 = vst [vmem:[%s706_s5 + $0x50] sm:$0xff] %v471_v35  ;;  %v315_v46 = vadd.f32 %v674_v2, %v276_v32  ;;  %v316_v47 = vadd.f32 %v674_v2, %v277_v33  ;;  %v317_v48 = vadd.f32 %v674_v2, %v278_v38  ;;  %v450_v35 = vld [vmem:[%s681_s28 + $0xa8] sm:$0xff] }
  0x28   : > { %v279_v49 = vmul.f32 %v662_v0, %v240_v34  ;;  %504 = vst [vmem:[%s706_s5 + $0x58] sm:$0xff] %v472_v42  ;;  %v410_v50 = vsel %vm346_vm13, %v314_v31, %v378_v44  ;;  %v280_v51 = vmul.f32 %v662_v0, %v241_v39  ;;  %v281_v52 = vmul.f32 %v662_v0, %v242_v40  ;;  %v451_v40 = vld [vmem:[%s681_s28 + $0xb0] sm:$0xff]  ;;  %v250_v44 = vld [vmem:[%s668_s23 + $0xd8] sm:$0xff] }
  0x29   : > { %505 = vst [vmem:[%s706_s5 + $0x60] sm:$0xff] %v473_v43  ;;  %v282_v53 = vmul.f32 %v662_v0, %v243_v41  ;;  %v474_v54 = vadd.f32 %v442_v45, %v410_v50  ;;  %vm347_vm14 = vcmp.gt.f32.partialorder %v315_v46, 0.0  ;;  %v379_v55 = vmul.f32 0.1, %v315_v46  ;;  %v452_v41 = vld [vmem:[%s681_s28 + $0xb8] sm:$0xff] }
  0x2a   : > { %vm348_vm15 = vcmp.gt.f32.partialorder %v316_v47, 0.0  ;;  %v380_v58 = vmul.f32 0.1, %v316_v47  ;;  %vm349_vm0 = vcmp.gt.f32.partialorder %v317_v48, 0.0  ;;  %v381_v59 = vmul.f32 0.1, %v317_v48 }
  0x2b   : > { %v318_v61 = vadd.f32 %v674_v2, %v279_v49  ;;  %506 = vst [vmem:[%s706_s5 + $0x68] sm:$0xff] %v474_v54  ;;  %v411_v62 = vsel %vm347_vm14, %v315_v46, %v379_v55  ;;  %v319_v63 = vadd.f32 %v674_v2, %v280_v51  ;;  %v320_v1 = vadd.f32 %v674_v2, %v281_v52  ;;  %v453_v54 = vld [vmem:[%s681_s28 + $0xc0] sm:$0xff] }
  0x2c   : > { %v321_v3 = vadd.f32 %v674_v2, %v282_v53  ;;  %v475_v4 = vadd.f32 %v443_v56, %v411_v62  ;;  %v412_v5 = vsel %vm348_vm15, %v316_v47, %v380_v58  ;;  %v413_v6 = vsel %vm349_vm0, %v317_v48, %v381_v59  ;;  %v251_v56 = vld [vmem:[%s668_s23 + $0xe0] sm:$0xff]  ;;  %v455_v62 = vld [vmem:[%s681_s28 + $0xd0] sm:$0xff] }
  0x2d   : > { %vm350_vm1 = vcmp.gt.f32.partialorder %v318_v61, 0.0  ;;  %v476_v10 = vadd.f32 %v444_v57, %v412_v5  ;;  %v477_v11 = vadd.f32 %v445_v60, %v413_v6  ;;  %v382_v12 = vmul.f32 0.1, %v318_v61  ;;  %v252_v57 = vld [vmem:[%s668_s23 + $0xe8] sm:$0xff] }
  0x2e   : > { %vm351_vm2 = vcmp.gt.f32.partialorder %v319_v63, 0.0  ;;  %507 = vst [vmem:[%s706_s5 + $0x70] sm:$0xff] %v475_v4  ;;  %v383_v16 = vmul.f32 0.1, %v319_v63  ;;  %vm352_vm3 = vcmp.gt.f32.partialorder %v320_v1, 0.0  ;;  %vm353_vm4 = vcmp.gt.f32.partialorder %v321_v3, 0.0 }
  0x2f   : > { %v384_v17 = vmul.f32 0.1, %v320_v1  ;;  %508 = vst [vmem:[%s706_s5 + $0x78] sm:$0xff] %v476_v10  ;;  %509 = vst [vmem:[%s706_s5 + $0x80] sm:$0xff] %v477_v11  ;;  %v414_v18 = vsel %vm350_vm1, %v318_v61, %v382_v12  ;;  %v385_v19 = vmul.f32 0.1, %v321_v3  ;;  %v283_v21 = vmul.f32 %v662_v0, %v244_v8 }
  0x30   : > { %v284_v22 = vmul.f32 %v662_v0, %v245_v9  ;;  %v478_v24 = vadd.f32 %v446_v7, %v414_v18  ;;  %v415_v25 = vsel %vm351_vm2, %v319_v63, %v383_v16  ;;  %v285_v27 = vmul.f32 %v662_v0, %v246_v15  ;;  %v454_v61 = vld [vmem:[%s681_s28 + $0xc8] sm:$0xff]  ;;  %v253_v63 = vld [vmem:[%s668_s23 + $0xf0] sm:$0xff]  ;;  %v254_v8 = vld [vmem:[%s668_s23 + $0xf8] sm:$0xff] }
  0x31   : > { %v416_v26 = vsel %vm352_vm3, %v320_v1, %v384_v17  ;;  %v479_v30 = vadd.f32 %v447_v13, %v415_v25  ;;  %v417_v32 = vsel %vm353_vm4, %v321_v3, %v385_v19  ;;  %v322_v33 = vadd.f32 %v674_v2, %v283_v21  ;;  %v456_v16 = vld [vmem:[%s681_s28 + $0xd8] sm:$0xff]  ;;  %v458_v25 = vld [vmem:[%s681_s28 + $0xe8] sm:$0xff] }
  0x32   : > { %v480_v31 = vadd.f32 %v448_v14, %v416_v26  ;;  %510 = vst [vmem:[%s706_s5 + $0x88] sm:$0xff] %v478_v24  ;;  %v481_v34 = vadd.f32 %v449_v20, %v417_v32  ;;  %v323_v36 = vadd.f32 %v674_v2, %v284_v22  ;;  %v324_v37 = vadd.f32 %v674_v2, %v285_v27  ;;  %v457_v24 = vld [vmem:[%s681_s28 + $0xe0] sm:$0xff] }
  0x33   : > { %v286_v38 = vmul.f32 %v662_v0, %v247_v23  ;;  %511 = vst [vmem:[%s706_s5 + $0x90] sm:$0xff] %v479_v30  ;;  %vm354_vm5 = vcmp.gt.f32.partialorder %v322_v33, 0.0  ;;  %v386_v39 = vmul.f32 0.1, %v322_v33  ;;  %v287_v42 = vmul.f32 %v662_v0, %v248_v28  ;;  %v459_v28 = vld [vmem:[%s681_s28 + $0xf0] sm:$0xff] }
  0x34   : > { %512 = vst [vmem:[%s706_s5 + $0x98] sm:$0xff] %v480_v31  ;;  %v288_v43 = vmul.f32 %v662_v0, %v249_v29  ;;  %513 = vst [vmem:[%s706_s5 + $0xa0] sm:$0xff] %v481_v34  ;;  %vm355_vm6 = vcmp.gt.f32.partialorder %v323_v36, 0.0  ;;  %v387_v45 = vmul.f32 0.1, %v323_v36  ;;  %vm356_vm7 = vcmp.gt.f32.partialorder %v324_v37, 0.0 }
  0x35   : > { %v388_v46 = vmul.f32 0.1, %v324_v37  ;;  %v418_v47 = vsel %vm354_vm5, %v322_v33, %v386_v39  ;;  %v325_v48 = vadd.f32 %v674_v2, %v286_v38  ;;  %v326_v49 = vadd.f32 %v674_v2, %v287_v42 }
  0x36   : > { %v327_v50 = vadd.f32 %v674_v2, %v288_v43  ;;  %v482_v51 = vadd.f32 %v450_v35, %v418_v47  ;;  %v419_v52 = vsel %vm355_vm6, %v323_v36, %v387_v45  ;;  %v289_v55 = vmul.f32 %v662_v0, %v250_v44  ;;  %v460_v36 = vld [vmem:[%s681_s28 + $0xf8] sm:$0xff] }
  0x37   : > { %v420_v53 = vsel %vm356_vm7, %v324_v37, %v388_v46  ;;  %v483_v58 = vadd.f32 %v451_v40, %v419_v52  ;;  %vm357_vm8 = vcmp.gt.f32.partialorder %v325_v48, 0.0  ;;  %v389_v60 = vmul.f32 0.1, %v325_v48 }
  0x38   : > { %v484_v59 = vadd.f32 %v452_v41, %v420_v53  ;;  %514 = vst [vmem:[%s706_s5 + $0xa8] sm:$0xff] %v482_v51  ;;  %vm358_vm9 = vcmp.gt.f32.partialorder %v326_v49, 0.0  ;;  %v390_v1 = vmul.f32 0.1, %v326_v49  ;;  %vm359_vm10 = vcmp.gt.f32.partialorder %v327_v50, 0.0 }
  0x39   : > { %v391_v3 = vmul.f32 0.1, %v327_v50  ;;  %515 = vst [vmem:[%s706_s5 + $0xb0] sm:$0xff] %v483_v58  ;;  %v421_v4 = vsel %vm357_vm8, %v325_v48, %v389_v60  ;;  %v328_v5 = vadd.f32 %v674_v2, %v289_v55  ;;  %v290_v6 = vmul.f32 %v662_v0, %v251_v56 }
  0x3a   : > { %516 = vst [vmem:[%s706_s5 + $0xb8] sm:$0xff] %v484_v59  ;;  %v291_v7 = vmul.f32 %v662_v0, %v252_v57  ;;  %v485_v9 = vadd.f32 %v453_v54, %v421_v4  ;;  %v422_v10 = vsel %vm358_vm9, %v326_v49, %v390_v1  ;;  %v292_v12 = vmul.f32 %v662_v0, %v253_v63 }
  0x3b   : > { %v423_v11 = vsel %vm359_vm10, %v327_v50, %v391_v3  ;;  %v486_v13 = vadd.f32 %v454_v61, %v422_v10  ;;  %vm360_vm11 = vcmp.gt.f32.partialorder %v328_v5, 0.0  ;;  %v392_v15 = vmul.f32 0.1, %v328_v5 }
  0x3c   : > { %v487_v14 = vadd.f32 %v455_v62, %v423_v11  ;;  %517 = vst [vmem:[%s706_s5 + $0xc0] sm:$0xff] %v485_v9  ;;  %v329_v17 = vadd.f32 %v674_v2, %v290_v6  ;;  %v330_v18 = vadd.f32 %v674_v2, %v291_v7  ;;  %v331_v19 = vadd.f32 %v674_v2, %v292_v12 }
  0x3d   : > { %v293_v20 = vmul.f32 %v662_v0, %v254_v8  ;;  %518 = vst [vmem:[%s706_s5 + $0xc8] sm:$0xff] %v486_v13  ;;  %v424_v21 = vsel %vm360_vm11, %v328_v5, %v392_v15 }
  0x3e   : > { %519 = vst [vmem:[%s706_s5 + $0xd0] sm:$0xff] %v487_v14  ;;  %v488_v22 = vadd.f32 %v456_v16, %v424_v21  ;;  %vm361_vm12 = vcmp.gt.f32.partialorder %v329_v17, 0.0  ;;  %v393_v23 = vmul.f32 0.1, %v329_v17  ;;  %vm362_vm13 = vcmp.gt.f32.partialorder %v330_v18, 0.0 }
  0x3f   : > { %v394_v26 = vmul.f32 0.1, %v330_v18  ;;  %vm363_vm14 = vcmp.gt.f32.partialorder %v331_v19, 0.0  ;;  %v395_v27 = vmul.f32 0.1, %v331_v19  ;;  %v332_v29 = vadd.f32 %v674_v2, %v293_v20 }
  0x40   : > { %520 = vst [vmem:[%s706_s5 + $0xd8] sm:$0xff] %v488_v22  ;;  %v425_v0 = vsel %vm361_vm12, %v329_v17, %v393_v23 }
  0x41   : > { %v489_v30 = vadd.f32 %v457_v24, %v425_v0  ;;  %v426_v31 = vsel %vm362_vm13, %v330_v18, %v394_v26  ;;  %v427_v32 = vsel %vm363_vm14, %v331_v19, %v395_v27  ;;  %vm364_vm15 = vcmp.gt.f32.partialorder %v332_v29, 0.0 }
  0x42   : > { %v490_v33 = vadd.f32 %v458_v25, %v426_v31  ;;  %v491_v34 = vadd.f32 %v459_v28, %v427_v32  ;;  %v396_v35 = vmul.f32 0.1, %v332_v29 }
  0x43   : > { %521 = vst [vmem:[%s706_s5 + $0xe0] sm:$0xff] %v489_v30 }
  0x44   : > { %522 = vst [vmem:[%s706_s5 + $0xe8] sm:$0xff] %v490_v33  ;;  %523 = vst [vmem:[%s706_s5 + $0xf0] sm:$0xff] %v491_v34  ;;  %v428_v37 = vsel %vm364_vm15, %v332_v29, %v396_v35 }
  0x45   : > { %v492_v38 = vadd.f32 %v460_v36, %v428_v37 }
  0x47   : > { %524 = vst [vmem:[%s706_s5 + $0xf8] sm:$0xff] %v492_v38 }
  0x48 PF: > { %s14_s15 = sadd.s32 1, %s622_s15  }
  0x49   : > { %p11_p4 = scmp.ge.s32.totalorder %s14_s15, 4  }
  0x4b   :  { %13 = sbr.rel (!%p11_p4) target bundleno = 1 (0x1), region = 69 }

// kernel: residual_block_forward.10
= control target key start
LH: loop header
LB: loop body
LE: loop exit
PB: predicated region body
PF: predicated region fallthrough
CT: control target
= control target key end

     0   :  { %s2375_s15 = smov 0   ;;  %s2377_s16 = smov 0   ;;  %s2911_s0 = inlined_call_operand.vmem [shape: bf16[512,1152], index: 0, kind: input, shape index: {}]   ;;  %s2912_s1 = inlined_call_operand.vmem [shape: bf16[1152,128], index: 1, kind: input, shape index: {}]   ;;  %s2913_s2 = inlined_call_operand.vmem [shape: f32[512,128], index: 2, kind: output, shape index: {0}]   ;;  %s2914_s3 = inlined_call_operand.vmem [shape: f32[2,8,128], index: 3, kind: output, shape index: {1}]   ;;  %s2915_s4 = inlined_call_operand.vmem [shape: f32[2,8,128], index: 4, kind: output, shape index: {2}]  }
   0x1   :  { %s2379_s17 = smov 0   ;;  %s2381_s18 = smov 0  }
   0x2   :  { %s2383_s19 = smov 0   ;;  %s2385_s20 = smov 0  }
   0x3   :  { %s2387_s21 = smov 0  }
   0x4 LB: > { %s27_s22 = sadd.s32 1, %s2339_s19  ;;  %s34_s23 = sadd.s32 1, %s2343_s20  ;;  %s2347_s21 = sphi %s2387_s21, %s15_s21   ;;  %s2343_s20 = sphi %s2385_s20, %s2921_s20   ;;  %s2339_s19 = sphi %s2383_s19, %s2920_s19   ;;  %s2335_s18 = sphi %s2381_s18, %s2919_s18   ;;  %s2331_s17 = sphi %s2379_s17, %s2918_s17   ;;  %s2327_s16 = sphi %s2377_s16, %s2917_s16   ;;  %s2323_s15 = sphi %s2375_s15, %s2916_s15  }
   0x5   : > { %p28_p0 = scmp.ge.s32.totalorder %s27_s22, 3  ;;  %p50_p1 = scmp.ne.s32.totalorder %s2327_s16, %s2323_s15 }
   0x6   : > { %p51_p2 = scmp.eq.s32.totalorder %s2347_s21, 0  ;;  %s43_s27 = sadd.s32 1, %s2327_s16 }
   0x7   : > { %s2923_s22 = smov (%p28_p0, %s27_s22), 0  ;;  %s2925_s23 = smov (!%p28_p0, %s34_s23), %s2343_s20 }
   0x8   : > { %p52_p3 = por %p51_p2, %p50_p1  ;;  %p36_p4 = scmp.ge.s32.totalorder %s2925_s23, 2 }
   0x9   : > { %s39_s24 = ssub.s32 %s2339_s19, %s2923_s22  ;;  %p1795_p6 = scmp.ge.s32.totalorder %s2347_s21, 6 }
   0xa   : > { %s2927_s23 = smov (%p36_p4, %s2925_s23), 0 }
   0xb   : > { %s38_s25 = ssub.s32 %s2343_s20, %s2927_s23  ;;  %188 = sbr.rel (%p1795_p6) target bundleno = 64 (0x40), region = 16 }
   0xc   : > { %s40_s26 = sor.u32 %s39_s24, %s38_s25 }
   0xd   : > { %p41_p5 = scmp.eq.s32.totalorder %s40_s26, 0 }
   0xf   : > { %s2426_s28 = scalar_select %p41_p5, %s2327_s16, %s43_s27  }
  0x12   : > { %191 = sbr.rel (!%p52_p3) target bundleno = 64 (0x40), region = 20  ;;  %s193_s29 = sand.u32 (%p52_p3), 1, %s2327_s16  }
  0x13   : > { %s197_s30 = smul.u32 (%p52_p3), 3, %s2339_s19 }
  0x14   : > { %s2145_s5 = smul.u32 (%p52_p3), 384, %s193_s29 }
  0x15   : > { %s2146_s6 = smul.u32 (%p52_p3), 288, %s2343_s20 }
  0x16   : > { %s2440_s12 = scalar_lea.vmem (%p52_p3), [#allocation3], %s2145_s5 }
  0x17   : > { %s199_s7 = sadd.s32 (%p52_p3), %s2146_s6, %s197_s30 }
  0x18   : > { %s1798_s8 = sshll.u32 (%p52_p3), %s199_s7, 2 }
  0x19   : > { %s2435_s11 = scalar_lea.vmem %s2911_s0, %s1798_s8 }
  0x1a   : > { %v216_v0 = vld [vmem:[%s2435_s11] sm:$0xff]  ;;  %v220_v2 = vld [vmem:[%s2435_s11 + $0x48] sm:$0xff]  ;;  %v224_v4 = vld [vmem:[%s2435_s11 + $0x90] sm:$0xff] }
  0x1b   : > { %v218_v1 = vld [vmem:[%s2435_s11 + $0x24] sm:$0xff]  ;;  %217 = vst [vmem:[%s2440_s12] sm:$0xff] %v216_v0  ;;  %221 = vst [vmem:[%s2440_s12 + $0x18] sm:$0xff] %v220_v2  ;;  %v222_v3 = vld [vmem:[%s2435_s11 + $0x6c] sm:$0xff] }
  0x1c   : > { %219 = vst [vmem:[%s2440_s12 + $0xc] sm:$0xff] %v218_v1  ;;  %v226_v5 = vld [vmem:[%s2435_s11 + $0xb4] sm:$0xff]  ;;  %223 = vst [vmem:[%s2440_s12 + $0x24] sm:$0xff] %v222_v3  ;;  %v230_v7 = vld [vmem:[%s2435_s11 + $0xfc] sm:$0xff] }
  0x1d   : > { %225 = vst [vmem:[%s2440_s12 + $0x30] sm:$0xff] %v224_v4  ;;  %227 = vst [vmem:[%s2440_s12 + $0x3c] sm:$0xff] %v226_v5  ;;  %v228_v6 = vld [vmem:[%s2435_s11 + $0xd8] sm:$0xff]  ;;  %v232_v8 = vld [vmem:[%s2435_s11 + $0x120] sm:$0xff] }
  0x1e   : > { %229 = vst [vmem:[%s2440_s12 + $0x48] sm:$0xff] %v228_v6  ;;  %231 = vst [vmem:[%s2440_s12 + $0x54] sm:$0xff] %v230_v7  ;;  %v234_v9 = vld [vmem:[%s2435_s11 + $0x144] sm:$0xff]  ;;  %v238_v11 = vld [vmem:[%s2435_s11 + $0x18c] sm:$0xff] }
  0x1f   : > { %233 = vst [vmem:[%s2440_s12 + $0x60] sm:$0xff] %v232_v8  ;;  %v236_v10 = vld [vmem:[%s2435_s11 + $0x168] sm:$0xff]  ;;  %235 = vst [vmem:[%s2440_s12 + $0x6c] sm:$0xff] %v234_v9  ;;  %v240_v12 = vld [vmem:[%s2435_s11 + $0x1b0] sm:$0xff] }
  0x20   : > { %237 = vst [vmem:[%s2440_s12 + $0x78] sm:$0xff] %v236_v10  ;;  %239 = vst [vmem:[%s2440_s12 + $0x84] sm:$0xff] %v238_v11  ;;  %v242_v13 = vld [vmem:[%s2435_s11 + $0x1d4] sm:$0xff]  ;;  %v246_v15 = vld [vmem:[%s2435_s11 + $0x21c] sm:$0xff] }
  0x21   : > { %v244_v14 = vld [vmem:[%s2435_s11 + $0x1f8] sm:$0xff]  ;;  %241 = vst [vmem:[%s2440_s12 + $0x90] sm:$0xff] %v240_v12  ;;  %243 = vst [vmem:[%s2440_s12 + $0x9c] sm:$0xff] %v242_v13  ;;  %v248_v16 = vld [vmem:[%s2435_s11 + $0x240] sm:$0xff] }
  0x22   : > { %245 = vst [vmem:[%s2440_s12 + $0xa8] sm:$0xff] %v244_v14  ;;  %v250_v17 = vld [vmem:[%s2435_s11 + $0x264] sm:$0xff]  ;;  %247 = vst [vmem:[%s2440_s12 + $0xb4] sm:$0xff] %v246_v15  ;;  %v254_v19 = vld [vmem:[%s2435_s11 + $0x2ac] sm:$0xff] }
  0x23   : > { %249 = vst [vmem:[%s2440_s12 + $0xc0] sm:$0xff] %v248_v16  ;;  %251 = vst [vmem:[%s2440_s12 + $0xcc] sm:$0xff] %v250_v17  ;;  %v252_v18 = vld [vmem:[%s2435_s11 + $0x288] sm:$0xff]  ;;  %v256_v20 = vld [vmem:[%s2435_s11 + $0x2d0] sm:$0xff] }
  0x24   : > { %253 = vst [vmem:[%s2440_s12 + $0xd8] sm:$0xff] %v252_v18  ;;  %255 = vst [vmem:[%s2440_s12 + $0xe4] sm:$0xff] %v254_v19  ;;  %v258_v21 = vld [vmem:[%s2435_s11 + $0x2f4] sm:$0xff]  ;;  %v262_v23 = vld [vmem:[%s2435_s11 + $0x33c] sm:$0xff] }
  0x25   : > { %257 = vst [vmem:[%s2440_s12 + $0xf0] sm:$0xff] %v256_v20  ;;  %v260_v22 = vld [vmem:[%s2435_s11 + $0x318] sm:$0xff]  ;;  %259 = vst [vmem:[%s2440_s12 + $0xfc] sm:$0xff] %v258_v21  ;;  %v264_v24 = vld [vmem:[%s2435_s11 + $0x360] sm:$0xff] }
  0x26   : > { %261 = vst [vmem:[%s2440_s12 + $0x108] sm:$0xff] %v260_v22  ;;  %263 = vst [vmem:[%s2440_s12 + $0x114] sm:$0xff] %v262_v23  ;;  %v266_v25 = vld [vmem:[%s2435_s11 + $0x384] sm:$0xff]  ;;  %v270_v27 = vld [vmem:[%s2435_s11 + $0x3cc] sm:$0xff] }
  0x27   : > { %v268_v26 = vld [vmem:[%s2435_s11 + $0x3a8] sm:$0xff]  ;;  %265 = vst [vmem:[%s2440_s12 + $0x120] sm:$0xff] %v264_v24  ;;  %267 = vst [vmem:[%s2440_s12 + $0x12c] sm:$0xff] %v266_v25  ;;  %v272_v28 = vld [vmem:[%s2435_s11 + $0x3f0] sm:$0xff] }
  0x28   : > { %269 = vst [vmem:[%s2440_s12 + $0x138] sm:$0xff] %v268_v26  ;;  %v274_v29 = vld [vmem:[%s2435_s11 + $0x414] sm:$0xff]  ;;  %271 = vst [vmem:[%s2440_s12 + $0x144] sm:$0xff] %v270_v27  ;;  %v278_v31 = vld [vmem:[%s2435_s11 + $0x45c] sm:$0xff] }
  0x29   : > { %273 = vst [vmem:[%s2440_s12 + $0x150] sm:$0xff] %v272_v28  ;;  %275 = vst [vmem:[%s2440_s12 + $0x15c] sm:$0xff] %v274_v29  ;;  %v276_v30 = vld [vmem:[%s2435_s11 + $0x438] sm:$0xff]  ;;  %v1799_v32 = vld [vmem:[%s2435_s11 + $0x8] sm:$0xf] }
  0x2a   : > { %277 = vst [vmem:[%s2440_s12 + $0x168] sm:$0xff] %v276_v30  ;;  %279 = vst [vmem:[%s2440_s12 + $0x174] sm:$0xff] %v278_v31  ;;  %v1801_v33 = vld [vmem:[%s2435_s11 + $0x2c] sm:$0xf]  ;;  %v1803_v34 = vld [vmem:[%s2435_s11 + $0x50] sm:$0xf] }
  0x2b   : > { %1800 = vst [vmem:[%s2440_s12 + $0x8] sm:$0xf] %v1799_v32  ;;  %v1805_v35 = vld [vmem:[%s2435_s11 + $0x74] sm:$0xf]  ;;  %1802 = vst [vmem:[%s2440_s12 + $0x14] sm:$0xf] %v1801_v33 }
  0x2c   : > { %1804 = vst [vmem:[%s2440_s12 + $0x20] sm:$0xf] %v1803_v34  ;;  %1806 = vst [vmem:[%s2440_s12 + $0x2c] sm:$0xf] %v1805_v35  ;;  %v1807_v36 = vld [vmem:[%s2435_s11 + $0x98] sm:$0xf] }
  0x2d   : > { %v1809_v37 = vld [vmem:[%s2435_s11 + $0xbc] sm:$0xf]  ;;  %v1811_v38 = vld [vmem:[%s2435_s11 + $0xe0] sm:$0xf]  ;;  %1808 = vst [vmem:[%s2440_s12 + $0x38] sm:$0xf] %v1807_v36 }
  0x2e   : > { %1810 = vst [vmem:[%s2440_s12 + $0x44] sm:$0xf] %v1809_v37  ;;  %1812 = vst [vmem:[%s2440_s12 + $0x50] sm:$0xf] %v1811_v38  ;;  %v1813_v39 = vld [vmem:[%s2435_s11 + $0x104] sm:$0xf] }
  0x2f   : > { %v1815_v40 = vld [vmem:[%s2435_s11 + $0x128] sm:$0xf]  ;;  %v1817_v41 = vld [vmem:[%s2435_s11 + $0x14c] sm:$0xf]  ;;  %1814 = vst [vmem:[%s2440_s12 + $0x5c] sm:$0xf] %v1813_v39 }
  0x30   : > { %1816 = vst [vmem:[%s2440_s12 + $0x68] sm:$0xf] %v1815_v40  ;;  %1818 = vst [vmem:[%s2440_s12 + $0x74] sm:$0xf] %v1817_v41  ;;  %v1819_v42 = vld [vmem:[%s2435_s11 + $0x170] sm:$0xf] }
  0x31   : > { %v1821_v43 = vld [vmem:[%s2435_s11 + $0x194] sm:$0xf]  ;;  %v1823_v44 = vld [vmem:[%s2435_s11 + $0x1b8] sm:$0xf]  ;;  %1820 = vst [vmem:[%s2440_s12 + $0x80] sm:$0xf] %v1819_v42 }
  0x32   : > { %1822 = vst [vmem:[%s2440_s12 + $0x8c] sm:$0xf] %v1821_v43  ;;  %1824 = vst [vmem:[%s2440_s12 + $0x98] sm:$0xf] %v1823_v44  ;;  %v1825_v45 = vld [vmem:[%s2435_s11 + $0x1dc] sm:$0xf] }
  0x33   : > { %v1827_v46 = vld [vmem:[%s2435_s11 + $0x200] sm:$0xf]  ;;  %v1829_v47 = vld [vmem:[%s2435_s11 + $0x224] sm:$0xf]  ;;  %1826 = vst [vmem:[%s2440_s12 + $0xa4] sm:$0xf] %v1825_v45 }
  0x34   : > { %1828 = vst [vmem:[%s2440_s12 + $0xb0] sm:$0xf] %v1827_v46  ;;  %1830 = vst [vmem:[%s2440_s12 + $0xbc] sm:$0xf] %v1829_v47  ;;  %v1831_v48 = vld [vmem:[%s2435_s11 + $0x248] sm:$0xf] }
  0x35   : > { %v1833_v49 = vld [vmem:[%s2435_s11 + $0x26c] sm:$0xf]  ;;  %v1835_v50 = vld [vmem:[%s2435_s11 + $0x290] sm:$0xf]  ;;  %1832 = vst [vmem:[%s2440_s12 + $0xc8] sm:$0xf] %v1831_v48 }
  0x36   : > { %1834 = vst [vmem:[%s2440_s12 + $0xd4] sm:$0xf] %v1833_v49  ;;  %1836 = vst [vmem:[%s2440_s12 + $0xe0] sm:$0xf] %v1835_v50  ;;  %v1837_v51 = vld [vmem:[%s2435_s11 + $0x2b4] sm:$0xf] }
  0x37   : > { %v1839_v52 = vld [vmem:[%s2435_s11 + $0x2d8] sm:$0xf]  ;;  %v1841_v53 = vld [vmem:[%s2435_s11 + $0x2fc] sm:$0xf]  ;;  %1838 = vst [vmem:[%s2440_s12 + $0xec] sm:$0xf] %v1837_v51 }
  0x38   : > { %1840 = vst [vmem:[%s2440_s12 + $0xf8] sm:$0xf] %v1839_v52  ;;  %1842 = vst [vmem:[%s2440_s12 + $0x104] sm:$0xf] %v1841_v53  ;;  %v1843_v54 = vld [vmem:[%s2435_s11 + $0x320] sm:$0xf] }
  0x39   : > { %v1845_v55 = vld [vmem:[%s2435_s11 + $0x344] sm:$0xf]  ;;  %v1847_v56 = vld [vmem:[%s2435_s11 + $0x368] sm:$0xf]  ;;  %1844 = vst [vmem:[%s2440_s12 + $0x110] sm:$0xf] %v1843_v54 }
  0x3a   : > { %1846 = vst [vmem:[%s2440_s12 + $0x11c] sm:$0xf] %v1845_v55  ;;  %1848 = vst [vmem:[%s2440_s12 + $0x128] sm:$0xf] %v1847_v56  ;;  %v1849_v57 = vld [vmem:[%s2435_s11 + $0x38c] sm:$0xf] }
  0x3b   : > { %v1851_v58 = vld [vmem:[%s2435_s11 + $0x3b0] sm:$0xf]  ;;  %v1853_v59 = vld [vmem:[%s2435_s11 + $0x3d4] sm:$0xf]  ;;  %1850 = vst [vmem:[%s2440_s12 + $0x134] sm:$0xf] %v1849_v57 }
  0x3c   : > { %1852 = vst [vmem:[%s2440_s12 + $0x140] sm:$0xf] %v1851_v58  ;;  %1854 = vst [vmem:[%s2440_s12 + $0x14c] sm:$0xf] %v1853_v59  ;;  %v1855_v60 = vld [vmem:[%s2435_s11 + $0x3f8] sm:$0xf] }
  0x3d   : > { %v1857_v61 = vld [vmem:[%s2435_s11 + $0x41c] sm:$0xf]  ;;  %v1859_v62 = vld [vmem:[%s2435_s11 + $0x440] sm:$0xf]  ;;  %1856 = vst [vmem:[%s2440_s12 + $0x158] sm:$0xf] %v1855_v60 }
  0x3e   : > { %1858 = vst [vmem:[%s2440_s12 + $0x164] sm:$0xf] %v1857_v61  ;;  %1860 = vst [vmem:[%s2440_s12 + $0x170] sm:$0xf] %v1859_v62  ;;  %v1861_v63 = vld [vmem:[%s2435_s11 + $0x464] sm:$0xf] }
  0x3f   : > { %1862 = vst [vmem:[%s2440_s12 + $0x17c] sm:$0xf] %v1861_v63 }
  0x40 PF: > { %p1863_p7 = scmp.ge.s32.totalorder %s2347_s21, 1  ;;  %p367_p8 = scmp.lt.s32.totalorder %s2347_s21, 7 }
  0x42   : > { %p368_p9 = pnand %p1863_p7, %p367_p8 }
  0x43   : > { %s374_s13 = sand.u32 (!%p368_p9), 1, %s2323_s15   ;;  %s426_s14 = smul.u32 (!%p368_p9), 48, %s2331_s17 }
  0x44   : > { %371 = sbr.rel (%p368_p9) target bundleno = 508 (0x1fc), region = 50  ;;  %s1865_s25 = sshll.u32 (!%p368_p9), %s2335_s18, 5 }
  0x45   : > { %s2147_s24 = smul.u32 (!%p368_p9), 384, %s374_s13  ;;  %p427_p10 = scmp.lt.s32.totalorder (!%p368_p9), %s426_s14, 143 }
  0x46   : > { %p436_p11 = scmp.lt.s32.totalorder (!%p368_p9), %s1865_s25, 63  ;;  %p444_p12 = scmp.lt.s32.totalorder (!%p368_p9), %s2335_s18, 1 }
  0x47   : > { %p1869_p13 = scmp.ne.s32.totalorder (!%p368_p9), %s2331_s17, 0 }
  0x4b   : > { %s2929_s14 = smov (!%p427_p10, %s426_s14), 143  ;;  %s2931_s25 = smov (!%p436_p11, %s1865_s25), 63 }
  0x4c   : > { %s1864_s26 = sshll.u32 %s2929_s14, 2  ;;  %s1866_s5 = sshll.u32 %s2931_s25, 3  ;;  %v2349_v0 = vmov (!%p1869_p13), 0.0  }
  0x4d   : > { %s2576_s30 = scalar_lea.vmem %s2912_s1, %s1864_s26  ;;  %s2581_s8 = scalar_lea.vmem %s2913_s2, %s1866_s5  ;;  %463 = vst [vmem:[#allocation2] sm:$0xff] (!%p1869_p13), %v2349_v0  ;;  %464 = vst [vmem:[#allocation2 + $0x8] sm:$0xff] (!%p1869_p13), %v2349_v0 }
  0x4e   : > { %s2933_s18 = smov (!%p444_p12, %s2335_s18), 1  ;;  %s2594_s26 = scalar_lea.vmem [#allocation3], %s2147_s24  ;;  %465 = vst [vmem:[#allocation2 + $0x10] sm:$0xff] (!%p1869_p13), %v2349_v0  ;;  %466 = vst [vmem:[#allocation2 + $0x18] sm:$0xff] (!%p1869_p13), %v2349_v0 }
  0x4f   : > { %s1867_s15 = sshll.u32 %s2933_s18, 3  ;;  %462 = sbr.rel (%p1869_p13) target bundleno = 93 (0x5d), region = 58  ;;  %467 = vst [vmem:[#allocation2 + $0x20] sm:$0xff] (!%p1869_p13), %v2349_v0  ;;  %468 = vst [vmem:[#allocation2 + $0x28] sm:$0xff] (!%p1869_p13), %v2349_v0 }
  0x50   : > { %s2587_s11 = scalar_lea.vmem %s2914_s3, %s1867_s15  ;;  %s2592_s14 = scalar_lea.vmem %s2915_s4, %s1867_s15  ;;  %469 = vst [vmem:[#allocation2 + $0x30] sm:$0xff] (!%p1869_p13), %v2349_v0  ;;  %470 = vst [vmem:[#allocation2 + $0x38] sm:$0xff] (!%p1869_p13), %v2349_v0 }
  0x51   : > { %471 = vst [vmem:[#allocation2 + $0x40] sm:$0xff] (!%p1869_p13), %v2349_v0  ;;  %472 = vst [vmem:[#allocation2 + $0x48] sm:$0xff] (!%p1869_p13), %v2349_v0 }
  0x52   : > { %473 = vst [vmem:[#allocation2 + $0x50] sm:$0xff] (!%p1869_p13), %v2349_v0  ;;  %474 = vst [vmem:[#allocation2 + $0x58] sm:$0xff] (!%p1869_p13), %v2349_v0 }
  0x53   : > { %475 = vst [vmem:[#allocation2 + $0x60] sm:$0xff] (!%p1869_p13), %v2349_v0  ;;  %476 = vst [vmem:[#allocation2 + $0x68] sm:$0xff] (!%p1869_p13), %v2349_v0 }
  0x54   : > { %477 = vst [vmem:[#allocation2 + $0x70] sm:$0xff] (!%p1869_p13), %v2349_v0  ;;  %478 = vst [vmem:[#allocation2 + $0x78] sm:$0xff] (!%p1869_p13), %v2349_v0 }
  0x55   : > { %479 = vst [vmem:[#allocation2 + $0x80] sm:$0xff] (!%p1869_p13), %v2349_v0  ;;  %480 = vst [vmem:[#allocation2 + $0x88] sm:$0xff] (!%p1869_p13), %v2349_v0 }
  0x56   : > { %481 = vst [vmem:[#allocation2 + $0x90] sm:$0xff] %v2349_v0  ;;  %482 = vst [vmem:[#allocation2 + $0x98] sm:$0xff] %v2349_v0 }
  0x57   : > { %483 = vst [vmem:[#allocation2 + $0xa0] sm:$0xff] %v2349_v0  ;;  %484 = vst [vmem:[#allocation2 + $0xa8] sm:$0xff] %v2349_v0 }
  0x58   : > { %485 = vst [vmem:[#allocation2 + $0xb0] sm:$0xff] %v2349_v0  ;;  %486 = vst [vmem:[#allocation2 + $0xb8] sm:$0xff] %v2349_v0 }
  0x59   : > { %487 = vst [vmem:[#allocation2 + $0xc0] sm:$0xff] %v2349_v0  ;;  %488 = vst [vmem:[#allocation2 + $0xc8] sm:$0xff] %v2349_v0 }
  0x5a   : > { %489 = vst [vmem:[#allocation2 + $0xd0] sm:$0xff] %v2349_v0  ;;  %490 = vst [vmem:[#allocation2 + $0xd8] sm:$0xff] %v2349_v0 }
  0x5b   : > { %491 = vst [vmem:[#allocation2 + $0xe0] sm:$0xff] %v2349_v0  ;;  %492 = vst [vmem:[#allocation2 + $0xe8] sm:$0xff] %v2349_v0 }
  0x5c   : > { %493 = vst [vmem:[#allocation2 + $0xf0] sm:$0xff] %v2349_v0  ;;  %494 = vst [vmem:[#allocation2 + $0xf8] sm:$0xff] %v2349_v0 }
  0x5d PF: > { %v2205_v1 = vld [vmem:[%s2576_s30 + $0x40] sm:$0xff]   ;;  %v2207_v3 = vld [vmem:[%s2576_s30 + $0x48] sm:$0xff]   ;;  %v2209_v5 = vld [vmem:[%s2576_s30 + $0x50] sm:$0xff]   ;;  %p1942_p0 = scmp.ne.s32.totalorder %s2331_s17, 2 }
  0x5e   : > { %v2206_v2 = vld [vmem:[%s2576_s30] sm:$0xff]   ;;  %1945 = vmatprep.subr.bf16.mxu0 %v2205_v1  ;;  %2129 = vmatprep.subr.bf16.mxu1 %v2205_v1  ;;  %v2208_v4 = vld [vmem:[%s2576_s30 + $0x8] sm:$0xff]   ;;  %v2210_v6 = vld [vmem:[%s2576_s30 + $0x10] sm:$0xff]  }
  0x5f   : > { %1946 = vmatpush3.bf16.msra.mxu0 %v2206_v2  ;;  %2137 = vmatpush3.bf16.msra.mxu1 %v2206_v2  ;;  %v2211_v7 = vld [vmem:[%s2576_s30 + $0x58] sm:$0xff]   ;;  %v2213_v9 = vld [vmem:[%s2576_s30 + $0x60] sm:$0xff]   ;;  %v2215_v11 = vld [vmem:[%s2576_s30 + $0x68] sm:$0xff]  }
  0x60   : > { %1947 = vmatprep.subr.bf16.mxu0 %v2207_v3  ;;  %2130 = vmatprep.subr.bf16.mxu1 %v2207_v3  ;;  %v2212_v8 = vld [vmem:[%s2576_s30 + $0x18] sm:$0xff]   ;;  %v2214_v10 = vld [vmem:[%s2576_s30 + $0x20] sm:$0xff]   ;;  %v2216_v14 = vld [vmem:[%s2576_s30 + $0x28] sm:$0xff]  }
  0x61   : > { %v2223_v12 = vld [vmem:[%s2594_s26 + $0x4] ss:$12 sps:$4 sm:$0xff]   ;;  %v2219_v17 = vld [vmem:[%s2576_s30 + $0x78] sm:$0xff]   ;;  %v2221_v20 = vld [vmem:[%s2594_s26] ss:$12 sps:$4 sm:$0xff]  }
  0x62   : > { %v2226_v13 = vld [vmem:[%s2594_s26 + $0x124] ss:$12 sps:$4 sm:$0xff]   ;;  %1071 = vmatprep.mubr.bf16.mxu0 %v2223_v12  ;;  %v2220_v18 = vld [vmem:[%s2576_s30 + $0x38] sm:$0xff]   ;;  %v2224_v21 = vld [vmem:[%s2594_s26 + $0x120] ss:$12 sps:$4 sm:$0xff]  }
  0x63   : > { %1948 = vmatpush3.bf16.msra.mxu0 %v2208_v4  ;;  %2138 = vmatpush3.bf16.msra.mxu1 %v2208_v4  ;;  %v2217_v15 = vld [vmem:[%s2576_s30 + $0x70] sm:$0xff]   ;;  %v2227_v19 = vld [vmem:[%s2576_s30 + $0x80] sm:$0xff]   ;;  %v2229_v22 = vld [vmem:[%s2594_s26 + $0x1c] ss:$12 sps:$4 sm:$0xff]  }
  0x64   : > { %1949 = vmatprep.subr.bf16.mxu0 %v2209_v5  ;;  %2131 = vmatprep.subr.bf16.mxu1 %v2209_v5  ;;  %v2218_v16 = vld [vmem:[%s2576_s30 + $0x30] sm:$0xff]   ;;  %v2228_v23 = vld [vmem:[%s2576_s30 + $0x88] sm:$0xff]   ;;  %v2233_v25 = vld [vmem:[%s2594_s26 + $0x18] ss:$12 sps:$4 sm:$0xff]  }
  0x65   : > { %1167 = vmatprep.mubr.bf16.mxu1 %v2226_v13  ;;  %v2231_v24 = vld [vmem:[%s2594_s26 + $0x13c] ss:$12 sps:$4 sm:$0xff]   ;;  %v2235_v26 = vld [vmem:[%s2576_s30 + $0x90] sm:$0xff]   ;;  %v2234_v27 = vld [vmem:[%s2594_s26 + $0x138] ss:$12 sps:$4 sm:$0xff]  }
  0x66   : > { %v2236_v28 = vld [vmem:[%s2576_s30 + $0x98] sm:$0xff]   ;;  %v2237_v29 = vld [vmem:[%s2594_s26 + $0x34] ss:$12 sps:$4 sm:$0xff]   ;;  %v2244_v34 = vld [vmem:[%s2576_s30 + $0xa8] sm:$0xff]  }
  0x67   : > { %1950 = vmatpush3.bf16.msra.mxu0 %v2210_v6  ;;  %2139 = vmatpush3.bf16.msra.mxu1 %v2210_v6  ;;  %v2239_v30 = vld [vmem:[%s2594_s26 + $0x154] ss:$12 sps:$4 sm:$0xff]   ;;  %v2241_v32 = vld [vmem:[%s2594_s26 + $0x30] ss:$12 sps:$4 sm:$0xff]   ;;  %v2245_v35 = vld [vmem:[%s2594_s26 + $0x4c] ss:$12 sps:$4 sm:$0xff]  }
  0x68   : > { %1951 = vmatprep.subr.bf16.mxu0 %v2211_v7  ;;  %2132 = vmatprep.subr.bf16.mxu1 %v2211_v7  ;;  %v2243_v31 = vld [vmem:[%s2576_s30 + $0xa0] sm:$0xff]   ;;  %v2242_v33 = vld [vmem:[%s2594_s26 + $0x150] ss:$12 sps:$4 sm:$0xff]   ;;  %v2247_v36 = vld [vmem:[%s2594_s26 + $0x16c] ss:$12 sps:$4 sm:$0xff]  }
  0x69   : > { %v2251_v37 = vld [vmem:[%s2576_s30 + $0xb0] sm:$0xff]   ;;  %v2252_v41 = vld [vmem:[%s2576_s30 + $0xb8] sm:$0xff]   ;;  %v2256_v43 = vld [vmem:[%s2594_s26 + $0x60] ss:$12 sps:$4 sm:$0xff]  }
  0x6a   : > { %v2249_v38 = vld [vmem:[%s2594_s26 + $0x48] ss:$12 sps:$4 sm:$0xff]   ;;  %v2253_v40 = vld [vmem:[%s2594_s26 + $0x64] ss:$12 sps:$4 sm:$0xff]   ;;  %v2257_v44 = vld [vmem:[%s2594_s26 + $0x20] ss:$12 sps:$4 sm:$0xff]  }
  0x6b   : > { %1952 = vmatpush3.bf16.msra.mxu0 %v2212_v8  ;;  %2140 = vmatpush3.bf16.msra.mxu1 %v2212_v8  ;;  %v2250_v39 = vld [vmem:[%s2594_s26 + $0x168] ss:$12 sps:$4 sm:$0xff]   ;;  %v2260_v46 = vld [vmem:[%s2594_s26 + $0x38] ss:$12 sps:$4 sm:$0xff]   ;;  %v2262_v48 = vld [vmem:[%s2594_s26 + $0x50] ss:$12 sps:$4 sm:$0xff]  }
  0x6c   : > { %1953 = vmatprep.subr.bf16.mxu0 %v2213_v9  ;;  %2133 = vmatprep.subr.bf16.mxu1 %v2213_v9  ;;  %v2255_v42 = vld [vmem:[%s2594_s26 + $0x8] ss:$12 sps:$4 sm:$0xff]   ;;  %v2261_v47 = vld [vmem:[%s2594_s26 + $0x78] ss:$12 sps:$4 sm:$0xff]   ;;  %v2266_v51 = vld [vmem:[%s2594_s26 + $0x90] ss:$12 sps:$4 sm:$0xff]  }
  0x6d   : > { %v2258_v45 = vld [vmem:[%s2594_s26 + $0x7c] ss:$12 sps:$4 sm:$0xff]   ;;  %v2263_v49 = vld [vmem:[%s2594_s26 + $0x94] ss:$12 sps:$4 sm:$0xff]   ;;  %v2268_v53 = vld [vmem:[%s2594_s26 + $0xac] ss:$12 sps:$4 sm:$0xff]  }
  0x6e   : > { %v2265_v50 = vld [vmem:[%s2594_s26 + $0x68] ss:$12 sps:$4 sm:$0xff]   ;;  %v2267_v52 = vld [vmem:[%s2594_s26 + $0x80] ss:$12 sps:$4 sm:$0xff]   ;;  %v2270_v54 = vld [vmem:[%s2594_s26 + $0x98] ss:$12 sps:$4 sm:$0xff]  }
  0x6f   : > { %1954 = vmatpush3.bf16.msra.mxu0 %v2214_v10  ;;  %2141 = vmatpush3.bf16.msra.mxu1 %v2214_v10  ;;  %v2271_v55 = vld [vmem:[%s2594_s26 + $0xa8] ss:$12 sps:$4 sm:$0xff]   ;;  %v2272_v56 = vld [vmem:[%s2594_s26 + $0xb0] ss:$12 sps:$4 sm:$0xff]   ;;  %v2276_v59 = vld [vmem:[%s2594_s26 + $0xc0] ss:$12 sps:$4 sm:$0xff]  }
  0x70   : > { %1955 = vmatprep.subr.bf16.mxu0 %v2215_v11  ;;  %2134 = vmatprep.subr.bf16.mxu1 %v2215_v11  ;;  %v2273_v57 = vld [vmem:[%s2594_s26 + $0xc4] ss:$12 sps:$4 sm:$0xff]   ;;  %v2275_v58 = vld [vmem:[%s2594_s26 + $0xc8] ss:$12 sps:$4 sm:$0xff]   ;;  %v2277_v60 = vld [vmem:[%s2594_s26 + $0xe0] ss:$12 sps:$4 sm:$0xff]  }
  0x71   : > { %v2278_v61 = vld [vmem:[%s2594_s26 + $0xdc] ss:$12 sps:$4 sm:$0xff]   ;;  %v2280_v62 = vld [vmem:[%s2594_s26 + $0xf8] ss:$12 sps:$4 sm:$0xff]   ;;  %v2283_v1 = vld [vmem:[%s2594_s26 + $0xf4] ss:$12 sps:$4 sm:$0xff]  }
  0x72   : > { %v2281_v63 = vld [vmem:[%s2594_s26 + $0xd8] ss:$12 sps:$4 sm:$0xff]   ;;  %v2282_v0 = vld [vmem:[%s2594_s26 + $0x110] ss:$12 sps:$4 sm:$0xff]   ;;  %v2285_v2 = vld [vmem:[%s2594_s26 + $0x128] ss:$12 sps:$4 sm:$0xff]  }
  0x73   : > { %1956 = vmatpush3.bf16.msra.mxu0 %v2216_v14  ;;  %2142 = vmatpush3.bf16.msra.mxu1 %v2216_v14  ;;  %v2286_v3 = vld [vmem:[%s2594_s26 + $0xf0] ss:$12 sps:$4 sm:$0xff]   ;;  %v2287_v4 = vld [vmem:[%s2594_s26 + $0x140] ss:$12 sps:$4 sm:$0xff]   ;;  %v2290_v6 = vld [vmem:[%s2594_s26 + $0x158] ss:$12 sps:$4 sm:$0xff]  }
  0x74   : > { %1957 = vmatprep.subr.bf16.mxu0 %v2217_v15  ;;  %2135 = vmatprep.subr.bf16.mxu1 %v2217_v15  ;;  %v2288_v5 = vld [vmem:[%s2594_s26 + $0x10c] ss:$12 sps:$4 sm:$0xff]   ;;  %v2291_v7 = vld [vmem:[%s2594_s26 + $0x108] ss:$12 sps:$4 sm:$0xff]   ;;  %v2292_v8 = vld [vmem:[%s2594_s26 + $0x170] ss:$12 sps:$4 sm:$0xff]  }
  0x77   : > { %1958 = vmatpush3.bf16.msra.mxu0 %v2218_v16  ;;  %2143 = vmatpush3.bf16.msra.mxu1 %v2218_v16 }
  0x78   : > { %1959 = vmatprep.subr.bf16.mxu0 %v2219_v17  ;;  %2136 = vmatprep.subr.bf16.mxu1 %v2219_v17 }
  0x7b   : > { %1960 = vmatpush3.bf16.msra.mxu0 %v2220_v18  ;;  %2144 = vmatpush3.bf16.msra.mxu1 %v2220_v18 }
  0x7c   : > { %2081 = vmatprep.subr.bf16.mxu1 %v2227_v19 }
  0x7e   : > { %1072 = vmatmul.mubr.bf16.vlgmr.msra.gmra.mrb[0].mxu0 %v2221_v20  ;;  %1168 = vmatmul.mubr.bf16.vlgmr.msra.gmra.mrb[0].mxu1 %v2224_v21 }
  0x7f   : > { %2082 = vmatpush3.bf16.msra.mxu1 %v2227_v19  ;;  %1079 = vmatprep.mubr.bf16.mxu0 %v2229_v22 }
  0x80   : > { %2083 = vmatprep.subr.bf16.mxu1 %v2228_v23  ;;  %1175 = vmatprep.mubr.bf16.mxu1 %v2231_v24 }
  0x83   : > { %2084 = vmatpush3.bf16.msra.mxu1 %v2228_v23 }
  0x84   : > { %2085 = vmatprep.subr.bf16.mxu1 %v2235_v26 }
  0x86   : > { %1080 = vmatmul.mubr.bf16.gmra.mrb[4].mxu0 %v2233_v25  ;;  %1176 = vmatmul.mubr.bf16.gmra.mrb[4].mxu1 %v2234_v27 }
  0x87   : > { %2086 = vmatpush3.bf16.msra.mxu1 %v2235_v26  ;;  %1087 = vmatprep.mubr.bf16.mxu0 %v2237_v29 }
  0x88   : > { %2087 = vmatprep.subr.bf16.mxu1 %v2236_v28  ;;  %1183 = vmatprep.mubr.bf16.mxu1 %v2239_v30 }
  0x8b   : > { %2088 = vmatpush3.bf16.msra.mxu1 %v2236_v28 }
  0x8c   : > { %2089 = vmatprep.subr.bf16.mxu1 %v2243_v31 }
  0x8e   : > { %1088 = vmatmul.mubr.bf16.gmra.mrb[8].mxu0 %v2241_v32  ;;  %1184 = vmatmul.mubr.bf16.gmra.mrb[8].mxu1 %v2242_v33 }
  0x8f   : > { %2090 = vmatpush3.bf16.msra.mxu1 %v2243_v31  ;;  %1095 = vmatprep.mubr.bf16.mxu0 %v2245_v35 }
  0x90   : > { %2091 = vmatprep.subr.bf16.mxu1 %v2244_v34  ;;  %1191 = vmatprep.mubr.bf16.mxu1 %v2247_v36 }
  0x93   : > { %2092 = vmatpush3.bf16.msra.mxu1 %v2244_v34 }
  0x94   : > { %2093 = vmatprep.subr.bf16.mxu1 %v2251_v37 }
  0x96   : > { %1096 = vmatmul.mubr.bf16.gmra.mrb[12].mxu0 %v2249_v38  ;;  %1192 = vmatmul.mubr.bf16.gmra.mrb[12].mxu1 %v2250_v39 }
  0x97   : > { %2094 = vmatpush3.bf16.msra.mxu1 %v2251_v37  ;;  %1103 = vmatprep.mubr.bf16.mxu0 %v2253_v40 }
  0x98   : > { %2095 = vmatprep.subr.bf16.mxu1 %v2252_v41  ;;  %2097 = vmatprep.mubr.bf16.mxu1 %v2255_v42 }
  0x9b   : > { %2096 = vmatpush3.bf16.msra.mxu1 %v2252_v41 }
  0x9e   : > { %1104 = vmatmul.mubr.bf16.gmra.mrb[16].mxu0 %v2256_v43  ;;  %2098 = vmatmul.mubr.bf16.vlgmr.msra.gmra.mrb[16].mxu1 %v2257_v44 }
  0x9f   : > { %1111 = vmatprep.mubr.bf16.mxu0 %v2258_v45  ;;  %2101 = vmatprep.mubr.bf16.mxu1 %v2260_v46 }
  0xa6   : > { %1112 = vmatmul.mubr.bf16.gmra.mrb[20].mxu0 %v2261_v47  ;;  %2102 = vmatmul.mubr.bf16.gmra.mrb[20].mxu1 %v2262_v48 }
  0xa7   : > { %1119 = vmatprep.mubr.bf16.mxu0 %v2263_v49  ;;  %2105 = vmatprep.mubr.bf16.mxu1 %v2265_v50 }
  0xae   : > { %1120 = vmatmul.mubr.bf16.gmra.mrb[24].mxu0 %v2266_v51  ;;  %2106 = vmatmul.mubr.bf16.gmra.mrb[24].mxu1 %v2267_v52 }
  0xaf   : > { %1127 = vmatprep.mubr.bf16.mxu0 %v2268_v53  ;;  %2109 = vmatprep.mubr.bf16.mxu1 %v2270_v54 }
  0xb6   : > { %1128 = vmatmul.mubr.bf16.gmra.mrb[28].mxu0 %v2271_v55  ;;  %2110 = vmatmul.mubr.bf16.gmra.mrb[28].mxu1 %v2272_v56 }
  0xb7   : > { %1135 = vmatprep.mubr.bf16.mxu0 %v2273_v57  ;;  %2113 = vmatprep.mubr.bf16.mxu1 %v2275_v58  ;;  %v497_v58 = vld [vmem:[#allocation2 + $0x10] sm:$0xff] }
  0xbe   : > { %1136 = vmatmul.mubr.bf16.gmra.mrb[32].mxu0 %v2276_v59  ;;  %2114 = vmatmul.mubr.bf16.gmra.mrb[32].mxu1 %v2277_v60 }
  0xbf   : > { %1143 = vmatprep.mubr.bf16.mxu0 %v2278_v61  ;;  %2117 = vmatprep.mubr.bf16.mxu1 %v2280_v62  ;;  %v495_v62 = vld [vmem:[#allocation2] sm:$0xff] }
  0xc6   : > { %1144 = vmatmul.mubr.bf16.gmra.mrb[36].mxu0 %v2281_v63  ;;  %2118 = vmatmul.mubr.bf16.gmra.mrb[36].mxu1 %v2282_v0 }
  0xc7   : > { %1151 = vmatprep.mubr.bf16.mxu0 %v2283_v1  ;;  %2121 = vmatprep.mubr.bf16.mxu1 %v2285_v2 }
  0xce   : > { %1152 = vmatmul.mubr.bf16.gmra.mrb[40].mxu0 %v2286_v3  ;;  %2122 = vmatmul.mubr.bf16.gmra.mrb[40].mxu1 %v2287_v4  ;;  %v498_v3 = vld [vmem:[#allocation2 + $0x18] sm:$0xff] }
  0xcf   : > { %1159 = vmatprep.mubr.bf16.mxu0 %v2288_v5  ;;  %2125 = vmatprep.mubr.bf16.mxu1 %v2290_v6 }
  0xd6   : > { %1160 = vmatmul.mubr.bf16.gmra.mrb[44].mxu0 %v2291_v7  ;;  %2126 = vmatmul.mubr.bf16.gmra.mrb[44].mxu1 %v2292_v8  ;;  %v496_v8 = vld [vmem:[#allocation2 + $0x8] sm:$0xff] }
 0x151   : > { %v1961_v9 = vpop.f32.mrb[0].mxu0  ;;  %v2033_v10 = vpop.f32.mrb[0].mxu1 }
 0x152   : > { %v1962_v11 = vpop.f32.mrb[1].mxu0  ;;  %v2034_v12 = vpop.f32.mrb[1].mxu1 }
 0x153   : > { %v1963_v13 = vadd.f32 %v1962_v11, %v1961_v9  ;;  %v2669_v14 = vadd.f32 %v2034_v12, %v2033_v10  ;;  %v1964_v15 = vpop.f32.mrb[2].mxu0  ;;  %v2036_v16 = vpop.f32.mrb[2].mxu1 }
 0x154   : > { %v1965_v17 = vpop.f32.mrb[3].mxu0  ;;  %v2037_v18 = vpop.f32.mrb[3].mxu1 }
 0x155   : > { %v1966_v19 = vadd.f32 %v1965_v17, %v1964_v15  ;;  %v2671_v20 = vadd.f32 %v2037_v18, %v2036_v16  ;;  %v501_v18 = vld [vmem:[#allocation2 + $0x30] sm:$0xff] }
 0x159   : > { %v1967_v21 = vpop.f32.mrb[4].mxu0  ;;  %v2039_v22 = vpop.f32.mrb[4].mxu1 }
 0x15a   : > { %v1968_v23 = vpop.f32.mrb[5].mxu0  ;;  %v2040_v24 = vpop.f32.mrb[5].mxu1 }
 0x15b   : > { %v1969_v25 = vadd.f32 %v1968_v23, %v1967_v21  ;;  %v2673_v26 = vadd.f32 %v2040_v24, %v2039_v22  ;;  %v1970_v27 = vpop.f32.mrb[6].mxu0  ;;  %v2042_v28 = vpop.f32.mrb[6].mxu1  ;;  %v499_v23 = vld [vmem:[#allocation2 + $0x20] sm:$0xff] }
 0x15c   : > { %v1971_v29 = vpop.f32.mrb[7].mxu0  ;;  %v2043_v30 = vpop.f32.mrb[7].mxu1 }
 0x15d   : > { %v1972_v31 = vadd.f32 %v1971_v29, %v1970_v27  ;;  %v2675_v32 = vadd.f32 %v2043_v30, %v2042_v28  ;;  %v502_v29 = vld [vmem:[#allocation2 + $0x38] sm:$0xff] }
 0x161   : > { %v1973_v33 = vpop.f32.mrb[8].mxu0  ;;  %v2045_v34 = vpop.f32.mrb[8].mxu1 }
 0x162   : > { %v1974_v35 = vpop.f32.mrb[9].mxu0  ;;  %v2046_v36 = vpop.f32.mrb[9].mxu1 }
 0x163   : > { %v1975_v37 = vadd.f32 %v1974_v35, %v1973_v33  ;;  %v2677_v38 = vadd.f32 %v2046_v36, %v2045_v34  ;;  %v1976_v39 = vpop.f32.mrb[10].mxu0  ;;  %v2048_v40 = vpop.f32.mrb[10].mxu1  ;;  %v500_v34 = vld [vmem:[#allocation2 + $0x28] sm:$0xff] }
 0x164   : > { %v1977_v41 = vpop.f32.mrb[11].mxu0  ;;  %v2049_v42 = vpop.f32.mrb[11].mxu1 }
 0x165   : > { %v1978_v43 = vadd.f32 %v1977_v41, %v1976_v39  ;;  %v2679_v44 = vadd.f32 %v2049_v42, %v2048_v40 }
 0x169   : > { %v1979_v45 = vpop.f32.mrb[12].mxu0  ;;  %v2051_v46 = vpop.f32.mrb[12].mxu1 }
 0x16a   : > { %v1980_v47 = vpop.f32.mrb[13].mxu0  ;;  %v2052_v48 = vpop.f32.mrb[13].mxu1 }
 0x16b   : > { %v1981_v49 = vadd.f32 %v1980_v47, %v1979_v45  ;;  %v2681_v50 = vadd.f32 %v2052_v48, %v2051_v46  ;;  %v1982_v51 = vpop.f32.mrb[14].mxu0  ;;  %v2054_v52 = vpop.f32.mrb[14].mxu1  ;;  %v505_v46 = vld [vmem:[#allocation2 + $0x50] sm:$0xff] }
 0x16c   : > { %v1983_v53 = vpop.f32.mrb[15].mxu0  ;;  %v2055_v54 = vpop.f32.mrb[15].mxu1 }
 0x16d   : > { %v1984_v55 = vadd.f32 %v1983_v53, %v1982_v51  ;;  %v2683_v56 = vadd.f32 %v2055_v54, %v2054_v52 }
 0x171   : > { %v1985_v57 = vpop.f32.mrb[16].mxu0  ;;  %v2099_v59 = vpop.f32.mrb[16].mxu1 }
 0x172   : > { %v1243_v60 = vadd.f32 %v2099_v59, %v1969_v25  ;;  %v1986_v61 = vpop.f32.mrb[17].mxu0  ;;  %v1234_v63 = vpop.f32.mrb[17].mxu1 }
 0x173   : > { %v1987_v0 = vadd.f32 %v1986_v61, %v1985_v57  ;;  %v1235_v1 = vadd.f32 %v1963_v13, %v1234_v63  ;;  %v1988_v2 = vpop.f32.mrb[18].mxu0  ;;  %v2100_v4 = vpop.f32.mrb[18].mxu1 }
 0x174   : > { %v1363_v5 = vadd.f32 %v1243_v60, %v497_v58  ;;  %v1246_v6 = vadd.f32 %v2100_v4, %v1972_v31  ;;  %v1989_v7 = vpop.f32.mrb[19].mxu0  ;;  %v1237_v9 = vpop.f32.mrb[19].mxu1  ;;  %v504_v60 = vld [vmem:[#allocation2 + $0x48] sm:$0xff] }
 0x175   : > { %v1361_v10 = vadd.f32 %v1235_v1, %v495_v62  ;;  %v1990_v11 = vadd.f32 %v1989_v7, %v1988_v2  ;;  %v1238_v12 = vadd.f32 %v1966_v19, %v1237_v9 }
 0x176   : > { %1395 = vst [vmem:[#allocation2 + $0x10] sm:$0xff] %v1363_v5  ;;  %v1364_v15 = vadd.f32 %v1246_v6, %v498_v3  ;;  %v507_v6 = vld [vmem:[#allocation2 + $0x60] sm:$0xff] }
 0x177   : > { %1393 = vst [vmem:[#allocation2] sm:$0xff] %v1361_v10  ;;  %v1362_v16 = vadd.f32 %v1238_v12, %v496_v8 }
 0x178   : > { %1396 = vst [vmem:[#allocation2 + $0x18] sm:$0xff] %v1364_v15  ;;  %v509_v15 = vld [vmem:[#allocation2 + $0x70] sm:$0xff] }
 0x179   : > { %1394 = vst [vmem:[#allocation2 + $0x8] sm:$0xff] %v1362_v16  ;;  %v1991_v17 = vpop.f32.mrb[20].mxu0  ;;  %v2103_v13 = vpop.f32.mrb[20].mxu1 }
 0x17a   : > { %v1259_v21 = vadd.f32 %v2103_v13, %v1981_v49  ;;  %v1992_v22 = vpop.f32.mrb[21].mxu0  ;;  %v1250_v24 = vpop.f32.mrb[21].mxu1  ;;  %v503_v49 = vld [vmem:[#allocation2 + $0x40] sm:$0xff] }
 0x17b   : > { %v1993_v25 = vadd.f32 %v1992_v22, %v1991_v17  ;;  %v1251_v27 = vadd.f32 %v1975_v37, %v1250_v24  ;;  %v1994_v28 = vpop.f32.mrb[22].mxu0  ;;  %v2104_v30 = vpop.f32.mrb[22].mxu1  ;;  %v508_v17 = vld [vmem:[#allocation2 + $0x68] sm:$0xff] }
 0x17c   : > { %v1367_v31 = vadd.f32 %v1259_v21, %v501_v18  ;;  %v1262_v19 = vadd.f32 %v2104_v30, %v1984_v55  ;;  %v1995_v33 = vpop.f32.mrb[23].mxu0  ;;  %v1253_v35 = vpop.f32.mrb[23].mxu1  ;;  %v506_v55 = vld [vmem:[#allocation2 + $0x58] sm:$0xff] }
 0x17d   : > { %v1365_v36 = vadd.f32 %v1251_v27, %v499_v23  ;;  %v1996_v39 = vadd.f32 %v1995_v33, %v1994_v28  ;;  %v1254_v40 = vadd.f32 %v1978_v43, %v1253_v35  ;;  %v510_v23 = vld [vmem:[#allocation2 + $0x78] sm:$0xff] }
 0x17e   : > { %1399 = vst [vmem:[#allocation2 + $0x30] sm:$0xff] %v1367_v31  ;;  %v1368_v41 = vadd.f32 %v1262_v19, %v502_v29 }
 0x17f   : > { %1397 = vst [vmem:[#allocation2 + $0x20] sm:$0xff] %v1365_v36  ;;  %v1366_v42 = vadd.f32 %v1254_v40, %v500_v34  ;;  %v511_v36 = vld [vmem:[#allocation2 + $0x80] sm:$0xff] }
 0x180   : > { %1400 = vst [vmem:[#allocation2 + $0x38] sm:$0xff] %v1368_v41 }
 0x181   : > { %1398 = vst [vmem:[#allocation2 + $0x28] sm:$0xff] %v1366_v42  ;;  %v1997_v45 = vpop.f32.mrb[24].mxu0  ;;  %v2107_v37 = vpop.f32.mrb[24].mxu1 }
 0x182   : > { %v1275_v47 = vadd.f32 %v2107_v37, %v1993_v25  ;;  %v1998_v48 = vpop.f32.mrb[25].mxu0  ;;  %v1266_v51 = vpop.f32.mrb[25].mxu1 }
 0x183   : > { %v1999_v52 = vadd.f32 %v1998_v48, %v1997_v45  ;;  %v1267_v53 = vadd.f32 %v1987_v0, %v1266_v51  ;;  %v2000_v54 = vpop.f32.mrb[26].mxu0  ;;  %v2108_v57 = vpop.f32.mrb[26].mxu1  ;;  %v512_v45 = vld [vmem:[#allocation2 + $0x88] sm:$0xff] }
 0x184   : > { %v1371_v58 = vadd.f32 %v1275_v47, %v505_v46  ;;  %v1278_v43 = vadd.f32 %v2108_v57, %v1996_v39  ;;  %v2001_v59 = vpop.f32.mrb[27].mxu0  ;;  %v1269_v61 = vpop.f32.mrb[27].mxu1  ;;  %v513_v57 = vld [vmem:[#allocation2 + $0x90] sm:$0xff] }
 0x185   : > { %v1369_v62 = vadd.f32 %v1267_v53, %v503_v49  ;;  %v2002_v63 = vadd.f32 %v2001_v59, %v2000_v54  ;;  %v1270_v1 = vadd.f32 %v1990_v11, %v1269_v61  ;;  %v514_v61 = vld [vmem:[#allocation2 + $0x98] sm:$0xff] }
 0x186   : > { %1403 = vst [vmem:[#allocation2 + $0x50] sm:$0xff] %v1371_v58  ;;  %v1372_v2 = vadd.f32 %v1278_v43, %v506_v55 }
 0x187   : > { %1401 = vst [vmem:[#allocation2 + $0x40] sm:$0xff] %v1369_v62  ;;  %v1370_v3 = vadd.f32 %v1270_v1, %v504_v60 }
 0x188   : > { %1404 = vst [vmem:[#allocation2 + $0x58] sm:$0xff] %v1372_v2 }
 0x189   : > { %1402 = vst [vmem:[#allocation2 + $0x48] sm:$0xff] %v1370_v3  ;;  %v2003_v4 = vpop.f32.mrb[28].mxu0  ;;  %v2111_v5 = vpop.f32.mrb[28].mxu1  ;;  %v521_v3 = vld [vmem:[#allocation2 + $0xd0] sm:$0xff] }
 0x18a   : > { %v2004_v0 = vpop.f32.mrb[29].mxu0  ;;  %v1282_v7 = vpop.f32.mrb[29].mxu1 }
 0x18b   : > { %v2005_v8 = vadd.f32 %v2004_v0, %v2003_v4  ;;  %v1283_v9 = vadd.f32 %v1999_v52, %v1282_v7  ;;  %v2006_v10 = vpop.f32.mrb[30].mxu0  ;;  %v2112_v12 = vpop.f32.mrb[30].mxu1 }
 0x18c   : > { %v2007_v16 = vpop.f32.mrb[31].mxu0  ;;  %v1285_v18 = vpop.f32.mrb[31].mxu1 }
 0x18d   : > { %v1291_v11 = vadd.f32 %v2111_v5, %v2005_v8  ;;  %v1373_v13 = vadd.f32 %v1283_v9, %v507_v6  ;;  %v2008_v21 = vadd.f32 %v2007_v16, %v2006_v10  ;;  %v1286_v22 = vadd.f32 %v2002_v63, %v1285_v18  ;;  %v519_v6 = vld [vmem:[#allocation2 + $0xc0] sm:$0xff] }
 0x18f   : > { %v1375_v24 = vadd.f32 %v1291_v11, %v509_v15  ;;  %1405 = vst [vmem:[#allocation2 + $0x60] sm:$0xff] %v1373_v13  ;;  %v1294_v25 = vadd.f32 %v2112_v12, %v2008_v21  ;;  %v1374_v27 = vadd.f32 %v1286_v22, %v508_v17  ;;  %v522_v12 = vld [vmem:[#allocation2 + $0xd8] sm:$0xff]  ;;  %v515_v17 = vld [vmem:[#allocation2 + $0xa0] sm:$0xff]  ;;  %v520_v13 = vld [vmem:[#allocation2 + $0xc8] sm:$0xff] }
 0x191   : > { %1407 = vst [vmem:[#allocation2 + $0x70] sm:$0xff] %v1375_v24  ;;  %v1376_v28 = vadd.f32 %v1294_v25, %v510_v23  ;;  %1406 = vst [vmem:[#allocation2 + $0x68] sm:$0xff] %v1374_v27  ;;  %v2009_v29 = vpop.f32.mrb[32].mxu0  ;;  %v2115_v30 = vpop.f32.mrb[32].mxu1  ;;  %v516_v27 = vld [vmem:[#allocation2 + $0xa8] sm:$0xff] }
 0x192   : > { %v2010_v31 = vpop.f32.mrb[33].mxu0  ;;  %v1298_v19 = vpop.f32.mrb[33].mxu1 }
 0x193   : > { %1408 = vst [vmem:[#allocation2 + $0x78] sm:$0xff] %v1376_v28  ;;  %v2011_v33 = vadd.f32 %v2010_v31, %v2009_v29  ;;  %v2012_v34 = vpop.f32.mrb[34].mxu0  ;;  %v2116_v35 = vpop.f32.mrb[34].mxu1  ;;  %v525_v31 = vld [vmem:[#allocation2 + $0xf0] sm:$0xff] }
 0x194   : > { %v2013_v39 = vpop.f32.mrb[35].mxu0  ;;  %v1301_v40 = vpop.f32.mrb[35].mxu1 }
 0x195   : > { %v1299_v41 = vadd.f32 %v2011_v33, %v1298_v19  ;;  %v2014_v42 = vadd.f32 %v2013_v39, %v2012_v34 }
 0x197   : > { %v1377_v46 = vadd.f32 %v1299_v41, %v511_v36  ;;  %v1302_v37 = vadd.f32 %v2014_v42, %v1301_v40  ;;  %v526_v41 = vld [vmem:[#allocation2 + $0xf8] sm:$0xff] }
 0x199   : > { %1409 = vst [vmem:[#allocation2 + $0x80] sm:$0xff] %v1377_v46  ;;  %v1378_v47 = vadd.f32 %v1302_v37, %v512_v45  ;;  %v2015_v48 = vpop.f32.mrb[36].mxu0  ;;  %v2685_v49 = vpop.f32.mrb[36].mxu1  ;;  %v517_v46 = vld [vmem:[#allocation2 + $0xb0] sm:$0xff] }
 0x19a   : > { %v2016_v51 = vpop.f32.mrb[37].mxu0  ;;  %v1314_v52 = vpop.f32.mrb[37].mxu1 }
 0x19b   : > { %1410 = vst [vmem:[#allocation2 + $0x88] sm:$0xff] %v1378_v47  ;;  %v2017_v53 = vadd.f32 %v2016_v51, %v2015_v48  ;;  %v2018_v54 = vpop.f32.mrb[38].mxu0  ;;  %v2687_v55 = vpop.f32.mrb[38].mxu1  ;;  %v524_v48 = vld [vmem:[#allocation2 + $0xe8] sm:$0xff] }
 0x19c   : > { %v2019_v58 = vpop.f32.mrb[39].mxu0  ;;  %v1317_v43 = vpop.f32.mrb[39].mxu1 }
 0x19d   : > { %v1307_v59 = vadd.f32 %v2115_v30, %v2017_v53  ;;  %v2020_v60 = vadd.f32 %v2019_v58, %v2018_v54  ;;  %v518_v58 = vld [vmem:[#allocation2 + $0xb8] sm:$0xff] }
 0x19f   : > { %v1379_v62 = vadd.f32 %v1307_v59, %v513_v57  ;;  %v1310_v63 = vadd.f32 %v2116_v35, %v2020_v60  ;;  %v523_v35 = vld [vmem:[#allocation2 + $0xe0] sm:$0xff]  ;;  %v1431_v60 = vld [vmem:[#allocation2 + $0x10] sm:$0xff] (!%p1942_p0) }
 0x1a0   : > { %1463 = vst [vmem:[%s2581_s8 + $0x10] sm:$0xff] (!%p1942_p0), %v1431_v60 }
 0x1a1   : > { %1411 = vst [vmem:[#allocation2 + $0x90] sm:$0xff] %v1379_v62  ;;  %v1380_v1 = vadd.f32 %v1310_v63, %v514_v61  ;;  %v2021_v2 = vpop.f32.mrb[40].mxu0  ;;  %v2123_v4 = vpop.f32.mrb[40].mxu1  ;;  %v1532_v63 = vmul.f32 (!%p1942_p0), %v1431_v60, %v1431_v60 }
 0x1a2   : > { %v1339_v5 = vadd.f32 %v2123_v4, %v2673_v26  ;;  %v2022_v0 = vpop.f32.mrb[41].mxu0  ;;  %v1330_v7 = vpop.f32.mrb[41].mxu1  ;;  %v2706_v4 = vld [vmem:[#allocation2 + $0x30] sm:$0xff] (!%p1942_p0) }
 0x1a3   : > { %1412 = vst [vmem:[#allocation2 + $0x98] sm:$0xff] %v1380_v1  ;;  %v2023_v8 = vadd.f32 %v2022_v0, %v2021_v2  ;;  %v1331_v9 = vadd.f32 %v2669_v14, %v1330_v7  ;;  %v2024_v10 = vpop.f32.mrb[42].mxu0  ;;  %v2124_v15 = vpop.f32.mrb[42].mxu1  ;;  %v1432_v1 = vld [vmem:[#allocation2 + $0x18] sm:$0xff] (!%p1942_p0)  ;;  %v1433_v2 = vld [vmem:[#allocation2 + $0x20] sm:$0xff] (!%p1942_p0)  ;;  %1467 = vst [vmem:[%s2581_s8 + $0x30] sm:$0xff] (!%p1942_p0), %v2706_v4 }
 0x1a4   : > { %v1387_v16 = vadd.f32 %v1339_v5, %v521_v3  ;;  %v1342_v18 = vadd.f32 %v2124_v15, %v2675_v32  ;;  %v2025_v11 = vpop.f32.mrb[43].mxu0  ;;  %v1333_v21 = vpop.f32.mrb[43].mxu1  ;;  %v1434_v3 = vld [vmem:[#allocation2 + $0x28] sm:$0xff] (!%p1942_p0)  ;;  %1464 = vst [vmem:[%s2581_s8 + $0x18] sm:$0xff] (!%p1942_p0), %v1432_v1  ;;  %1465 = vst [vmem:[%s2581_s8 + $0x20] sm:$0xff] (!%p1942_p0), %v1433_v2  ;;  %v2708_v5 = vld [vmem:[#allocation2 + $0x38] sm:$0xff] (!%p1942_p0) }
 0x1a5   : > { %v1315_v22 = vadd.f32 %v2023_v8, %v1314_v52  ;;  %v1385_v23 = vadd.f32 %v1331_v9, %v519_v6  ;;  %v2026_v26 = vadd.f32 %v2025_v11, %v2024_v10  ;;  %v1334_v24 = vadd.f32 %v2671_v20, %v1333_v21  ;;  %1466 = vst [vmem:[%s2581_s8 + $0x28] sm:$0xff] (!%p1942_p0), %v1434_v3  ;;  %v2710_v0 = vld [vmem:[#allocation2 + $0x40] sm:$0xff] (!%p1942_p0)  ;;  %v2718_v9 = vld [vmem:[#allocation2 + $0x48] sm:$0xff] (!%p1942_p0)  ;;  %v2720_v10 = vld [vmem:[#allocation2 + $0x50] sm:$0xff] (!%p1942_p0) }
 0x1a6   : > { %1419 = vst [vmem:[#allocation2 + $0xd0] sm:$0xff] %v1387_v16  ;;  %v1388_v25 = vadd.f32 %v1342_v18, %v522_v12  ;;  %v1533_v8 = vmul.f32 (!%p1942_p0), %v1432_v1, %v1432_v1  ;;  %1468 = vst [vmem:[%s2581_s8 + $0x38] sm:$0xff] (!%p1942_p0), %v2708_v5  ;;  %v2722_v12 = vld [vmem:[#allocation2 + $0x58] sm:$0xff] (!%p1942_p0)  ;;  %v2730_v15 = vld [vmem:[#allocation2 + $0x60] sm:$0xff] (!%p1942_p0) }
 0x1a7   : > { %v1381_v28 = vadd.f32 %v1315_v22, %v515_v17  ;;  %1417 = vst [vmem:[#allocation2 + $0xc0] sm:$0xff] %v1385_v23  ;;  %v1318_v14 = vadd.f32 %v2026_v26, %v1317_v43  ;;  %v1386_v29 = vadd.f32 %v1334_v24, %v520_v13  ;;  %1469 = vst [vmem:[%s2581_s8 + $0x40] sm:$0xff] (!%p1942_p0), %v2710_v0  ;;  %v2732_v16 = vld [vmem:[#allocation2 + $0x68] sm:$0xff] (!%p1942_p0)  ;;  %v2734_v17 = vld [vmem:[#allocation2 + $0x70] sm:$0xff] (!%p1942_p0) }
 0x1a8   : > { %1420 = vst [vmem:[#allocation2 + $0xd8] sm:$0xff] %v1388_v25  ;;  %1470 = vst [vmem:[%s2581_s8 + $0x48] sm:$0xff] (!%p1942_p0), %v2718_v9  ;;  %v1534_v13 = vmul.f32 (!%p1942_p0), %v1433_v2, %v1433_v2  ;;  %v2742_v21 = vld [vmem:[#allocation2 + $0x78] sm:$0xff] (!%p1942_p0)  ;;  %v2744_v22 = vld [vmem:[#allocation2 + $0x80] sm:$0xff] (!%p1942_p0) }
 0x1a9   : > { %1413 = vst [vmem:[#allocation2 + $0xa0] sm:$0xff] %v1381_v28  ;;  %v1382_v30 = vadd.f32 %v1318_v14, %v516_v27  ;;  %1418 = vst [vmem:[#allocation2 + $0xc8] sm:$0xff] %v1386_v29  ;;  %v2027_v32 = vpop.f32.mrb[44].mxu0  ;;  %v2127_v19 = vpop.f32.mrb[44].mxu1  ;;  %v2746_v23 = vld [vmem:[#allocation2 + $0x88] sm:$0xff] (!%p1942_p0)  ;;  %v2754_v26 = vld [vmem:[#allocation2 + $0x90] sm:$0xff] (!%p1942_p0)  ;;  %v1535_v14 = vmul.f32 (!%p1942_p0), %v1434_v3, %v1434_v3 }
 0x1aa   : > { %v1355_v33 = vadd.f32 %v2127_v19, %v2681_v50  ;;  %v2028_v34 = vpop.f32.mrb[45].mxu0  ;;  %v1346_v36 = vpop.f32.mrb[45].mxu1  ;;  %1471 = vst [vmem:[%s2581_s8 + $0x50] sm:$0xff] (!%p1942_p0), %v2720_v10  ;;  %1472 = vst [vmem:[%s2581_s8 + $0x58] sm:$0xff] (!%p1942_p0), %v2722_v12  ;;  %v2756_v24 = vld [vmem:[#allocation2 + $0x98] sm:$0xff] (!%p1942_p0) }
 0x1ab   : > { %1414 = vst [vmem:[#allocation2 + $0xa8] sm:$0xff] %v1382_v30  ;;  %v2029_v20 = vadd.f32 %v2028_v34, %v2027_v32  ;;  %v1347_v39 = vadd.f32 %v2677_v38, %v1346_v36  ;;  %v2030_v40 = vpop.f32.mrb[46].mxu0  ;;  %v2128_v42 = vpop.f32.mrb[46].mxu1  ;;  %1473 = vst [vmem:[%s2581_s8 + $0x60] sm:$0xff] (!%p1942_p0), %v2730_v15  ;;  %v1536_v36 = vmul.f32 (!%p1942_p0), %v2706_v4, %v2706_v4 }
 0x1ac   : > { %v1391_v45 = vadd.f32 %v1355_v33, %v525_v31  ;;  %v1358_v37 = vadd.f32 %v2128_v42, %v2683_v56  ;;  %v2031_v47 = vpop.f32.mrb[47].mxu0  ;;  %v1349_v51 = vpop.f32.mrb[47].mxu1  ;;  %1474 = vst [vmem:[%s2581_s8 + $0x68] sm:$0xff] (!%p1942_p0), %v2732_v16  ;;  %1475 = vst [vmem:[%s2581_s8 + $0x70] sm:$0xff] (!%p1942_p0), %v2734_v17 }
 0x1ad   : > { %v1323_v52 = vadd.f32 %v2685_v49, %v2029_v20  ;;  %v1389_v50 = vadd.f32 %v1347_v39, %v523_v35  ;;  %v2032_v53 = vadd.f32 %v2031_v47, %v2030_v40  ;;  %v1350_v54 = vadd.f32 %v2679_v44, %v1349_v51  ;;  %1428 = sbr.rel (%p1942_p0) target bundleno = 508 (0x1fc), region = 62  ;;  %v1429_v49 = vld [vmem:[#allocation2] sm:$0xff] (!%p1942_p0)  ;;  %v1430_v44 = vld [vmem:[#allocation2 + $0x8] sm:$0xff] (!%p1942_p0)  ;;  %1476 = vst [vmem:[%s2581_s8 + $0x78] sm:$0xff] (!%p1942_p0), %v2742_v21  ;;  %v2782_v33 = vld [vmem:[#allocation2 + $0xd0] sm:$0xff] (!%p1942_p0) }
 0x1ae   : > { %1423 = vst [vmem:[#allocation2 + $0xf0] sm:$0xff] %v1391_v45  ;;  %v1392_v57 = vadd.f32 %v1358_v37, %v526_v41  ;;  %1461 = vst [vmem:[%s2581_s8] sm:$0xff] (!%p1942_p0), %v1429_v49  ;;  %v1493_v61 = vadd.f32 (!%p1942_p0), %v1430_v44, %v1429_v49  ;;  %v1531_v62 = vmul.f32 (!%p1942_p0), %v1430_v44, %v1430_v44  ;;  %v2778_v31 = vld [vmem:[#allocation2 + $0xc0] sm:$0xff] (!%p1942_p0) }
 0x1af   : > { %v1383_v38 = vadd.f32 %v1323_v52, %v517_v46  ;;  %1421 = vst [vmem:[#allocation2 + $0xe0] sm:$0xff] %v1389_v50  ;;  %v1326_v43 = vadd.f32 %v2687_v55, %v2032_v53  ;;  %v1390_v59 = vadd.f32 %v1350_v54, %v524_v48  ;;  %v1530_v55 = vmul.f32 (!%p1942_p0), %v1429_v49, %v1429_v49  ;;  %v2792_v20 = vld [vmem:[#allocation2 + $0xd8] sm:$0xff] (!%p1942_p0) }
 0x1b0   : > { %1424 = vst [vmem:[#allocation2 + $0xf8] sm:$0xff] %v1392_v57  ;;  %1462 = vst [vmem:[%s2581_s8 + $0x8] sm:$0xff] (!%p1942_p0), %v1430_v44  ;;  %v1494_v7 = vadd.f32 (!%p1942_p0), %v1493_v61, %v1431_v60  ;;  %v2758_v25 = vld [vmem:[#allocation2 + $0xa0] sm:$0xff] (!%p1942_p0)  ;;  %v2780_v19 = vld [vmem:[#allocation2 + $0xc8] sm:$0xff] (!%p1942_p0)  ;;  %v1537_v37 = vmul.f32 (!%p1942_p0), %v2708_v5, %v2708_v5  ;;  %v1538_v51 = vmul.f32 (!%p1942_p0), %v2710_v0, %v2710_v0 }
 0x1b1   : > { %1415 = vst [vmem:[#allocation2 + $0xb0] sm:$0xff] %v1383_v38  ;;  %v1384_v56 = vadd.f32 %v1326_v43, %v518_v58  ;;  %1422 = vst [vmem:[#allocation2 + $0xe8] sm:$0xff] %v1390_v59  ;;  %v1562_v6 = vadd.f32 (!%p1942_p0), %v1531_v62, %v1530_v55  ;;  %v1539_v53 = vmul.f32 (!%p1942_p0), %v2718_v9, %v2718_v9 }
 0x1b2   : > { %v1495_v11 = vadd.f32 (!%p1942_p0), %v1494_v7, %v1432_v1  ;;  %1477 = vst [vmem:[%s2581_s8 + $0x80] sm:$0xff] (!%p1942_p0), %v2744_v22  ;;  %1478 = vst [vmem:[%s2581_s8 + $0x88] sm:$0xff] (!%p1942_p0), %v2746_v23  ;;  %v2766_v29 = vld [vmem:[#allocation2 + $0xa8] sm:$0xff] (!%p1942_p0)  ;;  %v1540_v58 = vmul.f32 (!%p1942_p0), %v2720_v10, %v2720_v10  ;;  %v1541_v59 = vmul.f32 (!%p1942_p0), %v2722_v12, %v2722_v12 }
 0x1b3   : > { %1416 = vst [vmem:[#allocation2 + $0xb8] sm:$0xff] %v1384_v56  ;;  %v1563_v18 = vadd.f32 (!%p1942_p0), %v1562_v6, %v1532_v63  ;;  %1479 = vst [vmem:[%s2581_s8 + $0x90] sm:$0xff] (!%p1942_p0), %v2754_v26  ;;  %v1542_v44 = vmul.f32 (!%p1942_p0), %v2730_v15, %v2730_v15  ;;  %v1543_v61 = vmul.f32 (!%p1942_p0), %v2732_v16, %v2732_v16 }
 0x1b4   : > { %v1496_v28 = vadd.f32 %v1495_v11, %v1433_v2  ;;  %1480 = vst [vmem:[%s2581_s8 + $0x98] sm:$0xff] %v2756_v24  ;;  %1481 = vst [vmem:[%s2581_s8 + $0xa0] sm:$0xff] %v2758_v25  ;;  %v1544_v1 = vmul.f32 %v2734_v17, %v2734_v17  ;;  %v1546_v6 = vmul.f32 %v2744_v22, %v2744_v22 }
 0x1b5   : > { %v1564_v27 = vadd.f32 %v1563_v18, %v1533_v8  ;;  %1482 = vst [vmem:[%s2581_s8 + $0xa8] sm:$0xff] %v2766_v29  ;;  %1485 = vst [vmem:[%s2581_s8 + $0xc0] sm:$0xff] %v2778_v31  ;;  %v2804_v41 = vld [vmem:[#allocation2 + $0xf0] sm:$0xff]  ;;  %v1549_v18 = vmul.f32 %v2756_v24, %v2756_v24 }
 0x1b6   : > { %v1497_v35 = vadd.f32 %v1496_v28, %v1434_v3  ;;  %1486 = vst [vmem:[%s2581_s8 + $0xc8] sm:$0xff] %v2780_v19  ;;  %1487 = vst [vmem:[%s2581_s8 + $0xd0] sm:$0xff] %v2782_v33  ;;  %v2794_v39 = vld [vmem:[#allocation2 + $0xe0] sm:$0xff] }
 0x1b7   : > { %v1565_v34 = vadd.f32 %v1564_v27, %v1534_v13  ;;  %1488 = vst [vmem:[%s2581_s8 + $0xd8] sm:$0xff] %v2792_v20  ;;  %1489 = vst [vmem:[%s2581_s8 + $0xe0] sm:$0xff] %v2794_v39  ;;  %v2806_v42 = vld [vmem:[#allocation2 + $0xf8] sm:$0xff] }
 0x1b8   : > { %v2768_v30 = vld [vmem:[#allocation2 + $0xb0] sm:$0xff]  ;;  %v2796_v40 = vld [vmem:[#allocation2 + $0xe8] sm:$0xff]  ;;  %v1498_v46 = vadd.f32 %v1497_v35, %v2706_v4  ;;  %1491 = vst [vmem:[%s2581_s8 + $0xf0] sm:$0xff] %v2804_v41  ;;  %1492 = vst [vmem:[%s2581_s8 + $0xf8] sm:$0xff] %v2806_v42  ;;  %v1545_v4 = vmul.f32 %v2742_v21, %v2742_v21 }
 0x1b9   : > { %1483 = vst [vmem:[%s2581_s8 + $0xb0] sm:$0xff] %v2768_v30  ;;  %1490 = vst [vmem:[%s2581_s8 + $0xe8] sm:$0xff] %v2796_v40  ;;  %v1566_v45 = vadd.f32 %v1565_v34, %v1535_v14 }
 0x1ba   : > { %v2770_v32 = vld [vmem:[#allocation2 + $0xb8] sm:$0xff]  ;;  %v1499_v48 = vadd.f32 %v1498_v46, %v2708_v5 }
 0x1bb   : > { %1484 = vst [vmem:[%s2581_s8 + $0xb8] sm:$0xff] %v2770_v32  ;;  %v1567_v47 = vadd.f32 %v1566_v45, %v1536_v36 }
 0x1bc   : > { %v1500_v50 = vadd.f32 %v1499_v48, %v2710_v0 }
 0x1bd   : > { %v1568_v52 = vadd.f32 %v1567_v47, %v1537_v37 }
 0x1be   : > { %v1501_v57 = vadd.f32 %v1500_v50, %v2718_v9  ;;  %v1547_v9 = vmul.f32 %v2746_v23, %v2746_v23 }
 0x1bf   : > { %v1569_v54 = vadd.f32 %v1568_v52, %v1538_v51 }
 0x1c0   : > { %v1502_v43 = vadd.f32 %v1501_v57, %v2720_v10 }
 0x1c1   : > { %v1570_v38 = vadd.f32 %v1569_v54, %v1539_v53 }
 0x1c2   : > { %v1503_v49 = vadd.f32 %v1502_v43, %v2722_v12 }
 0x1c3   : > { %v1571_v56 = vadd.f32 %v1570_v38, %v1540_v58 }
 0x1c4   : > { %v1504_v55 = vadd.f32 %v1503_v49, %v2730_v15  ;;  %v1548_v15 = vmul.f32 %v2754_v26, %v2754_v26 }
 0x1c5   : > { %v1572_v60 = vadd.f32 %v1571_v56, %v1541_v59 }
 0x1c6   : > { %v1505_v63 = vadd.f32 %v1504_v55, %v2732_v16 }
 0x1c7   : > { %v1573_v62 = vadd.f32 %v1572_v60, %v1542_v44 }
 0x1c8   : > { %v1506_v3 = vadd.f32 %v1505_v63, %v2734_v17 }
 0x1c9   : > { %v1574_v2 = vadd.f32 %v1573_v62, %v1543_v61 }
 0x1ca   : > { %v1507_v0 = vadd.f32 %v1506_v3, %v2742_v21  ;;  %v1550_v21 = vmul.f32 %v2758_v25, %v2758_v25 }
 0x1cb   : > { %v1575_v5 = vadd.f32 %v1574_v2, %v1544_v1 }
 0x1cc   : > { %v1508_v8 = vadd.f32 %v1507_v0, %v2744_v22 }
 0x1cd   : > { %v1576_v7 = vadd.f32 %v1575_v5, %v1545_v4 }
 0x1ce   : > { %v1509_v12 = vadd.f32 %v1508_v8, %v2746_v23  ;;  %v1551_v23 = vmul.f32 %v2766_v29, %v2766_v29 }
 0x1cf   : > { %v1577_v10 = vadd.f32 %v1576_v7, %v1546_v6 }
 0x1d0   : > { %v1510_v17 = vadd.f32 %v1509_v12, %v2754_v26  ;;  %v1552_v26 = vmul.f32 %v2768_v30, %v2768_v30 }
 0x1d1   : > { %v1578_v16 = vadd.f32 %v1577_v10, %v1547_v9 }
 0x1d2   : > { %v1511_v13 = vadd.f32 %v1510_v17, %v2756_v24  ;;  %v1553_v24 = vmul.f32 %v2770_v32, %v2770_v32 }
 0x1d3   : > { %v1579_v11 = vadd.f32 %v1578_v16, %v1548_v15 }
 0x1d4   : > { %v1512_v27 = vadd.f32 %v1511_v13, %v2758_v25  ;;  %v1554_v25 = vmul.f32 %v2778_v31, %v2778_v31 }
 0x1d5   : > { %v1580_v22 = vadd.f32 %v1579_v11, %v1549_v18 }
 0x1d6   : > { %v1513_v14 = vadd.f32 %v1512_v27, %v2766_v29  ;;  %v1555_v29 = vmul.f32 %v2780_v19, %v2780_v19 }
 0x1d7   : > { %v1581_v28 = vadd.f32 %v1580_v22, %v1550_v21 }
 0x1d8   : > { %v1514_v35 = vadd.f32 %v1513_v14, %v2768_v30  ;;  %v1556_v30 = vmul.f32 %v2782_v33, %v2782_v33 }
 0x1d9   : > { %v1582_v34 = vadd.f32 %v1581_v28, %v1551_v23 }
 0x1da   : > { %v1515_v45 = vadd.f32 %v1514_v35, %v2770_v32  ;;  %v1557_v32 = vmul.f32 %v2792_v20, %v2792_v20 }
 0x1db   : > { %v1583_v36 = vadd.f32 %v1582_v34, %v1552_v26 }
 0x1dc   : > { %v1516_v37 = vadd.f32 %v1515_v45, %v2778_v31  ;;  %v1558_v31 = vmul.f32 %v2794_v39, %v2794_v39 }
 0x1dd   : > { %v1584_v46 = vadd.f32 %v1583_v36, %v1553_v24 }
 0x1de   : > { %v1517_v48 = vadd.f32 %v1516_v37, %v2780_v19  ;;  %v1559_v19 = vmul.f32 %v2796_v40, %v2796_v40 }
 0x1df   : > { %v1585_v47 = vadd.f32 %v1584_v46, %v1554_v25 }
 0x1e0   : > { %v1518_v52 = vadd.f32 %v1517_v48, %v2782_v33  ;;  %v1560_v33 = vmul.f32 %v2804_v41, %v2804_v41 }
 0x1e1   : > { %v1586_v51 = vadd.f32 %v1585_v47, %v1555_v29 }
 0x1e2   : > { %v1519_v53 = vadd.f32 %v1518_v52, %v2792_v20  ;;  %v1561_v20 = vmul.f32 %v2806_v42, %v2806_v42 }
 0x1e3   : > { %v1587_v50 = vadd.f32 %v1586_v51, %v1556_v30 }
 0x1e4   : > { %v1520_v57 = vadd.f32 %v1519_v53, %v2794_v39 }
 0x1e5   : > { %v1588_v54 = vadd.f32 %v1587_v50, %v1557_v32 }
 0x1e6   : > { %v1521_v38 = vadd.f32 %v1520_v57, %v2796_v40 }
 0x1e7   : > { %v1589_v58 = vadd.f32 %v1588_v54, %v1558_v31 }
 0x1e8   : > { %v1522_v59 = vadd.f32 %v1521_v38, %v2804_v41 }
 0x1e9   : > { %v1590_v43 = vadd.f32 %v1589_v58, %v1559_v19 }
 0x1ea   : > { %v1523_v39 = vadd.f32 %v1522_v59, %v2806_v42 }
 0x1eb   : > { %v1591_v56 = vadd.f32 %v1590_v43, %v1560_v33 }
 0x1ec   : > { %v1524_v49 = vrot.slane %v1523_v39, 4 }
 0x1ed   : > { %v1592_v44 = vadd.f32 %v1591_v56, %v1561_v20 }
 0x1ee   : > { %v1525_v60 = vadd.f32 %v1524_v49, %v1523_v39 }
 0x1ef   : > { %v1593_v55 = vrot.slane %v1592_v44, 4 }
 0x1f0   : > { %v1526_v61 = vrot.slane %v1525_v60, 2 }
 0x1f1   : > { %v1594_v40 = vadd.f32 %v1593_v55, %v1592_v44 }
 0x1f2   : > { %v1527_v62 = vadd.f32 %v1526_v61, %v1525_v60 }
 0x1f3   : > { %v1595_v63 = vrot.slane %v1594_v40, 2 }
 0x1f4   : > { %v1528_v1 = vrot.slane %v1527_v62, 1 }
 0x1f5   : > { %v1596_v2 = vadd.f32 %v1595_v63, %v1594_v40 }
 0x1f6   : > { %v1529_v3 = vadd.f32 %v1528_v1, %v1527_v62 }
 0x1f7   : > { %v1597_v41 = vrot.slane %v1596_v2, 1 }
 0x1f8   : > { %1599 = vst [vmem:[%s2587_s11] sm:$0xff] %v1529_v3 }
 0x1f9   : > { %v1598_v4 = vadd.f32 %v1597_v41, %v1596_v2 }
 0x1fb   : > { %1600 = vst [vmem:[%s2592_s14] sm:$0xff] %v1598_v4 }
 0x1fc PF: > { %s15_s21 = sadd.s32 1, %s2347_s21   ;;  %s2916_s15 = smov %s2327_s16 }
 0x1fd   : > { %p12_p1 = scmp.ge.s32.totalorder %s15_s21, 8   ;;  %s2917_s16 = smov %s2426_s28 }
 0x1fe   : > { %s2918_s17 = smov %s2339_s19  ;;  %s2919_s18 = smov %s2343_s20 }
 0x1ff   : > { %s2920_s19 = smov %s2923_s22  ;;  %s2921_s20 = smov %s2927_s23 }
 0x200   :  { %14 = sbr.rel (!%p12_p1) target bundleno = 4 (0x4), region = 130 }

// kernel: residual_block_forward.15
= control target key start
LH: loop header
LB: loop body
LE: loop exit
PB: predicated region body
PF: predicated region fallthrough
CT: control target
= control target key end

     0   :  { %9 = vsyncpa [#allocation3], 0  ;;  %s1054_s0 = inlined_call_operand.vmem [shape: f32[512,128], index: 0, kind: input, shape index: {}]   ;;  %s1055_s1 = inlined_call_operand.vmem [shape: f32[1,128], index: 1, kind: input, shape index: {}]   ;;  %s1056_s2 = inlined_call_operand.vmem [shape: f32[1,128], index: 2, kind: input, shape index: {}]   ;;  %s1057_s3 = inlined_call_operand.vmem [shape: f32[512,128], index: 3, kind: input, shape index: {}]   ;;  %s1058_s4 = inlined_call_operand.hbm [shape: f32[512,128], index: 4, kind: output, shape index: {}]  }
   0x1   :  { %11 = vsyncpa [#allocation3 + $0x1], 0  ;;  %s761_s15 = smov 0   ;;  %s763_s16 = smov 0  }
   0x2   :  { %s765_s17 = smov 0   ;;  %s767_s18 = smov 0  }
   0x3 LB: > { %s782_s19 = sadd.s32 4294967295, %s731_s18   ;;  %s611_s20 = sadd.s32 4294967294, %s731_s18   ;;  %s731_s18 = sphi %s767_s18, %s1064_s18   ;;  %s727_s17 = sphi %s765_s17, %s1063_s17   ;;  %s723_s16 = sphi %s763_s16, %s1062_s16   ;;  %s719_s15 = sphi %s761_s15, %s1061_s15  }
   0x4   : > { %s786_s21 = sadd.s32 1, %s731_s18   ;;  %s118_s22 = sadd.s32 1, %s727_s17 }
   0x5   : > { %s115_s23 = ssub.s32 %s731_s18, %s786_s21  ;;  %p128_p0 = scmp.ne.s32.totalorder %s727_s17, %s723_s16 }
   0x6   : > { %p116_p1 = scmp.eq.s32.totalorder %s115_s23, 0  ;;  %p129_p2 = scmp.eq.s32.totalorder %s782_s19, 1 }
   0x7   : > { %p134_p3 = scmp.ne.s32.totalorder %s723_s16, %s719_s15  ;;  %p135_p4 = scmp.eq.s32.totalorder %s611_s20, 1 }
   0x8   : > { %s797_s24 = scalar_select %p116_p1, %s727_s17, %s118_s22  }
   0x9   : > { %p799_p5 = por %p129_p2, %p128_p0  ;;  %p803_p6 = por %p135_p4, %p134_p3 }
   0xa   : > { %p614_p7 = scmp.ge.s32.totalorder %s731_s18, 1  ;;  %p177_p8 = scmp.lt.s32.totalorder %s731_s18, 3 }
   0xc   : > { %p178_p9 = pnand %p614_p7, %p177_p8 }
   0xd   : > { %s616_s27 = sshll.u32 (!%p178_p9), %s782_s19, 5  ;;  %v813_v0 = vld [vmem:[%s1055_s1] ss:$0 sm:$0xff] (!%p178_p9)  ;;  %s205_s10 = sand.u32 (!%p178_p9), 1, %s723_s16  }
   0xe   : > { %181 = sbr.rel (%p178_p9) target bundleno = 94 (0x5e), region = 36  ;;  %p209_p10 = scmp.lt.s32.totalorder (!%p178_p9), %s616_s27, 63  ;;  %v824_v2 = vld [vmem:[%s1056_s2] ss:$0 sm:$0xff] (!%p178_p9) }
   0xf   : > { %s846_s14 = sshll.u32 (!%p178_p9), %s205_s10, 8  ;;  %s627_s22 = sshll.u32 (!%p178_p9), %s782_s19, 12 }
  0x10   : > { %s864_s20 = scalar_lea.vmem (!%p178_p9), [#allocation2], %s846_s14  ;;  %s1006_s29 = scalar_lea.hbm (!%p178_p9), %s1058_s4, %s627_s22 }
  0x11   : > { %s537_s23 = sshll.u32 (!%p178_p9), %s864_s20, 4  ;;  %s1013_s19 = scalar_lea.sflag (!%p178_p9), [#allocation3], %s205_s10  ;;  %s1008_s23 = int_to_ptr.vmem [resolvable:$true] %s537_s23 }
  0x12   : > { %s669_s30 = scalar_lea.vmem (!%p178_p9), %s1008_s23, 4096  ;;  %s733_s5 = smov (!%p178_p9), [#allocation2]  }
  0x13   : > { %p670_p11 = scmp.ne.s32.totalorder (!%p178_p9), %s1008_s23, %s669_s30  ;;  %s673_s6 = sshll.u32 (!%p178_p9), %s733_s5, 4  ;;  %s674_s6 = int_to_ptr.vmem [resolvable:$false] %s673_s6 }
  0x14   : > { %p676_p0 = scmp.lt.s32.totalorder (!%p178_p9), %s1008_s23, %s674_s6 }
  0x15   : > { %s1066_s27 = smov (!%p209_p10, %s616_s27), 63  ;;  %p671_p12 = pnand %p670_p11, %p799_p5 }
  0x16   : > { %s617_s28 = sshll.u32 %s1066_s27, 3 }
  0x17   : > { %s818_s7 = scalar_lea.vmem %s1054_s0, %s617_s28  ;;  %s831_s13 = scalar_lea.vmem %s1057_s3, %s617_s28 }
  0x18   : > { %v221_v1 = vld [vmem:[%s818_s7] sm:$0xff]  ;;  %v222_v3 = vld [vmem:[%s818_s7 + $0x8] sm:$0xff]  ;;  %v223_v6 = vld [vmem:[%s818_s7 + $0x10] sm:$0xff]  ;;  %p672_p13 = pneg %p671_p12 }
  0x19   : > { %v260_v4 = vmul.f32 %v813_v0, %v221_v1  ;;  %v261_v5 = vmul.f32 %v813_v0, %v222_v3  ;;  %v262_v7 = vmul.f32 %v813_v0, %v223_v6  ;;  %v224_v8 = vld [vmem:[%s818_s7 + $0x18] sm:$0xff]  ;;  %v225_v9 = vld [vmem:[%s818_s7 + $0x20] sm:$0xff]  ;;  %v226_v14 = vld [vmem:[%s818_s7 + $0x28] sm:$0xff] }
  0x1a   : > { %v263_v12 = vmul.f32 %v813_v0, %v224_v8  ;;  %v264_v13 = vmul.f32 %v813_v0, %v225_v9  ;;  %v427_v15 = vld [vmem:[%s831_s13] sm:$0xff]  ;;  %v428_v16 = vld [vmem:[%s831_s13 + $0x8] sm:$0xff]  ;;  %v265_v18 = vmul.f32 %v813_v0, %v226_v14  ;;  %v227_v19 = vld [vmem:[%s818_s7 + $0x30] sm:$0xff] }
  0x1b   : > { %v299_v10 = vadd.f32 %v824_v2, %v260_v4  ;;  %v300_v11 = vadd.f32 %v824_v2, %v261_v5  ;;  %v301_v17 = vadd.f32 %v824_v2, %v262_v7  ;;  %v429_v23 = vld [vmem:[%s831_s13 + $0x10] sm:$0xff]  ;;  %v266_v29 = vmul.f32 %v813_v0, %v227_v19  ;;  %v228_v30 = vld [vmem:[%s818_s7 + $0x38] sm:$0xff]  ;;  %v229_v35 = vld [vmem:[%s818_s7 + $0x40] sm:$0xff] }
  0x1c   : > { %v302_v24 = vadd.f32 %v824_v2, %v263_v12  ;;  %v303_v25 = vadd.f32 %v824_v2, %v264_v13  ;;  %v304_v28 = vadd.f32 %v824_v2, %v265_v18  ;;  %v430_v34 = vld [vmem:[%s831_s13 + $0x18] sm:$0xff]  ;;  %v230_v36 = vld [vmem:[%s818_s7 + $0x48] sm:$0xff]  ;;  %v431_v40 = vld [vmem:[%s831_s13 + $0x20] sm:$0xff]  ;;  %v267_v44 = vmul.f32 %v813_v0, %v228_v30 }
  0x1d   : > { %vm331_vm0 = vcmp.gt.f32.partialorder %v299_v10, 0.0  ;;  %v363_v20 = vmul.f32 0.1, %v299_v10  ;;  %vm332_vm1 = vcmp.gt.f32.partialorder %v300_v11, 0.0  ;;  %v364_v21 = vmul.f32 0.1, %v300_v11 }
  0x1e   : > { %vm333_vm2 = vcmp.gt.f32.partialorder %v301_v17, 0.0  ;;  %v365_v22 = vmul.f32 0.1, %v301_v17  ;;  %vm334_vm3 = vcmp.gt.f32.partialorder %v302_v24, 0.0  ;;  %v366_v38 = vmul.f32 0.1, %v302_v24 }
  0x1f   : > { %v395_v26 = vsel %vm331_vm0, %v299_v10, %v363_v20  ;;  %v396_v27 = vsel %vm332_vm1, %v300_v11, %v364_v21  ;;  %vm335_vm4 = vcmp.gt.f32.partialorder %v303_v25, 0.0  ;;  %v367_v39 = vmul.f32 0.1, %v303_v25  ;;  %v432_v42 = vld [vmem:[%s831_s13 + $0x28] sm:$0xff]  ;;  %v231_v49 = vld [vmem:[%s818_s7 + $0x50] sm:$0xff]  ;;  %v232_v50 = vld [vmem:[%s818_s7 + $0x58] sm:$0xff] }
  0x20   : > { %v459_v31 = vadd.f32 %v427_v15, %v395_v26  ;;  %v460_v32 = vadd.f32 %v428_v16, %v396_v27  ;;  %v397_v33 = vsel %vm333_vm2, %v301_v17, %v365_v22  ;;  %vm336_vm5 = vcmp.gt.f32.partialorder %v304_v28, 0.0  ;;  %v233_v51 = vld [vmem:[%s818_s7 + $0x60] sm:$0xff]  ;;  %v433_v57 = vld [vmem:[%s831_s13 + $0x30] sm:$0xff]  ;;  %v434_v60 = vld [vmem:[%s831_s13 + $0x38] sm:$0xff] }
  0x21   : > { %v461_v37 = vadd.f32 %v429_v23, %v397_v33  ;;  %v368_v41 = vmul.f32 0.1, %v304_v28  ;;  %v305_v43 = vadd.f32 %v824_v2, %v266_v29  ;;  %v398_v45 = vsel %vm334_vm3, %v302_v24, %v366_v38  ;;  %v435_v5 = vld [vmem:[%s831_s13 + $0x40] sm:$0xff]  ;;  %v234_v6 = vld [vmem:[%s818_s7 + $0x68] sm:$0xff]  ;;  %v437_v18 = vld [vmem:[%s831_s13 + $0x50] sm:$0xff] }
  0x22   : > { %491 = vst [vmem:[%s864_s20] sm:$0xff] %v459_v31  ;;  %492 = vst [vmem:[%s864_s20 + $0x8] sm:$0xff] %v460_v32  ;;  %v399_v46 = vsel %vm335_vm4, %v303_v25, %v367_v39  ;;  %v268_v47 = vmul.f32 %v813_v0, %v229_v35  ;;  %v269_v48 = vmul.f32 %v813_v0, %v230_v36  ;;  %v436_v10 = vld [vmem:[%s831_s13 + $0x48] sm:$0xff]  ;;  %v235_v20 = vld [vmem:[%s818_s7 + $0x70] sm:$0xff] }
  0x23   : > { %493 = vst [vmem:[%s864_s20 + $0x10] sm:$0xff] %v461_v37  ;;  %v462_v52 = vadd.f32 %v430_v34, %v398_v45  ;;  %v463_v53 = vadd.f32 %v431_v40, %v399_v46  ;;  %v400_v54 = vsel %vm336_vm5, %v304_v28, %v368_v41  ;;  %vm337_vm6 = vcmp.gt.f32.partialorder %v305_v43, 0.0  ;;  %v236_v21 = vld [vmem:[%s818_s7 + $0x78] sm:$0xff]  ;;  %v439_v26 = vld [vmem:[%s831_s13 + $0x60] sm:$0xff]  ;;  %v238_v34 = vld [vmem:[%s818_s7 + $0x88] sm:$0xff] }
  0x24   : > { %v464_v55 = vadd.f32 %v432_v42, %v400_v54  ;;  %v369_v56 = vmul.f32 0.1, %v305_v43  ;;  %v306_v58 = vadd.f32 %v824_v2, %v267_v44  ;;  %v307_v59 = vadd.f32 %v824_v2, %v268_v47  ;;  %v438_v25 = vld [vmem:[%s831_s13 + $0x58] sm:$0xff]  ;;  %v237_v27 = vld [vmem:[%s818_s7 + $0x80] sm:$0xff]  ;;  %v239_v39 = vld [vmem:[%s818_s7 + $0x90] sm:$0xff] }
  0x25   : > { %494 = vst [vmem:[%s864_s20 + $0x18] sm:$0xff] %v462_v52  ;;  %495 = vst [vmem:[%s864_s20 + $0x20] sm:$0xff] %v463_v53  ;;  %v308_v61 = vadd.f32 %v824_v2, %v269_v48  ;;  %v270_v62 = vmul.f32 %v813_v0, %v231_v49  ;;  %v271_v63 = vmul.f32 %v813_v0, %v232_v50  ;;  %v240_v40 = vld [vmem:[%s818_s7 + $0x98] sm:$0xff]  ;;  %v241_v41 = vld [vmem:[%s818_s7 + $0xa0] sm:$0xff] }
  0x26   : > { %v272_v1 = vmul.f32 %v813_v0, %v233_v51  ;;  %496 = vst [vmem:[%s864_s20 + $0x28] sm:$0xff] %v464_v55  ;;  %v401_v3 = vsel %vm337_vm6, %v305_v43, %v369_v56  ;;  %vm338_vm7 = vcmp.gt.f32.partialorder %v306_v58, 0.0  ;;  %v370_v4 = vmul.f32 0.1, %v306_v58  ;;  %v440_v45 = vld [vmem:[%s831_s13 + $0x68] sm:$0xff]  ;;  %v441_v56 = vld [vmem:[%s831_s13 + $0x70] sm:$0xff] }
  0x27   : > { %vm339_vm8 = vcmp.gt.f32.partialorder %v307_v59, 0.0  ;;  %v465_v7 = vadd.f32 %v433_v57, %v401_v3  ;;  %v371_v8 = vmul.f32 0.1, %v307_v59  ;;  %vm340_vm9 = vcmp.gt.f32.partialorder %v308_v61, 0.0  ;;  %v442_v57 = vld [vmem:[%s831_s13 + $0x78] sm:$0xff] }
  0x28   : > { %v372_v9 = vmul.f32 0.1, %v308_v61  ;;  %v402_v11 = vsel %vm338_vm7, %v306_v58, %v370_v4  ;;  %v309_v12 = vadd.f32 %v824_v2, %v270_v62  ;;  %v310_v13 = vadd.f32 %v824_v2, %v271_v63 }
  0x29   : > { %v311_v14 = vadd.f32 %v824_v2, %v272_v1  ;;  %497 = vst [vmem:[%s864_s20 + $0x30] sm:$0xff] %v465_v7  ;;  %v466_v15 = vadd.f32 %v434_v60, %v402_v11  ;;  %v403_v16 = vsel %vm339_vm8, %v307_v59, %v371_v8  ;;  %v273_v19 = vmul.f32 %v813_v0, %v234_v6  ;;  %v443_v60 = vld [vmem:[%s831_s13 + $0x80] sm:$0xff]  ;;  %v444_v7 = vld [vmem:[%s831_s13 + $0x88] sm:$0xff] }
  0x2a   : > { %v404_v17 = vsel %vm340_vm9, %v308_v61, %v372_v9  ;;  %v467_v22 = vadd.f32 %v435_v5, %v403_v16  ;;  %vm341_vm10 = vcmp.gt.f32.partialorder %v309_v12, 0.0  ;;  %v373_v24 = vmul.f32 0.1, %v309_v12  ;;  %v242_v8 = vld [vmem:[%s818_s7 + $0xa8] sm:$0xff]  ;;  %v243_v9 = vld [vmem:[%s818_s7 + $0xb0] sm:$0xff] }
  0x2b   : > { %v468_v23 = vadd.f32 %v436_v10, %v404_v17  ;;  %498 = vst [vmem:[%s864_s20 + $0x38] sm:$0xff] %v466_v15  ;;  %vm342_vm11 = vcmp.gt.f32.partialorder %v310_v13, 0.0  ;;  %v374_v28 = vmul.f32 0.1, %v310_v13  ;;  %vm343_vm12 = vcmp.gt.f32.partialorder %v311_v14, 0.0  ;;  %v244_v15 = vld [vmem:[%s818_s7 + $0xb8] sm:$0xff] }
  0x2c   : > { %v375_v29 = vmul.f32 0.1, %v311_v14  ;;  %499 = vst [vmem:[%s864_s20 + $0x40] sm:$0xff] %v467_v22  ;;  %v405_v30 = vsel %vm341_vm10, %v309_v12, %v373_v24  ;;  %v312_v31 = vadd.f32 %v824_v2, %v273_v19  ;;  %v274_v32 = vmul.f32 %v813_v0, %v235_v20  ;;  %v447_v20 = vld [vmem:[%s831_s13 + $0xa0] sm:$0xff] }
  0x2d   : > { %500 = vst [vmem:[%s864_s20 + $0x48] sm:$0xff] %v468_v23  ;;  %v275_v33 = vmul.f32 %v813_v0, %v236_v21  ;;  %v469_v35 = vadd.f32 %v437_v18, %v405_v30  ;;  %v406_v36 = vsel %vm342_vm11, %v310_v13, %v374_v28  ;;  %v276_v38 = vmul.f32 %v813_v0, %v237_v27  ;;  %v445_v13 = vld [vmem:[%s831_s13 + $0x90] sm:$0xff]  ;;  %v245_v23 = vld [vmem:[%s818_s7 + $0xc0] sm:$0xff]  ;;  %v246_v28 = vld [vmem:[%s818_s7 + $0xc8] sm:$0xff] }
  0x2e   : > { %v407_v37 = vsel %vm343_vm12, %v311_v14, %v375_v29  ;;  %v470_v42 = vadd.f32 %v438_v25, %v406_v36  ;;  %vm344_vm13 = vcmp.gt.f32.partialorder %v312_v31, 0.0  ;;  %v376_v44 = vmul.f32 0.1, %v312_v31  ;;  %v446_v14 = vld [vmem:[%s831_s13 + $0x98] sm:$0xff]  ;;  %v247_v29 = vld [vmem:[%s818_s7 + $0xd0] sm:$0xff] }
  0x2f   : > { %v471_v43 = vadd.f32 %v439_v26, %v407_v37  ;;  %501 = vst [vmem:[%s864_s20 + $0x50] sm:$0xff] %v469_v35  ;;  %v313_v46 = vadd.f32 %v824_v2, %v274_v32  ;;  %v314_v47 = vadd.f32 %v824_v2, %v275_v33  ;;  %v315_v48 = vadd.f32 %v824_v2, %v276_v38  ;;  %v448_v35 = vld [vmem:[%s831_s13 + $0xa8] sm:$0xff] }
  0x30   : > { %v277_v49 = vmul.f32 %v813_v0, %v238_v34  ;;  %502 = vst [vmem:[%s864_s20 + $0x58] sm:$0xff] %v470_v42  ;;  %v408_v50 = vsel %vm344_vm13, %v312_v31, %v376_v44  ;;  %v278_v51 = vmul.f32 %v813_v0, %v239_v39  ;;  %v279_v52 = vmul.f32 %v813_v0, %v240_v40  ;;  %v449_v40 = vld [vmem:[%s831_s13 + $0xb0] sm:$0xff]  ;;  %v248_v44 = vld [vmem:[%s818_s7 + $0xd8] sm:$0xff] }
  0x31   : > { %503 = vst [vmem:[%s864_s20 + $0x60] sm:$0xff] %v471_v43  ;;  %v280_v53 = vmul.f32 %v813_v0, %v241_v41  ;;  %v472_v54 = vadd.f32 %v440_v45, %v408_v50  ;;  %vm345_vm14 = vcmp.gt.f32.partialorder %v313_v46, 0.0  ;;  %v377_v55 = vmul.f32 0.1, %v313_v46  ;;  %v450_v41 = vld [vmem:[%s831_s13 + $0xb8] sm:$0xff] }
  0x32   : > { %vm346_vm15 = vcmp.gt.f32.partialorder %v314_v47, 0.0  ;;  %v378_v58 = vmul.f32 0.1, %v314_v47  ;;  %vm347_vm0 = vcmp.gt.f32.partialorder %v315_v48, 0.0  ;;  %v379_v59 = vmul.f32 0.1, %v315_v48 }
  0x33   : > { %v316_v61 = vadd.f32 %v824_v2, %v277_v49  ;;  %504 = vst [vmem:[%s864_s20 + $0x68] sm:$0xff] %v472_v54  ;;  %v409_v62 = vsel %vm345_vm14, %v313_v46, %v377_v55  ;;  %v317_v63 = vadd.f32 %v824_v2, %v278_v51  ;;  %v318_v1 = vadd.f32 %v824_v2, %v279_v52  ;;  %v451_v54 = vld [vmem:[%s831_s13 + $0xc0] sm:$0xff] }
  0x34   : > { %v319_v3 = vadd.f32 %v824_v2, %v280_v53  ;;  %v473_v4 = vadd.f32 %v441_v56, %v409_v62  ;;  %v410_v5 = vsel %vm346_vm15, %v314_v47, %v378_v58  ;;  %v411_v6 = vsel %vm347_vm0, %v315_v48, %v379_v59  ;;  %v249_v56 = vld [vmem:[%s818_s7 + $0xe0] sm:$0xff]  ;;  %v453_v62 = vld [vmem:[%s831_s13 + $0xd0] sm:$0xff] }
  0x35   : > { %vm348_vm1 = vcmp.gt.f32.partialorder %v316_v61, 0.0  ;;  %v474_v10 = vadd.f32 %v442_v57, %v410_v5  ;;  %v475_v11 = vadd.f32 %v443_v60, %v411_v6  ;;  %v380_v12 = vmul.f32 0.1, %v316_v61  ;;  %v250_v57 = vld [vmem:[%s818_s7 + $0xe8] sm:$0xff] }
  0x36   : > { %vm349_vm2 = vcmp.gt.f32.partialorder %v317_v63, 0.0  ;;  %505 = vst [vmem:[%s864_s20 + $0x70] sm:$0xff] %v473_v4  ;;  %v381_v16 = vmul.f32 0.1, %v317_v63  ;;  %vm350_vm3 = vcmp.gt.f32.partialorder %v318_v1, 0.0  ;;  %vm351_vm4 = vcmp.gt.f32.partialorder %v319_v3, 0.0 }
  0x37   : > { %v382_v17 = vmul.f32 0.1, %v318_v1  ;;  %506 = vst [vmem:[%s864_s20 + $0x78] sm:$0xff] %v474_v10  ;;  %507 = vst [vmem:[%s864_s20 + $0x80] sm:$0xff] %v475_v11  ;;  %v412_v18 = vsel %vm348_vm1, %v316_v61, %v380_v12  ;;  %v383_v19 = vmul.f32 0.1, %v319_v3  ;;  %v281_v21 = vmul.f32 %v813_v0, %v242_v8 }
  0x38   : > { %v282_v22 = vmul.f32 %v813_v0, %v243_v9  ;;  %v476_v24 = vadd.f32 %v444_v7, %v412_v18  ;;  %v413_v25 = vsel %vm349_vm2, %v317_v63, %v381_v16  ;;  %v283_v27 = vmul.f32 %v813_v0, %v244_v15  ;;  %v452_v61 = vld [vmem:[%s831_s13 + $0xc8] sm:$0xff]  ;;  %v251_v63 = vld [vmem:[%s818_s7 + $0xf0] sm:$0xff]  ;;  %v252_v8 = vld [vmem:[%s818_s7 + $0xf8] sm:$0xff]  ;;  %s675_s7 = scalar_lea.vmem %s674_s6, 8192 }
  0x39   : > { %v414_v26 = vsel %vm350_vm3, %v318_v1, %v382_v17  ;;  %v477_v30 = vadd.f32 %v445_v13, %v413_v25  ;;  %v415_v32 = vsel %vm351_vm4, %v319_v3, %v383_v19  ;;  %v320_v33 = vadd.f32 %v824_v2, %v281_v21  ;;  %v454_v16 = vld [vmem:[%s831_s13 + $0xd8] sm:$0xff]  ;;  %v456_v25 = vld [vmem:[%s831_s13 + $0xe8] sm:$0xff]  ;;  %p677_p1 = scmp.lt.s32.totalorder %s675_s7, %s669_s30 }
  0x3a   : > { %v478_v31 = vadd.f32 %v446_v14, %v414_v26  ;;  %508 = vst [vmem:[%s864_s20 + $0x88] sm:$0xff] %v476_v24  ;;  %v479_v34 = vadd.f32 %v447_v20, %v415_v32  ;;  %v321_v36 = vadd.f32 %v824_v2, %v282_v22  ;;  %v322_v37 = vadd.f32 %v824_v2, %v283_v27  ;;  %v455_v24 = vld [vmem:[%s831_s13 + $0xe0] sm:$0xff] }
  0x3b   : > { %v284_v38 = vmul.f32 %v813_v0, %v245_v23  ;;  %509 = vst [vmem:[%s864_s20 + $0x90] sm:$0xff] %v477_v30  ;;  %vm352_vm5 = vcmp.gt.f32.partialorder %v320_v33, 0.0  ;;  %v384_v39 = vmul.f32 0.1, %v320_v33  ;;  %v285_v42 = vmul.f32 %v813_v0, %v246_v28  ;;  %v457_v28 = vld [vmem:[%s831_s13 + $0xf0] sm:$0xff]  ;;  %p678_p2 = por %p677_p1, %p676_p0 }
  0x3c   : > { %510 = vst [vmem:[%s864_s20 + $0x98] sm:$0xff] %v478_v31  ;;  %v286_v43 = vmul.f32 %v813_v0, %v247_v29  ;;  %511 = vst [vmem:[%s864_s20 + $0xa0] sm:$0xff] %v479_v34  ;;  %vm353_vm6 = vcmp.gt.f32.partialorder %v321_v36, 0.0  ;;  %v385_v45 = vmul.f32 0.1, %v321_v36  ;;  %vm354_vm7 = vcmp.gt.f32.partialorder %v322_v37, 0.0 }
  0x3d   : > { %v386_v46 = vmul.f32 0.1, %v322_v37  ;;  %v416_v47 = vsel %vm352_vm5, %v320_v33, %v384_v39  ;;  %v323_v48 = vadd.f32 %v824_v2, %v284_v38  ;;  %v324_v49 = vadd.f32 %v824_v2, %v285_v42  ;;  %p679_p3 = pnand %p678_p2, %p672_p13 }
  0x3e   : > { %v325_v50 = vadd.f32 %v824_v2, %v286_v43  ;;  %v480_v51 = vadd.f32 %v448_v35, %v416_v47  ;;  %v417_v52 = vsel %vm353_vm6, %v321_v36, %v385_v45  ;;  %v287_v55 = vmul.f32 %v813_v0, %v248_v44  ;;  %v458_v36 = vld [vmem:[%s831_s13 + $0xf8] sm:$0xff] }
  0x3f   : > { %v418_v53 = vsel %vm354_vm7, %v322_v37, %v386_v46  ;;  %v481_v58 = vadd.f32 %v449_v40, %v417_v52  ;;  %vm355_vm8 = vcmp.gt.f32.partialorder %v323_v48, 0.0  ;;  %v387_v60 = vmul.f32 0.1, %v323_v48 }
  0x40   : > { %v482_v59 = vadd.f32 %v450_v41, %v418_v53  ;;  %512 = vst [vmem:[%s864_s20 + $0xa8] sm:$0xff] %v480_v51  ;;  %vm356_vm9 = vcmp.gt.f32.partialorder %v324_v49, 0.0  ;;  %v388_v1 = vmul.f32 0.1, %v324_v49  ;;  %vm357_vm10 = vcmp.gt.f32.partialorder %v325_v50, 0.0 }
  0x41   : > { %v389_v3 = vmul.f32 0.1, %v325_v50  ;;  %513 = vst [vmem:[%s864_s20 + $0xb0] sm:$0xff] %v481_v58  ;;  %v419_v4 = vsel %vm355_vm8, %v323_v48, %v387_v60  ;;  %v326_v5 = vadd.f32 %v824_v2, %v287_v55  ;;  %v288_v6 = vmul.f32 %v813_v0, %v249_v56 }
  0x42   : > { %514 = vst [vmem:[%s864_s20 + $0xb8] sm:$0xff] %v482_v59  ;;  %v289_v7 = vmul.f32 %v813_v0, %v250_v57  ;;  %v483_v9 = vadd.f32 %v451_v54, %v419_v4  ;;  %v420_v10 = vsel %vm356_vm9, %v324_v49, %v388_v1  ;;  %v290_v12 = vmul.f32 %v813_v0, %v251_v63 }
  0x43   : > { %v421_v11 = vsel %vm357_vm10, %v325_v50, %v389_v3  ;;  %v484_v13 = vadd.f32 %v452_v61, %v420_v10  ;;  %vm358_vm11 = vcmp.gt.f32.partialorder %v326_v5, 0.0  ;;  %v390_v15 = vmul.f32 0.1, %v326_v5 }
  0x44   : > { %v485_v14 = vadd.f32 %v453_v62, %v421_v11  ;;  %515 = vst [vmem:[%s864_s20 + $0xc0] sm:$0xff] %v483_v9  ;;  %v327_v17 = vadd.f32 %v824_v2, %v288_v6  ;;  %v328_v18 = vadd.f32 %v824_v2, %v289_v7  ;;  %v329_v19 = vadd.f32 %v824_v2, %v290_v12 }
  0x45   : > { %v291_v20 = vmul.f32 %v813_v0, %v252_v8  ;;  %516 = vst [vmem:[%s864_s20 + $0xc8] sm:$0xff] %v484_v13  ;;  %v422_v21 = vsel %vm358_vm11, %v326_v5, %v390_v15 }
  0x46   : > { %517 = vst [vmem:[%s864_s20 + $0xd0] sm:$0xff] %v485_v14  ;;  %v486_v22 = vadd.f32 %v454_v16, %v422_v21  ;;  %vm359_vm12 = vcmp.gt.f32.partialorder %v327_v17, 0.0  ;;  %v391_v23 = vmul.f32 0.1, %v327_v17  ;;  %vm360_vm13 = vcmp.gt.f32.partialorder %v328_v18, 0.0 }
  0x47   : > { %v392_v26 = vmul.f32 0.1, %v328_v18  ;;  %vm361_vm14 = vcmp.gt.f32.partialorder %v329_v19, 0.0  ;;  %v393_v27 = vmul.f32 0.1, %v329_v19  ;;  %v330_v0 = vadd.f32 %v824_v2, %v291_v20 }
  0x48   : > { %518 = vst [vmem:[%s864_s20 + $0xd8] sm:$0xff] %v486_v22  ;;  %v423_v29 = vsel %vm359_vm12, %v327_v17, %v391_v23 }
  0x49   : > { %v487_v30 = vadd.f32 %v455_v24, %v423_v29  ;;  %v424_v31 = vsel %vm360_vm13, %v328_v18, %v392_v26  ;;  %v425_v32 = vsel %vm361_vm14, %v329_v19, %v393_v27  ;;  %vm362_vm15 = vcmp.gt.f32.partialorder %v330_v0, 0.0 }
  0x4a   : > { %v488_v33 = vadd.f32 %v456_v25, %v424_v31  ;;  %v489_v34 = vadd.f32 %v457_v28, %v425_v32  ;;  %v394_v35 = vmul.f32 0.1, %v330_v0 }
  0x4b   : > { %519 = vst [vmem:[%s864_s20 + $0xe0] sm:$0xff] %v487_v30 }
  0x4c   : > { %520 = vst [vmem:[%s864_s20 + $0xe8] sm:$0xff] %v488_v33  ;;  %521 = vst [vmem:[%s864_s20 + $0xf0] sm:$0xff] %v489_v34  ;;  %v426_v37 = vsel %vm362_vm15, %v330_v0, %v394_v35 }
  0x4d   : > { %v490_v2 = vadd.f32 %v458_v36, %v426_v37 }
  0x4f   : > { %522 = vst [vmem:[%s864_s20 + $0xf8] sm:$0xff] %v490_v2 }
  0x50   : > { %682 = shalt.err (!%p679_p3)
}
  0x51   : > { %s683_s8 = scalar_lea.hbm %s1006_s29, 4096  ;;  %s687_s11 = scalar_lea.hbm %s1058_s4, 8192 }
  0x52   : > { %p684_p4 = scmp.ne.s32.totalorder %s1006_s29, %s683_s8  ;;  %p688_p9 = scmp.lt.u32.totalorder %s1006_s29, %s1058_s4 }
  0x53   : > { %p689_p10 = scmp.lt.u32.totalorder %s687_s11, %s683_s8  ;;  %p691_p12 = scmp.lt.u32.totalorder %s683_s8, %s1006_s29 }
  0x54   : > { %p685_p7 = pnand %p684_p4, %p799_p5 }
  0x55   : > { %p690_p11 = por %p689_p10, %p688_p9 }
  0x56   : > { %p686_p8 = pneg %p685_p7 }
  0x57   : > { %p692_p13 = por %p691_p12, %p690_p11 }
  0x59   : > { %p693_p0 = pnand %p692_p13, %p686_p8 }
  0x5b   : > { %696 = shalt.err (!%p693_p0)
}
  0x5c   : > { %s734_s14 = smov 128   ;;  %s735_s20 = smov 8  }
  0x5d   : > { %628 = dma.vmem_to_hbm [thread:$0]  (%p799_p5), %s1008_s23, 4096, %s1006_s29, %s1013_s19, %s734_s14, %s734_s14, %s735_s20  }
  0x5e PF: > { %p634_p1 = scmp.ge.s32.totalorder %s731_s18, 2  ;;  %s552_s22 = sand.u32 1, %s719_s15  }
  0x5f   : > { %s553_s27 = scalar_lea.sflag [#allocation3], %s552_s22 }
  0x60   : > { %p631_p2 = pnand %p634_p1, %p803_p6 }
  0x62   : > { %714 = dma.done.wait (!%p631_p2), %s553_s27, 4096  }
  0x63   : > { %716 = vsyncadd (!%p631_p2), %s553_s27, 4294963200  ;;  %p14_p3 = scmp.ge.s32.totalorder %s786_s21, 4   ;;  %s1061_s15 = smov %s723_s16 }
  0x64   : > { %s1062_s16 = smov %s727_s17  ;;  %s1063_s17 = smov %s797_s24 }
  0x65   : > { %s1064_s18 = smov %s786_s21  ;;  %16 = sbr.rel (!%p14_p3) target bundleno = 3 (0x3), region = 74 }
  0x6c   :  { %558 = vsyncpa [#allocation3], 1 }
  0x6d   :  { %560 = vsyncpa [#allocation3 + $0x1], 1 }

// kernel: residual_block_forward.12
= control target key start
LH: loop header
LB: loop body
LE: loop exit
PB: predicated region body
PF: predicated region fallthrough
CT: control target
= control target key end

     0   :  { %s1374_s15 = smov 0   ;;  %s1376_s16 = smov 0   ;;  %s1582_s0 = inlined_call_operand.vmem [shape: bf16[512,128], index: 0, kind: input, shape index: {}]   ;;  %s1583_s1 = inlined_call_operand.vmem [shape: bf16[128,128], index: 1, kind: input, shape index: {}]   ;;  %s1584_s2 = inlined_call_operand.vmem [shape: f32[512,128], index: 2, kind: output, shape index: {0}]   ;;  %s1585_s3 = inlined_call_operand.vmem [shape: f32[2,8,128], index: 3, kind: output, shape index: {1}]   ;;  %s1586_s4 = inlined_call_operand.vmem [shape: f32[2,8,128], index: 4, kind: output, shape index: {2}]  }
   0x1   :  { %s1378_s17 = smov 0  }
   0x2 LB: > { %s34_s18 = sadd.s32 1, %s1343_s16  ;;  %p1156_p0 = scmp.ge.s32.totalorder %s1347_s17, 1  ;;  %s1347_s17 = sphi %s1378_s17, %s15_s17   ;;  %s1343_s16 = sphi %s1376_s16, %s1588_s16   ;;  %s1339_s15 = sphi %s1374_s15, %s1587_s15  }
   0x3   : > { %p36_p1 = scmp.ge.s32.totalorder %s34_s18, 2  ;;  %p214_p2 = scmp.lt.s32.totalorder %s1347_s17, 3 }
   0x5   : > { %s1590_s18 = smov (%p36_p1, %s34_s18), 0  ;;  %p215_p3 = pnand %p1156_p0, %p214_p2 }
   0x6   : > { %v1301_v0 = vld [vmem:[%s1583_s1] sm:$0xff] (!%p215_p3)   ;;  %s1157_s21 = sshll.u32 (!%p215_p3), %s1339_s15, 5  ;;  %v1302_v1 = vld [vmem:[%s1583_s1 + $0x8] sm:$0xff] (!%p215_p3)   ;;  %v1303_v2 = vld [vmem:[%s1583_s1 + $0x10] sm:$0xff] (!%p215_p3)   ;;  %p295_p5 = scmp.lt.s32.totalorder (!%p215_p3), %s1339_s15, 1 }
   0x7   : > { %218 = sbr.rel (%p215_p3) target bundleno = 331 (0x14b), region = 28  ;;  %p269_p4 = scmp.lt.s32.totalorder (!%p215_p3), %s1157_s21, 63  ;;  %1213 = vmatprep.subr.bf16.mxu0 (!%p215_p3), %v1301_v0  ;;  %1261 = vmatprep.subr.bf16.mxu1 (!%p215_p3), %v1301_v0  ;;  %v1304_v3 = vld [vmem:[%s1583_s1 + $0x18] sm:$0xff] (!%p215_p3)   ;;  %v1305_v5 = vld [vmem:[%s1583_s1 + $0x20] sm:$0xff] (!%p215_p3)   ;;  %v1306_v6 = vld [vmem:[%s1583_s1 + $0x28] sm:$0xff] (!%p215_p3)  }
   0x8   : > { %1214 = vmatpush3.bf16.msra.mxu0 (!%p215_p3), %v1301_v0  ;;  %1269 = vmatpush3.bf16.msra.mxu1 (!%p215_p3), %v1301_v0  ;;  %v1307_v8 = vld [vmem:[%s1583_s1 + $0x30] sm:$0xff] (!%p215_p3)   ;;  %v1308_v9 = vld [vmem:[%s1583_s1 + $0x38] sm:$0xff] (!%p215_p3)  }
   0x9   : > { %1215 = vmatprep.subr.bf16.mxu0 (!%p215_p3), %v1302_v1  ;;  %1262 = vmatprep.subr.bf16.mxu1 (!%p215_p3), %v1302_v1 }
   0xc   : > { %1216 = vmatpush3.bf16.msra.mxu0 (!%p215_p3), %v1302_v1  ;;  %1270 = vmatpush3.bf16.msra.mxu1 (!%p215_p3), %v1302_v1 }
   0xd   : > { %1217 = vmatprep.subr.bf16.mxu0 (!%p215_p3), %v1303_v2  ;;  %1263 = vmatprep.subr.bf16.mxu1 (!%p215_p3), %v1303_v2 }
   0xe   : > { %s1592_s21 = smov (!%p269_p4, %s1157_s21), 63  ;;  %s1594_s15 = smov (!%p295_p5, %s1339_s15), 1 }
   0xf   : > { %s1158_s26 = sshll.u32 %s1592_s21, 2  ;;  %s1160_s14 = sshll.u32 %s1592_s21, 3 }
  0x10   : > { %s1410_s29 = scalar_lea.vmem %s1582_s0, %s1158_s26  ;;  %1218 = vmatpush3.bf16.msra.mxu0 %v1303_v2  ;;  %1271 = vmatpush3.bf16.msra.mxu1 %v1303_v2  ;;  %s1447_s22 = scalar_lea.vmem %s1584_s2, %s1160_s14 }
  0x11   : > { %v1309_v4 = vld [vmem:[%s1410_s29] sm:$0xff]   ;;  %1219 = vmatprep.subr.bf16.mxu0 %v1304_v3  ;;  %1264 = vmatprep.subr.bf16.mxu1 %v1304_v3  ;;  %v1310_v10 = vld [vmem:[%s1410_s29 + $0x8] sm:$0xff]   ;;  %v1311_v12 = vld [vmem:[%s1410_s29 + $0x10] sm:$0xff]   ;;  %s1161_s21 = sshll.u32 %s1594_s15, 3 }
  0x12   : > { %1229 = vmatprep.mubr.bf16.mxu0 %v1309_v4  ;;  %v1317_v7 = vld [vmem:[%s1410_s29 + $0x40] sm:$0xff]   ;;  %v1318_v11 = vld [vmem:[%s1410_s29 + $0x48] sm:$0xff]   ;;  %v1319_v13 = vld [vmem:[%s1410_s29 + $0x50] sm:$0xff]   ;;  %s301_s25 = scalar_lea.vmem %s1585_s3, %s1161_s21  ;;  %s308_s28 = scalar_lea.vmem %s1586_s4, %s1161_s21 }
  0x13   : > { %1245 = vmatprep.mubr.bf16.mxu1 %v1317_v7  ;;  %v1312_v14 = vld [vmem:[%s1410_s29 + $0x18] sm:$0xff]   ;;  %v1313_v16 = vld [vmem:[%s1410_s29 + $0x20] sm:$0xff]   ;;  %v1314_v18 = vld [vmem:[%s1410_s29 + $0x28] sm:$0xff]  }
  0x14   : > { %1220 = vmatpush3.bf16.msra.mxu0 %v1304_v3  ;;  %1272 = vmatpush3.bf16.msra.mxu1 %v1304_v3  ;;  %v1320_v15 = vld [vmem:[%s1410_s29 + $0x58] sm:$0xff]   ;;  %v1321_v17 = vld [vmem:[%s1410_s29 + $0x60] sm:$0xff]   ;;  %v1322_v19 = vld [vmem:[%s1410_s29 + $0x68] sm:$0xff]  }
  0x15   : > { %1221 = vmatprep.subr.bf16.mxu0 %v1305_v5  ;;  %1265 = vmatprep.subr.bf16.mxu1 %v1305_v5  ;;  %v1315_v20 = vld [vmem:[%s1410_s29 + $0x30] sm:$0xff]   ;;  %v1316_v22 = vld [vmem:[%s1410_s29 + $0x38] sm:$0xff]  }
  0x16   : > { %v1323_v21 = vld [vmem:[%s1410_s29 + $0x70] sm:$0xff]   ;;  %v1324_v23 = vld [vmem:[%s1410_s29 + $0x78] sm:$0xff]  }
  0x18   : > { %1222 = vmatpush3.bf16.msra.mxu0 %v1305_v5  ;;  %1273 = vmatpush3.bf16.msra.mxu1 %v1305_v5 }
  0x19   : > { %1223 = vmatprep.subr.bf16.mxu0 %v1306_v6  ;;  %1266 = vmatprep.subr.bf16.mxu1 %v1306_v6 }
  0x1c   : > { %1224 = vmatpush3.bf16.msra.mxu0 %v1306_v6  ;;  %1274 = vmatpush3.bf16.msra.mxu1 %v1306_v6 }
  0x1d   : > { %1225 = vmatprep.subr.bf16.mxu0 %v1307_v8  ;;  %1267 = vmatprep.subr.bf16.mxu1 %v1307_v8 }
  0x20   : > { %1226 = vmatpush3.bf16.msra.mxu0 %v1307_v8  ;;  %1275 = vmatpush3.bf16.msra.mxu1 %v1307_v8 }
  0x21   : > { %1227 = vmatprep.subr.bf16.mxu0 %v1308_v9  ;;  %1268 = vmatprep.subr.bf16.mxu1 %v1308_v9 }
  0x24   : > { %1228 = vmatpush3.bf16.msra.mxu0 %v1308_v9  ;;  %1276 = vmatpush3.bf16.msra.mxu1 %v1308_v9 }
  0x27   : > { %1230 = vmatmul.mubr.bf16.vlgmr.msra.gmra.mrb[0].mxu0 %v1310_v10  ;;  %1246 = vmatmul.mubr.bf16.vlgmr.msra.gmra.mrb[0].mxu1 %v1318_v11 }
  0x28   : > { %1233 = vmatprep.mubr.bf16.mxu0 %v1311_v12  ;;  %1249 = vmatprep.mubr.bf16.mxu1 %v1319_v13 }
  0x2f   : > { %1234 = vmatmul.mubr.bf16.gmra.mrb[4].mxu0 %v1312_v14  ;;  %1250 = vmatmul.mubr.bf16.gmra.mrb[4].mxu1 %v1320_v15 }
  0x30   : > { %1237 = vmatprep.mubr.bf16.mxu0 %v1313_v16  ;;  %1253 = vmatprep.mubr.bf16.mxu1 %v1321_v17 }
  0x37   : > { %1238 = vmatmul.mubr.bf16.gmra.mrb[8].mxu0 %v1314_v18  ;;  %1254 = vmatmul.mubr.bf16.gmra.mrb[8].mxu1 %v1322_v19 }
  0x38   : > { %1241 = vmatprep.mubr.bf16.mxu0 %v1315_v20  ;;  %1257 = vmatprep.mubr.bf16.mxu1 %v1323_v21 }
  0x3f   : > { %1242 = vmatmul.mubr.bf16.gmra.mrb[12].mxu0 %v1316_v22  ;;  %1258 = vmatmul.mubr.bf16.gmra.mrb[12].mxu1 %v1324_v23 }
  0xfa   : > { %v1231_v24 = vpop.f32.mrb[0].mxu0  ;;  %v1449_v25 = vpop.f32.mrb[0].mxu1 }
  0xfb   : > { %832 = vst [vmem:[%s1447_s22 + $0x10] sm:$0xff] %v1231_v24  ;;  %v604_v26 = vpop.f32.mrb[1].mxu0  ;;  %848 = vst [vmem:[%s1447_s22 + $0x90] sm:$0xff] %v1449_v25  ;;  %v1454_v27 = vpop.f32.mrb[1].mxu1  ;;  %v901_v35 = vmul.f32 %v1231_v24, %v1231_v24 }
  0xfc   : > { %830 = vst [vmem:[%s1447_s22] sm:$0xff] %v604_v26  ;;  %v1232_v28 = vpop.f32.mrb[2].mxu0  ;;  %846 = vst [vmem:[%s1447_s22 + $0x80] sm:$0xff] %v1454_v27  ;;  %v1459_v29 = vpop.f32.mrb[2].mxu1  ;;  %v899_v32 = vmul.f32 %v604_v26, %v604_v26 }
  0xfd   : > { %833 = vst [vmem:[%s1447_s22 + $0x18] sm:$0xff] %v1232_v28  ;;  %v607_v30 = vpop.f32.mrb[3].mxu0  ;;  %849 = vst [vmem:[%s1447_s22 + $0x98] sm:$0xff] %v1459_v29  ;;  %v1464_v31 = vpop.f32.mrb[3].mxu1  ;;  %v902_v38 = vmul.f32 %v1232_v28, %v1232_v28 }
  0xfe   : > { %831 = vst [vmem:[%s1447_s22 + $0x8] sm:$0xff] %v607_v30  ;;  %v862_v33 = vadd.f32 %v607_v30, %v604_v26  ;;  %v900_v34 = vmul.f32 %v607_v30, %v607_v30  ;;  %847 = vst [vmem:[%s1447_s22 + $0x88] sm:$0xff] %v1464_v31 }
 0x100   : > { %v863_v36 = vadd.f32 %v1231_v24, %v862_v33  ;;  %v931_v37 = vadd.f32 %v900_v34, %v899_v32 }
 0x102   : > { %v932_v39 = vadd.f32 %v931_v37, %v901_v35  ;;  %v1235_v40 = vpop.f32.mrb[4].mxu0  ;;  %v864_v41 = vadd.f32 %v1232_v28, %v863_v36  ;;  %v1469_v42 = vpop.f32.mrb[4].mxu1 }
 0x103   : > { %836 = vst [vmem:[%s1447_s22 + $0x30] sm:$0xff] %v1235_v40  ;;  %v620_v43 = vpop.f32.mrb[5].mxu0  ;;  %852 = vst [vmem:[%s1447_s22 + $0xb0] sm:$0xff] %v1469_v42  ;;  %v1474_v44 = vpop.f32.mrb[5].mxu1  ;;  %v905_v55 = vmul.f32 %v1235_v40, %v1235_v40 }
 0x104   : > { %834 = vst [vmem:[%s1447_s22 + $0x20] sm:$0xff] %v620_v43  ;;  %v865_v45 = vadd.f32 %v864_v41, %v620_v43  ;;  %v903_v46 = vmul.f32 %v620_v43, %v620_v43  ;;  %v933_v47 = vadd.f32 %v932_v39, %v902_v38  ;;  %v1236_v48 = vpop.f32.mrb[6].mxu0  ;;  %850 = vst [vmem:[%s1447_s22 + $0xa0] sm:$0xff] %v1474_v44  ;;  %v1479_v49 = vpop.f32.mrb[6].mxu1 }
 0x105   : > { %837 = vst [vmem:[%s1447_s22 + $0x38] sm:$0xff] %v1236_v48  ;;  %v623_v50 = vpop.f32.mrb[7].mxu0  ;;  %853 = vst [vmem:[%s1447_s22 + $0xb8] sm:$0xff] %v1479_v49  ;;  %v1484_v51 = vpop.f32.mrb[7].mxu1  ;;  %v906_v58 = vmul.f32 %v1236_v48, %v1236_v48  ;;  %v915_v41 = vmul.f32 %v1454_v27, %v1454_v27 }
 0x106   : > { %v934_v52 = vadd.f32 %v933_v47, %v903_v46  ;;  %835 = vst [vmem:[%s1447_s22 + $0x28] sm:$0xff] %v623_v50  ;;  %v866_v53 = vadd.f32 %v865_v45, %v623_v50  ;;  %v904_v54 = vmul.f32 %v623_v50, %v623_v50  ;;  %851 = vst [vmem:[%s1447_s22 + $0xa8] sm:$0xff] %v1484_v51 }
 0x107   : > { %v917_v50 = vmul.f32 %v1449_v25, %v1449_v25 }
 0x108   : > { %v867_v56 = vadd.f32 %v1235_v40, %v866_v53  ;;  %v935_v57 = vadd.f32 %v934_v52, %v904_v54  ;;  %v918_v54 = vmul.f32 %v1459_v29, %v1459_v29 }
 0x10a   : > { %v936_v59 = vadd.f32 %v935_v57, %v905_v55  ;;  %v1239_v60 = vpop.f32.mrb[8].mxu0  ;;  %v868_v61 = vadd.f32 %v1236_v48, %v867_v56  ;;  %v1489_v62 = vpop.f32.mrb[8].mxu1  ;;  %v916_v48 = vmul.f32 %v1464_v31, %v1464_v31 }
 0x10b   : > { %840 = vst [vmem:[%s1447_s22 + $0x50] sm:$0xff] %v1239_v60  ;;  %v636_v63 = vpop.f32.mrb[9].mxu0  ;;  %856 = vst [vmem:[%s1447_s22 + $0xd0] sm:$0xff] %v1489_v62  ;;  %v1494_v0 = vpop.f32.mrb[9].mxu1  ;;  %v909_v11 = vmul.f32 %v1239_v60, %v1239_v60 }
 0x10c   : > { %838 = vst [vmem:[%s1447_s22 + $0x40] sm:$0xff] %v636_v63  ;;  %v869_v1 = vadd.f32 %v868_v61, %v636_v63  ;;  %v907_v2 = vmul.f32 %v636_v63, %v636_v63  ;;  %v937_v3 = vadd.f32 %v936_v59, %v906_v58  ;;  %v1240_v4 = vpop.f32.mrb[10].mxu0  ;;  %854 = vst [vmem:[%s1447_s22 + $0xc0] sm:$0xff] %v1494_v0  ;;  %v1499_v5 = vpop.f32.mrb[10].mxu1 }
 0x10d   : > { %841 = vst [vmem:[%s1447_s22 + $0x58] sm:$0xff] %v1240_v4  ;;  %v639_v6 = vpop.f32.mrb[11].mxu0  ;;  %857 = vst [vmem:[%s1447_s22 + $0xd8] sm:$0xff] %v1499_v5  ;;  %v1504_v7 = vpop.f32.mrb[11].mxu1  ;;  %v910_v14 = vmul.f32 %v1240_v4, %v1240_v4 }
 0x10e   : > { %v938_v8 = vadd.f32 %v937_v3, %v907_v2  ;;  %839 = vst [vmem:[%s1447_s22 + $0x48] sm:$0xff] %v639_v6  ;;  %v870_v9 = vadd.f32 %v869_v1, %v639_v6  ;;  %v908_v10 = vmul.f32 %v639_v6, %v639_v6  ;;  %855 = vst [vmem:[%s1447_s22 + $0xc8] sm:$0xff] %v1504_v7 }
 0x110   : > { %v871_v12 = vadd.f32 %v1239_v60, %v870_v9  ;;  %v939_v13 = vadd.f32 %v938_v8, %v908_v10  ;;  %v920_v60 = vmul.f32 %v1484_v51, %v1484_v51  ;;  %v924_v8 = vmul.f32 %v1504_v7, %v1504_v7 }
 0x112   : > { %v940_v15 = vadd.f32 %v939_v13, %v909_v11  ;;  %v1243_v16 = vpop.f32.mrb[12].mxu0  ;;  %v872_v17 = vadd.f32 %v1240_v4, %v871_v12  ;;  %v1509_v18 = vpop.f32.mrb[12].mxu1 }
 0x113   : > { %844 = vst [vmem:[%s1447_s22 + $0x70] sm:$0xff] %v1243_v16  ;;  %v652_v19 = vpop.f32.mrb[13].mxu0  ;;  %860 = vst [vmem:[%s1447_s22 + $0xf0] sm:$0xff] %v1509_v18  ;;  %v716_v20 = vpop.f32.mrb[13].mxu1  ;;  %v913_v35 = vmul.f32 %v1243_v16, %v1243_v16 }
 0x114   : > { %842 = vst [vmem:[%s1447_s22 + $0x60] sm:$0xff] %v652_v19  ;;  %v873_v21 = vadd.f32 %v872_v17, %v652_v19  ;;  %v911_v22 = vmul.f32 %v652_v19, %v652_v19  ;;  %v941_v23 = vadd.f32 %v940_v15, %v910_v14  ;;  %v1244_v24 = vpop.f32.mrb[14].mxu0  ;;  %858 = vst [vmem:[%s1447_s22 + $0xe0] sm:$0xff] %v716_v20  ;;  %v1516_v26 = vpop.f32.mrb[14].mxu1 }
 0x115   : > { %845 = vst [vmem:[%s1447_s22 + $0x78] sm:$0xff] %v1244_v24  ;;  %v655_v28 = vpop.f32.mrb[15].mxu0  ;;  %861 = vst [vmem:[%s1447_s22 + $0xf8] sm:$0xff] %v1516_v26  ;;  %v719_v30 = vpop.f32.mrb[15].mxu1  ;;  %v914_v38 = vmul.f32 %v1244_v24, %v1244_v24  ;;  %v927_v12 = vmul.f32 %v716_v20, %v716_v20  ;;  %v929_v17 = vmul.f32 %v1509_v18, %v1509_v18 }
 0x116   : > { %v942_v32 = vadd.f32 %v941_v23, %v911_v22  ;;  %843 = vst [vmem:[%s1447_s22 + $0x68] sm:$0xff] %v655_v28  ;;  %v874_v33 = vadd.f32 %v873_v21, %v655_v28  ;;  %v912_v34 = vmul.f32 %v655_v28, %v655_v28  ;;  %859 = vst [vmem:[%s1447_s22 + $0xe8] sm:$0xff] %v719_v30 }
 0x117   : > { %v930_v21 = vmul.f32 %v1516_v26, %v1516_v26 }
 0x118   : > { %v875_v36 = vadd.f32 %v1243_v16, %v874_v33  ;;  %v943_v37 = vadd.f32 %v942_v32, %v912_v34 }
 0x11a   : > { %v944_v39 = vadd.f32 %v943_v37, %v913_v35  ;;  %v876_v40 = vadd.f32 %v1244_v24, %v875_v36 }
 0x11c   : > { %v877_v43 = vadd.f32 %v876_v40, %v1454_v27  ;;  %v945_v45 = vadd.f32 %v944_v39, %v914_v38  ;;  %v919_v27 = vmul.f32 %v1474_v44, %v1474_v44 }
 0x11e   : > { %v946_v46 = vadd.f32 %v945_v45, %v915_v41  ;;  %v878_v47 = vadd.f32 %v877_v43, %v1464_v31 }
 0x120   : > { %v879_v52 = vadd.f32 %v1449_v25, %v878_v47  ;;  %v947_v53 = vadd.f32 %v946_v46, %v916_v48  ;;  %v921_v25 = vmul.f32 %v1469_v42, %v1469_v42 }
 0x122   : > { %v948_v55 = vadd.f32 %v947_v53, %v917_v50  ;;  %v880_v56 = vadd.f32 %v1459_v29, %v879_v52  ;;  %v922_v29 = vmul.f32 %v1479_v49, %v1479_v49 }
 0x124   : > { %v881_v57 = vadd.f32 %v880_v56, %v1474_v44  ;;  %v949_v58 = vadd.f32 %v948_v55, %v918_v54  ;;  %v923_v44 = vmul.f32 %v1494_v0, %v1494_v0 }
 0x126   : > { %v950_v59 = vadd.f32 %v949_v58, %v919_v27  ;;  %v882_v31 = vadd.f32 %v881_v57, %v1484_v51 }
 0x128   : > { %v883_v61 = vadd.f32 %v1469_v42, %v882_v31  ;;  %v951_v63 = vadd.f32 %v950_v59, %v920_v60  ;;  %v925_v42 = vmul.f32 %v1489_v62, %v1489_v62 }
 0x12a   : > { %v952_v1 = vadd.f32 %v951_v63, %v921_v25  ;;  %v884_v2 = vadd.f32 %v1479_v49, %v883_v61  ;;  %v926_v49 = vmul.f32 %v1499_v5, %v1499_v5 }
 0x12c   : > { %v885_v3 = vadd.f32 %v884_v2, %v1494_v0  ;;  %v953_v4 = vadd.f32 %v952_v1, %v922_v29 }
 0x12e   : > { %v954_v6 = vadd.f32 %v953_v4, %v923_v44  ;;  %v886_v51 = vadd.f32 %v885_v3, %v1504_v7  ;;  %v928_v7 = vmul.f32 %v719_v30, %v719_v30 }
 0x130   : > { %v887_v9 = vadd.f32 %v1489_v62, %v886_v51  ;;  %v955_v10 = vadd.f32 %v954_v6, %v924_v8 }
 0x132   : > { %v956_v11 = vadd.f32 %v955_v10, %v925_v42  ;;  %v888_v0 = vadd.f32 %v1499_v5, %v887_v9 }
 0x134   : > { %v889_v13 = vadd.f32 %v888_v0, %v716_v20  ;;  %v957_v14 = vadd.f32 %v956_v11, %v926_v49 }
 0x136   : > { %v958_v15 = vadd.f32 %v957_v14, %v927_v12  ;;  %v890_v16 = vadd.f32 %v889_v13, %v719_v30 }
 0x138   : > { %v891_v19 = vadd.f32 %v1509_v18, %v890_v16  ;;  %v959_v62 = vadd.f32 %v958_v15, %v928_v7 }
 0x13a   : > { %v892_v22 = vadd.f32 %v1516_v26, %v891_v19  ;;  %v960_v5 = vadd.f32 %v959_v62, %v929_v17 }
 0x13c   : > { %v893_v23 = vrot.slane %v892_v22, 4  ;;  %v961_v24 = vadd.f32 %v960_v5, %v930_v21 }
 0x13e   : > { %v894_v20 = vadd.f32 %v893_v23, %v892_v22  ;;  %v962_v28 = vrot.slane %v961_v24, 4 }
 0x140   : > { %v895_v32 = vrot.slane %v894_v20, 2  ;;  %v963_v30 = vadd.f32 %v962_v28, %v961_v24 }
 0x142   : > { %v896_v33 = vadd.f32 %v895_v32, %v894_v20  ;;  %v964_v34 = vrot.slane %v963_v30, 2 }
 0x144   : > { %v897_v35 = vrot.slane %v896_v33, 1  ;;  %v965_v18 = vadd.f32 %v964_v34, %v963_v30 }
 0x146   : > { %v898_v36 = vadd.f32 %v897_v35, %v896_v33  ;;  %v966_v37 = vrot.slane %v965_v18, 1 }
 0x148   : > { %v967_v26 = vadd.f32 %v966_v37, %v965_v18  ;;  %968 = vst [vmem:[%s301_s25] sm:$0xff] %v898_v36 }
 0x14a   : > { %969 = vst [vmem:[%s308_s28] sm:$0xff] %v967_v26 }
 0x14b PF: > { %s15_s17 = sadd.s32 1, %s1347_s17   ;;  %s1587_s15 = smov %s1343_s16 }
 0x14c   : > { %p12_p6 = scmp.ge.s32.totalorder %s15_s17, 4   ;;  %s1588_s16 = smov %s1590_s18 }
 0x14e   :  { %14 = sbr.rel (!%p12_p6) target bundleno = 2 (0x2), region = 93 }

</bundles_post_ra>
